<compile_context>
chip_gen: v5e
topology: v5e:2x2
jax: 0.10.0
libtpu: 0.0.40
codegen_flags: <defaults>
</compile_context>

<pallas_src>
import functools

import jax
import jax.numpy as jnp
from jax.experimental import pallas as pl
from jax.experimental.pallas import tpu as pltpu

EPS = 1e-5                       # torch InstanceNorm3d default eps
VMEM_LIMIT = 32 * 1024 * 1024    # >= scoped-VMEM default on v5e/v6e/v7x


# ---------------------------------------------------------------------------
# Conv kernel: depth-scan implicit GEMM with fused bias / IN stats / prev-IN
# ---------------------------------------------------------------------------
def _conv3d_scan_kernel(x_ref, w_ref, b_ref, sc_ref, sh_ref, y_ref, st_ref,
                        pad_ref, acc_ref, *, D, H, W, C, pre_relu):
    """One grid step = one input depth plane (plus one epilogue step).

    x_ref  : (1, 1, H, W, C)  raw input plane d (clamped to D-1 on epilogue)
    w_ref  : (9C, 3C)         bf16 GEMM weights; rows=(kh,kw,cin), cols=(kd,cout)
    b_ref  : (1, C)           f32 bias
    sc_ref : (1, 1, C)        fused per-(n,c) pre-scale  (rstd of prev IN, or 1)
    sh_ref : (1, 1, C)        fused per-(n,c) pre-shift  (-mean*rstd, or 0)
    y_ref  : (1, 1, H, W, C)  bf16 conv output plane d-1 (pre-norm, incl. bias)
    st_ref : (1, 2, C)        f32 running [sum; sum_sq] over (d, h, w)
    pad_ref: (H+2, W+2, C)    bf16 scratch: transformed + zero-padded plane
    acc_ref: (3, H*W, C)      f32 scratch: ring accumulator over output planes
    """
    d = pl.program_id(1)
    HW = H * W

    # Fresh sample: reset ring accumulator, stats, and the padded-plane halo.
    @pl.when(d == 0)
    def _init():
        acc_ref[...] = jnp.zeros_like(acc_ref)
        st_ref[...] = jnp.zeros_like(st_ref)
        pad_ref[...] = jnp.zeros_like(pad_ref)

    # ---- Phase 1: scatter input plane d into the ring (skipped on epilogue).
    @pl.when(d < D)
    def _process():
        # Pre-transform once per input plane: previous IN (+ReLU), bf16 cast.
        x = x_ref[0, 0].astype(jnp.float32)              # (H, W, C)
        x = x * sc_ref[0] + sh_ref[0]
        if pre_relu:
            x = jnp.maximum(x, 0.0)
        pad_ref[1:H + 1, 1:W + 1, :] = x.astype(jnp.bfloat16)

        # im2col in VMEM: (H*W, 9C) lhs; one MXU matmul with K=9C, N=3C.
        taps = [pad_ref[kh:kh + H, kw:kw + W, :].reshape(HW, C)
                for kh in range(3) for kw in range(3)]
        lhs = jnp.concatenate(taps, axis=1)              # (HW, 9C) bf16
        out = jnp.dot(lhs, w_ref[...],
                      preferred_element_type=jnp.float32)  # (HW, 3C) f32

        # Column chunk kd contributes to output plane (d + 1 - kd).
        acc_ref[d % 3] += out[:, C:2 * C]                # kd=1 -> plane d

        @pl.when(d < D - 1)
        def _():                                         # kd=0 -> plane d+1
            acc_ref[(d + 1) % 3] += out[:, 0:C]

        @pl.when(d > 0)
        def _():                                         # kd=2 -> plane d-1
            acc_ref[(d + 2) % 3] += out[:, 2 * C:3 * C]

    # ---- Phase 2: output plane d-1 is complete -> bias, stats, store, reuse.
    @pl.when(d > 0)
    def _finalize():
        slot = (d + 2) % 3                               # == (d - 1) % 3
        yf = acc_ref[slot] + b_ref[...]                  # (HW, C) f32
        y_ref[...] = yf.reshape(1, 1, H, W, C).astype(y_ref.dtype)
        upd = jnp.concatenate(
            [jnp.sum(yf, axis=0, keepdims=True),
             jnp.sum(yf * yf, axis=0, keepdims=True)], axis=0)[None]  # (1,2,C)
        st_ref[...] = st_ref[...] + upd
        acc_ref[slot] = jnp.zeros((HW, C), jnp.float32)


def _in_residual_kernel(y_ref, r_ref, sc_ref, sh_ref, o_ref):
    # out = IN(y) + residual == y*scale + shift + r, on lane-folded layout.
    y = y_ref[...].astype(jnp.float32)                   # (1, D, H*W*C)
    o = y * sc_ref[...] + sh_ref[...] + r_ref[...]
    o_ref[...] = o.astype(o_ref.dtype)


# ---------------------------------------------------------------------------
# pallas_call wrappers
# ---------------------------------------------------------------------------
def _conv3d_in_fused(x, w_gemm, b, scale, shift, *, pre_relu):
    """x: (N, D, H, W, C) unpadded activations (f32 or bf16).

    Returns (y, stats): y (N, D, H, W, C) bf16 conv output (bias included,
    pre-norm); stats (N, 2, C) f32 per-(n,c) [sum, sum_sq] over (d, h, w).
    """
    N, D, H, W, C = x.shape
    kern = functools.partial(_conv3d_scan_kernel, D=D, H=H, W=W, C=C,
                             pre_relu=pre_relu)
    y, stats = pl.pallas_call(
        kern,
        out_shape=(jax.ShapeDtypeStruct((N, D, H, W, C), jnp.bfloat16),
                   jax.ShapeDtypeStruct((N, 2, C), jnp.float32)),
        grid=(N, D + 1),
        in_specs=[
            # Each input plane is fetched exactly once; the epilogue step
            # revisits the clamped index D-1 (no extra DMA).
            pl.BlockSpec((1, 1, H, W, C),
                         lambda n, d: (n, jnp.minimum(d, D - 1), 0, 0, 0)),
            pl.BlockSpec((9 * C, 3 * C), lambda n, d: (0, 0)),
            pl.BlockSpec((1, C), lambda n, d: (0, 0)),
            pl.BlockSpec((1, 1, C), lambda n, d: (n, 0, 0)),
            pl.BlockSpec((1, 1, C), lambda n, d: (n, 0, 0)),
        ],
        out_specs=(
            pl.BlockSpec((1, 1, H, W, C),
                         lambda n, d: (n, jnp.maximum(d - 1, 0), 0, 0, 0)),
            pl.BlockSpec((1, 2, C), lambda n, d: (n, 0, 0)),
        ),
        scratch_shapes=[pltpu.VMEM((H + 2, W + 2, C), jnp.bfloat16),
                        pltpu.VMEM((3, H * W, C), jnp.float32)],
        compiler_params=pltpu.CompilerParams(
            dimension_semantics=("parallel", "arbitrary"),
            vmem_limit_bytes=VMEM_LIMIT),
    )(x, w_gemm, b, scale, shift)
    return y, stats


def _in_residual_apply(y, resid, scale, shift):
    """Lane-folded IN-normalize + residual add.

    y      : (N, D, F) bf16, F = H*W*C (pre-norm conv2 output)
    resid  : (N, D, F) f32
    scale, shift : (N, 1, F) f32 (per-channel affine tiled along H*W)
    """
    N, D, F = y.shape
    blk = pl.BlockSpec((1, D, F), lambda n: (n, 0, 0))
    aff = pl.BlockSpec((1, 1, F), lambda n: (n, 0, 0))
    return pl.pallas_call(
        _in_residual_kernel,
        out_shape=jax.ShapeDtypeStruct((N, D, F), jnp.float32),
        grid=(N,),
        in_specs=[blk, blk, aff, aff],
        out_specs=blk,
        compiler_params=pltpu.CompilerParams(
            dimension_semantics=("parallel",),
            vmem_limit_bytes=VMEM_LIMIT),
    )(y, resid, scale, shift)


# ---------------------------------------------------------------------------
# Glue (tiny JAX ops: (N,C)-sized stats math, weight relayout, reshapes)
# ---------------------------------------------------------------------------
def _stats_to_affine(stats, count):
    # stats: (N, 2, C) -> scale = rstd, shift = -mean*rstd, each (N, 1, C).
    # NOTE: E[x^2]-E[x]^2 in f32 is fine at these sizes; switch to two-pass /
    # compensated sums if D*H*W grows very large (review concern).
    s1 = stats[:, 0:1, :]
    s2 = stats[:, 1:2, :]
    mean = s1 / count
    var = jnp.maximum(s2 / count - mean * mean, 0.0)     # biased, like torch IN
    rstd = jax.lax.rsqrt(var + EPS)
    return rstd, -mean * rstd


def _to_gemm_weight(w):
    # (kd, kh, kw, ci, co) -> rows (kh, kw, ci), cols (kd, co): (9C, 3C) bf16
    kd, kh, kw, ci, co = w.shape
    return (jnp.transpose(w, (1, 2, 3, 0, 4))
            .reshape(kh * kw * ci, kd * co).astype(jnp.bfloat16))


def res_block_forward(x, p):
    # x: (N, D, H, W, C) float32
    N, D, H, W, C = x.shape
    P = D * H * W
    ones = jnp.ones((N, 1, C), jnp.float32)
    zeros = jnp.zeros((N, 1, C), jnp.float32)

    # conv1 (identity pre-transform) + fused bias + IN stats
    y1, st1 = _conv3d_in_fused(x, _to_gemm_weight(p["w1"]), p["b1"],
                               ones, zeros, pre_relu=False)
    sc1, sh1 = _stats_to_affine(st1, P)

    # conv2: IN(y1) + ReLU fused into the load transform; fused bias + IN stats
    y2, st2 = _conv3d_in_fused(y1, _to_gemm_weight(p["w2"]), p["b2"],
                               sc1, sh1, pre_relu=True)
    sc2, sh2 = _stats_to_affine(st2, P)

    # out = x + IN(y2), lane-folded so stores are dense even when C < 128.
    # NOTE: could be fused into the next block's conv1 load (saves one HBM
    # read per block); kept standalone for clarity.
    out = _in_residual_apply(
        y2.reshape(N, D, H * W * C),
        x.reshape(N, D, H * W * C),
        jnp.tile(sc2, (1, 1, H * W)),
        jnp.tile(sh2, (1, 1, H * W)))
    return out.reshape(N, D, H, W, C)


def res_blocks_forward(x_ncdhw, params):
    # PyTorch NCDHW in/out; kernels run channels-last NDHWC.
    x = jnp.transpose(x_ncdhw, (0, 2, 3, 4, 1)).astype(jnp.float32)
    for p in params:
        x = res_block_forward(x, p)
    return jnp.transpose(x, (0, 4, 1, 2, 3))


# ---------------------------------------------------------------------------
# Deterministic parameter init (shapes from nn.Conv3d(dim, dim, 3, 1))
# ---------------------------------------------------------------------------
def init_params(key, num_blocks, dim):
    params = []
    fan_in = dim * 27
    bound = 1.0 / (fan_in ** 0.5)
    for i in range(num_blocks):
        k = jax.random.fold_in(key, i)
        k1, k2, k3, k4 = jax.random.split(k, 4)
        w1 = jax.random.uniform(k1, (3, 3, 3, dim, dim), jnp.float32, -bound, bound)
        b1 = jax.random.uniform(k2, (1, dim), jnp.float32, -bound, bound)
        w2 = jax.random.uniform(k3, (3, 3, 3, dim, dim), jnp.float32, -bound, bound)
        b2 = jax.random.uniform(k4, (1, dim), jnp.float32, -bound, bound)
        params.append(dict(w1=w1, b1=b1, w2=w2, b2=b2))
    return params


# ---------------------------------------------------------------------------
# Pure-JAX reference. compute_dtype emulates the kernel's bf16 MXU operands;
# storage_dtype emulates the bf16 HBM storage of conv intermediates.  Defaults
# give the exact f32 module semantics.
# ---------------------------------------------------------------------------
def ref_forward(x_ncdhw, params, compute_dtype=jnp.float32,
                storage_dtype=jnp.float32):
    x = jnp.transpose(x_ncdhw, (0, 2, 3, 4, 1)).astype(jnp.float32)
    dn = ("NDHWC", "DHWIO", "NDHWC")

    def conv(z, w, b):
        y = jax.lax.conv_general_dilated(
            z.astype(compute_dtype), w.astype(compute_dtype),
            (1, 1, 1), "SAME", dimension_numbers=dn,
            preferred_element_type=jnp.float32)
        return (y + b).astype(storage_dtype).astype(jnp.float32)

    def inorm(z):
        m = jnp.mean(z, axis=(1, 2, 3), keepdims=True)
        v = jnp.mean((z - m) ** 2, axis=(1, 2, 3), keepdims=True)
        return (z - m) * jax.lax.rsqrt(v + EPS)

    for p in params:
        y = jnp.maximum(inorm(conv(x, p["w1"], p["b1"])), 0.0)
        y = inorm(conv(y, p["w2"], p["b2"]))
        x = x + y
    return jnp.transpose(x, (0, 4, 1, 2, 3))


if __name__ == "__main__":
    key = jax.random.PRNGKey(0)
    kx, kp = jax.random.split(key)

    # Small shapes consistent with Conv3d forward: (N, C, D, H, W)
    N, C, D, H, W = 2, 8, 4, 8, 8
    num_blocks = 2

    x = jax.random.normal(kx, (N, C, D, H, W), jnp.float32)
    params = init_params(kp, num_blocks, C)

    fwd = jax.jit(res_blocks_forward)
    out = jax.block_until_ready(fwd(x, params))
    assert out.shape == (N, C, D, H, W)
    assert bool(jnp.all(jnp.isfinite(out)))

    # 1) Tight check vs a precision-matched reference (bf16 matmul operands,
    #    bf16 intermediate storage, f32 accumulation / norm math) ->
    #    differences are accumulation-order only.
    ref_bf = ref_forward(x, params, compute_dtype=jnp.bfloat16,
                         storage_dtype=jnp.bfloat16)
    err_bf = float(jnp.max(jnp.abs(out - ref_bf)))
    assert jnp.allclose(out, ref_bf, atol=2e-2, rtol=2e-2), (
        f"mismatch vs precision-matched reference: {err_bf}")

    # 2) Loose check vs the full-f32 module semantics.
    ref32 = ref_forward(x, params)
    err32 = float(jnp.max(jnp.abs(out - ref32)))
    assert err32 < 0.25, f"too far from f32 reference: {err32}"

    print("KERNEL_OK")
</pallas_src>

<mosaic_0001>
module attributes {stable_mosaic.version = 11 : i64} {
  func.func @_conv3d_scan_kernel(%arg0: i32, %arg1: i32, %arg2: memref<1x1x8x8x8xf32, #tpu.memory_space<vmem>>, %arg3: memref<72x24xbf16, #tpu.memory_space<vmem>>, %arg4: memref<1x8xf32, #tpu.memory_space<vmem>>, %arg5: memref<1x1x8xf32, #tpu.memory_space<vmem>>, %arg6: memref<1x1x8xf32, #tpu.memory_space<vmem>>, %arg7: memref<1x1x8x8x8xbf16, #tpu.memory_space<vmem>>, %arg8: memref<1x2x8xf32, #tpu.memory_space<vmem>>, %arg9: memref<10x10x8xbf16, #tpu.memory_space<vmem>>, %arg10: memref<3x64x8xf32, #tpu.memory_space<vmem>>) attributes {dimension_semantics = [#tpu.dimension_semantics<parallel>, #tpu.dimension_semantics<arbitrary>], iteration_bounds = array<i64: 2, 5>, scalar_prefetch = 0 : i64, scratch_operands = 2 : i64, tpu.core_type = #tpu.core_type<tc>, window_params = [{transform_indices = @transform_0, window_bounds = array<i64: 1, 1, 8, 8, 8>}, {pipeline_mode = #tpu.pipeline_mode<synchronous>, transform_indices = @transform_1, window_bounds = array<i64: 72, 24>}, {pipeline_mode = #tpu.pipeline_mode<synchronous>, transform_indices = @transform_2, window_bounds = array<i64: 1, 8>}, {transform_indices = @transform_3, window_bounds = array<i64: 1, 1, 8>}, {transform_indices = @transform_4, window_bounds = array<i64: 1, 1, 8>}, {transform_indices = @transform_5, window_bounds = array<i64: 1, 1, 8, 8, 8>}, {transform_indices = @transform_6, window_bounds = array<i64: 1, 2, 8>}]} {
    %c0_i32 = arith.constant 0 : i32
    %0 = arith.cmpi eq, %arg1, %c0_i32 : i32
    %1 = arith.extui %0 : i1 to i32
    %c0_i32_0 = arith.constant 0 : i32
    %2 = arith.cmpi ne, %1, %c0_i32_0 : i32
    scf.if %2 {
      %cst = arith.constant 0.000000e+00 : f32
      %9 = vector.broadcast %cst : f32 to vector<3x64x8xf32>
      %c0 = arith.constant 0 : index
      %c0_4 = arith.constant 0 : index
      %c0_5 = arith.constant 0 : index
      %10 = vector.load %arg10[%c0, %c0_4, %c0_5] : memref<3x64x8xf32, #tpu.memory_space<vmem>>, vector<3x64x8xf32>
      tpu.vector_store %arg10[%c0, %c0_4, %c0_5], %9 {strides = array<i32>} : memref<3x64x8xf32, #tpu.memory_space<vmem>>, vector<3x64x8xf32>,
      %cst_6 = arith.constant 0.000000e+00 : f32
      %11 = vector.broadcast %cst_6 : f32 to vector<1x2x8xf32>
      %c0_7 = arith.constant 0 : index
      %c0_8 = arith.constant 0 : index
      %c0_9 = arith.constant 0 : index
      %12 = vector.load %arg8[%c0_7, %c0_8, %c0_9] : memref<1x2x8xf32, #tpu.memory_space<vmem>>, vector<1x2x8xf32>
      tpu.vector_store %arg8[%c0_7, %c0_8, %c0_9], %11 {strides = array<i32>} : memref<1x2x8xf32, #tpu.memory_space<vmem>>, vector<1x2x8xf32>,
      %cst_10 = arith.constant 0.000000e+00 : bf16
      %13 = vector.broadcast %cst_10 : bf16 to vector<10x10x8xbf16>
      %c0_11 = arith.constant 0 : index
      %c0_12 = arith.constant 0 : index
      %c0_13 = arith.constant 0 : index
      %14 = vector.load %arg9[%c0_11, %c0_12, %c0_13] : memref<10x10x8xbf16, #tpu.memory_space<vmem>>, vector<10x10x8xbf16>
      tpu.vector_store %arg9[%c0_11, %c0_12, %c0_13], %13 {strides = array<i32>} : memref<10x10x8xbf16, #tpu.memory_space<vmem>>, vector<10x10x8xbf16>,
    } else {
    }
    %c4_i32 = arith.constant 4 : i32
    %3 = arith.cmpi slt, %arg1, %c4_i32 : i32
    %4 = arith.extui %3 : i1 to i32
    %c0_i32_1 = arith.constant 0 : i32
    %5 = arith.cmpi ne, %4, %c0_i32_1 : i32
    scf.if %5 {
      %c0 = arith.constant 0 : index
      %c0_4 = arith.constant 0 : index
      %c0_5 = arith.constant 0 : index
      %c0_6 = arith.constant 0 : index
      %c0_7 = arith.constant 0 : index
      %9 = vector.load %arg2[%c0, %c0_4, %c0_5, %c0_6, %c0_7] : memref<1x1x8x8x8xf32, #tpu.memory_space<vmem>>, vector<1x1x8x8x8xf32>
      %10 = vector.shape_cast %9 : vector<1x1x8x8x8xf32> to vector<8x8x8xf32>
      %c0_8 = arith.constant 0 : index
      %c0_9 = arith.constant 0 : index
      %c0_10 = arith.constant 0 : index
      %11 = vector.load %arg5[%c0_8, %c0_9, %c0_10] : memref<1x1x8xf32, #tpu.memory_space<vmem>>, vector<1x1x8xf32>
      %12 = vector.shape_cast %11 : vector<1x1x8xf32> to vector<1x8xf32>
      %13 = vector.shape_cast %12 : vector<1x8xf32> to vector<1x1x8xf32>
      %14 = vector.broadcast %13 : vector<1x1x8xf32> to vector<8x8x8xf32>
      %15 = arith.mulf %10, %14 : vector<8x8x8xf32>
      %c0_11 = arith.constant 0 : index
      %c0_12 = arith.constant 0 : index
      %c0_13 = arith.constant 0 : index
      %16 = vector.load %arg6[%c0_11, %c0_12, %c0_13] : memref<1x1x8xf32, #tpu.memory_space<vmem>>, vector<1x1x8xf32>
      %17 = vector.shape_cast %16 : vector<1x1x8xf32> to vector<1x8xf32>
      %18 = vector.shape_cast %17 : vector<1x8xf32> to vector<1x1x8xf32>
      %19 = vector.broadcast %18 : vector<1x1x8xf32> to vector<8x8x8xf32>
      %20 = arith.addf %15, %19 : vector<8x8x8xf32>
      %21 = arith.truncf %20 : vector<8x8x8xf32> to vector<8x8x8xbf16>
      %c1 = arith.constant 1 : index
      %c1_14 = arith.constant 1 : index
      %c0_15 = arith.constant 0 : index
      %22 = vector.load %arg9[%c1, %c1_14, %c0_15] : memref<10x10x8xbf16, #tpu.memory_space<vmem>>, vector<8x8x8xbf16>
      tpu.vector_store %arg9[%c1, %c1_14, %c0_15], %21 {strides = array<i32>} : memref<10x10x8xbf16, #tpu.memory_space<vmem>>, vector<8x8x8xbf16>,
      %c0_16 = arith.constant 0 : index
      %c0_17 = arith.constant 0 : index
      %c0_18 = arith.constant 0 : index
      %23 = vector.load %arg9[%c0_16, %c0_17, %c0_18] : memref<10x10x8xbf16, #tpu.memory_space<vmem>>, vector<8x8x8xbf16>
      %24 = vector.shape_cast %23 : vector<8x8x8xbf16> to vector<64x8xbf16>
      %c0_19 = arith.constant 0 : index
      %c1_20 = arith.constant 1 : index
      %c0_21 = arith.constant 0 : index
      %25 = vector.load %arg9[%c0_19, %c1_20, %c0_21] : memref<10x10x8xbf16, #tpu.memory_space<vmem>>, vector<8x8x8xbf16>
      %26 = vector.shape_cast %25 : vector<8x8x8xbf16> to vector<64x8xbf16>
      %c0_22 = arith.constant 0 : index
      %c2 = arith.constant 2 : index
      %c0_23 = arith.constant 0 : index
      %27 = vector.load %arg9[%c0_22, %c2, %c0_23] : memref<10x10x8xbf16, #tpu.memory_space<vmem>>, vector<8x8x8xbf16>
      %28 = vector.shape_cast %27 : vector<8x8x8xbf16> to vector<64x8xbf16>
      %c1_24 = arith.constant 1 : index
      %c0_25 = arith.constant 0 : index
      %c0_26 = arith.constant 0 : index
      %29 = vector.load %arg9[%c1_24, %c0_25, %c0_26] : memref<10x10x8xbf16, #tpu.memory_space<vmem>>, vector<8x8x8xbf16>
      %30 = vector.shape_cast %29 : vector<8x8x8xbf16> to vector<64x8xbf16>
      %c1_27 = arith.constant 1 : index
      %c1_28 = arith.constant 1 : index
      %c0_29 = arith.constant 0 : index
      %31 = vector.load %arg9[%c1_27, %c1_28, %c0_29] : memref<10x10x8xbf16, #tpu.memory_space<vmem>>, vector<8x8x8xbf16>
      %32 = vector.shape_cast %31 : vector<8x8x8xbf16> to vector<64x8xbf16>
      %c1_30 = arith.constant 1 : index
      %c2_31 = arith.constant 2 : index
      %c0_32 = arith.constant 0 : index
      %33 = vector.load %arg9[%c1_30, %c2_31, %c0_32] : memref<10x10x8xbf16, #tpu.memory_space<vmem>>, vector<8x8x8xbf16>
      %34 = vector.shape_cast %33 : vector<8x8x8xbf16> to vector<64x8xbf16>
      %c2_33 = arith.constant 2 : index
      %c0_34 = arith.constant 0 : index
      %c0_35 = arith.constant 0 : index
      %35 = vector.load %arg9[%c2_33, %c0_34, %c0_35] : memref<10x10x8xbf16, #tpu.memory_space<vmem>>, vector<8x8x8xbf16>
      %36 = vector.shape_cast %35 : vector<8x8x8xbf16> to vector<64x8xbf16>
      %c2_36 = arith.constant 2 : index
      %c1_37 = arith.constant 1 : index
      %c0_38 = arith.constant 0 : index
      %37 = vector.load %arg9[%c2_36, %c1_37, %c0_38] : memref<10x10x8xbf16, #tpu.memory_space<vmem>>, vector<8x8x8xbf16>
      %38 = vector.shape_cast %37 : vector<8x8x8xbf16> to vector<64x8xbf16>
      %c2_39 = arith.constant 2 : index
      %c2_40 = arith.constant 2 : index
      %c0_41 = arith.constant 0 : index
      %39 = vector.load %arg9[%c2_39, %c2_40, %c0_41] : memref<10x10x8xbf16, #tpu.memory_space<vmem>>, vector<8x8x8xbf16>
      %40 = vector.shape_cast %39 : vector<8x8x8xbf16> to vector<64x8xbf16>
      %41 = tpu.concatenate %24, %26, %28, %30, %32, %34, %36, %38, %40 in 1 : vector<64x8xbf16>, vector<64x8xbf16>, vector<64x8xbf16>, vector<64x8xbf16>, vector<64x8xbf16>, vector<64x8xbf16>, vector<64x8xbf16>, vector<64x8xbf16>, vector<64x8xbf16> -> vector<64x72xbf16>
      %c0_42 = arith.constant 0 : index
      %c0_43 = arith.constant 0 : index
      %42 = vector.load %arg3[%c0_42, %c0_43] : memref<72x24xbf16, #tpu.memory_space<vmem>>, vector<72x24xbf16>
      %cst = arith.constant dense<0.000000e+00> : vector<64x24xf32>
      %43 = tpu.matmul %41, %42, %cst {dimension_numbers = #tpu.dot_dimension_numbers<[1], [0], [0], [1], [0, 0, 1, 1], [], []>} : vector<64x72xbf16>, vector<72x24xbf16>, vector<64x24xf32> -> vector<64x24xf32>
      %c3_i32 = arith.constant 3 : i32
      %c0_i32_44 = arith.constant 0 : i32
      %44 = arith.cmpi eq, %c3_i32, %c0_i32_44 : i32
      %c1_i32 = arith.constant 1 : i32
      %45 = arith.select %44, %c1_i32, %c3_i32 : i32
      %46 = arith.remsi %arg1, %45 : i32
      %c0_i32_45 = arith.constant 0 : i32
      %47 = arith.cmpi ne, %46, %c0_i32_45 : i32
      %c0_i32_46 = arith.constant 0 : i32
      %48 = arith.cmpi slt, %46, %c0_i32_46 : i32
      %c0_i32_47 = arith.constant 0 : i32
      %49 = arith.cmpi slt, %45, %c0_i32_47 : i32
      %50 = arith.xori %48, %49 : i1
      %51 = arith.andi %50, %47 : i1
      %52 = arith.addi %46, %45 : i32
      %53 = arith.select %51, %52, %46 : i32
      %54 = arith.index_cast %53 : i32 to index
      %c0_48 = arith.constant 0 : index
      %c0_49 = arith.constant 0 : index
      %55 = vector.load %arg10[%54, %c0_48, %c0_49] : memref<3x64x8xf32, #tpu.memory_space<vmem>>, vector<1x64x8xf32>
      %56 = vector.shape_cast %55 : vector<1x64x8xf32> to vector<64x8xf32>
      %57 = vector.extract_strided_slice %43 {offsets = [0, 8], sizes = [64, 8], strides = [1, 1]} : vector<64x24xf32> to vector<64x8xf32>
      %58 = arith.addf %56, %57 : vector<64x8xf32>
      %59 = arith.index_cast %53 : i32 to index
      %c0_50 = arith.constant 0 : index
      %c0_51 = arith.constant 0 : index
      %60 = vector.load %arg10[%59, %c0_50, %c0_51] : memref<3x64x8xf32, #tpu.memory_space<vmem>>, vector<1x64x8xf32>
      %61 = vector.shape_cast %60 : vector<1x64x8xf32> to vector<64x8xf32>
      %62 = vector.shape_cast %58 : vector<64x8xf32> to vector<1x64x8xf32>
      tpu.vector_store %arg10[%59, %c0_50, %c0_51], %62 {strides = array<i32>} : memref<3x64x8xf32, #tpu.memory_space<vmem>>, vector<1x64x8xf32>,
      %c3_i32_52 = arith.constant 3 : i32
      %63 = arith.cmpi slt, %arg1, %c3_i32_52 : i32
      %64 = arith.extui %63 : i1 to i32
      %c0_i32_53 = arith.constant 0 : i32
      %65 = arith.cmpi ne, %64, %c0_i32_53 : i32
      scf.if %65 {
        %c1_i32_56 = arith.constant 1 : i32
        %69 = arith.addi %arg1, %c1_i32_56 : i32
        %c3_i32_57 = arith.constant 3 : i32
        %c0_i32_58 = arith.constant 0 : i32
        %70 = arith.cmpi eq, %c3_i32_57, %c0_i32_58 : i32
        %c1_i32_59 = arith.constant 1 : i32
        %71 = arith.select %70, %c1_i32_59, %c3_i32_57 : i32
        %72 = arith.remsi %69, %71 : i32
        %c0_i32_60 = arith.constant 0 : i32
        %73 = arith.cmpi ne, %72, %c0_i32_60 : i32
        %c0_i32_61 = arith.constant 0 : i32
        %74 = arith.cmpi slt, %72, %c0_i32_61 : i32
        %c0_i32_62 = arith.constant 0 : i32
        %75 = arith.cmpi slt, %71, %c0_i32_62 : i32
        %76 = arith.xori %74, %75 : i1
        %77 = arith.andi %76, %73 : i1
        %78 = arith.addi %72, %71 : i32
        %79 = arith.select %77, %78, %72 : i32
        %80 = arith.index_cast %79 : i32 to index
        %c0_63 = arith.constant 0 : index
        %c0_64 = arith.constant 0 : index
        %81 = vector.load %arg10[%80, %c0_63, %c0_64] : memref<3x64x8xf32, #tpu.memory_space<vmem>>, vector<1x64x8xf32>
        %82 = vector.shape_cast %81 : vector<1x64x8xf32> to vector<64x8xf32>
        %83 = vector.extract_strided_slice %43 {offsets = [0, 0], sizes = [64, 8], strides = [1, 1]} : vector<64x24xf32> to vector<64x8xf32>
        %84 = arith.addf %82, %83 : vector<64x8xf32>
        %85 = arith.index_cast %79 : i32 to index
        %c0_65 = arith.constant 0 : index
        %c0_66 = arith.constant 0 : index
        %86 = vector.load %arg10[%85, %c0_65, %c0_66] : memref<3x64x8xf32, #tpu.memory_space<vmem>>, vector<1x64x8xf32>
        %87 = vector.shape_cast %86 : vector<1x64x8xf32> to vector<64x8xf32>
        %88 = vector.shape_cast %84 : vector<64x8xf32> to vector<1x64x8xf32>
        tpu.vector_store %arg10[%85, %c0_65, %c0_66], %88 {strides = array<i32>} : memref<3x64x8xf32, #tpu.memory_space<vmem>>, vector<1x64x8xf32>,
      } else {
      }
      %c0_i32_54 = arith.constant 0 : i32
      %66 = arith.cmpi sgt, %arg1, %c0_i32_54 : i32
      %67 = arith.extui %66 : i1 to i32
      %c0_i32_55 = arith.constant 0 : i32
      %68 = arith.cmpi ne, %67, %c0_i32_55 : i32
      scf.if %68 {
        %c2_i32 = arith.constant 2 : i32
        %69 = arith.addi %arg1, %c2_i32 : i32
        %c3_i32_56 = arith.constant 3 : i32
        %c0_i32_57 = arith.constant 0 : i32
        %70 = arith.cmpi eq, %c3_i32_56, %c0_i32_57 : i32
        %c1_i32_58 = arith.constant 1 : i32
        %71 = arith.select %70, %c1_i32_58, %c3_i32_56 : i32
        %72 = arith.remsi %69, %71 : i32
        %c0_i32_59 = arith.constant 0 : i32
        %73 = arith.cmpi ne, %72, %c0_i32_59 : i32
        %c0_i32_60 = arith.constant 0 : i32
        %74 = arith.cmpi slt, %72, %c0_i32_60 : i32
        %c0_i32_61 = arith.constant 0 : i32
        %75 = arith.cmpi slt, %71, %c0_i32_61 : i32
        %76 = arith.xori %74, %75 : i1
        %77 = arith.andi %76, %73 : i1
        %78 = arith.addi %72, %71 : i32
        %79 = arith.select %77, %78, %72 : i32
        %80 = arith.index_cast %79 : i32 to index
        %c0_62 = arith.constant 0 : index
        %c0_63 = arith.constant 0 : index
        %81 = vector.load %arg10[%80, %c0_62, %c0_63] : memref<3x64x8xf32, #tpu.memory_space<vmem>>, vector<1x64x8xf32>
        %82 = vector.shape_cast %81 : vector<1x64x8xf32> to vector<64x8xf32>
        %83 = vector.extract_strided_slice %43 {offsets = [0, 16], sizes = [64, 8], strides = [1, 1]} : vector<64x24xf32> to vector<64x8xf32>
        %84 = arith.addf %82, %83 : vector<64x8xf32>
        %85 = arith.index_cast %79 : i32 to index
        %c0_64 = arith.constant 0 : index
        %c0_65 = arith.constant 0 : index
        %86 = vector.load %arg10[%85, %c0_64, %c0_65] : memref<3x64x8xf32, #tpu.memory_space<vmem>>, vector<1x64x8xf32>
        %87 = vector.shape_cast %86 : vector<1x64x8xf32> to vector<64x8xf32>
        %88 = vector.shape_cast %84 : vector<64x8xf32> to vector<1x64x8xf32>
        tpu.vector_store %arg10[%85, %c0_64, %c0_65], %88 {strides = array<i32>} : memref<3x64x8xf32, #tpu.memory_space<vmem>>, vector<1x64x8xf32>,
      } else {
      }
    } else {
    }
    %c0_i32_2 = arith.constant 0 : i32
    %6 = arith.cmpi sgt, %arg1, %c0_i32_2 : i32
    %7 = arith.extui %6 : i1 to i32
    %c0_i32_3 = arith.constant 0 : i32
    %8 = arith.cmpi ne, %7, %c0_i32_3 : i32
    scf.if %8 {
      %c2_i32 = arith.constant 2 : i32
      %9 = arith.addi %arg1, %c2_i32 : i32
      %c3_i32 = arith.constant 3 : i32
      %c0_i32_4 = arith.constant 0 : i32
      %10 = arith.cmpi eq, %c3_i32, %c0_i32_4 : i32
      %c1_i32 = arith.constant 1 : i32
      %11 = arith.select %10, %c1_i32, %c3_i32 : i32
      %12 = arith.remsi %9, %11 : i32
      %c0_i32_5 = arith.constant 0 : i32
      %13 = arith.cmpi ne, %12, %c0_i32_5 : i32
      %c0_i32_6 = arith.constant 0 : i32
      %14 = arith.cmpi slt, %12, %c0_i32_6 : i32
      %c0_i32_7 = arith.constant 0 : i32
      %15 = arith.cmpi slt, %11, %c0_i32_7 : i32
      %16 = arith.xori %14, %15 : i1
      %17 = arith.andi %16, %13 : i1
      %18 = arith.addi %12, %11 : i32
      %19 = arith.select %17, %18, %12 : i32
      %20 = arith.index_cast %19 : i32 to index
      %c0 = arith.constant 0 : index
      %c0_8 = arith.constant 0 : index
      %21 = vector.load %arg10[%20, %c0, %c0_8] : memref<3x64x8xf32, #tpu.memory_space<vmem>>, vector<1x64x8xf32>
      %22 = vector.shape_cast %21 : vector<1x64x8xf32> to vector<64x8xf32>
      %c0_9 = arith.constant 0 : index
      %c0_10 = arith.constant 0 : index
      %23 = vector.load %arg4[%c0_9, %c0_10] : memref<1x8xf32, #tpu.memory_space<vmem>>, vector<1x8xf32>
      %24 = vector.broadcast %23 : vector<1x8xf32> to vector<64x8xf32>
      %25 = arith.addf %22, %24 : vector<64x8xf32>
      %26 = vector.shape_cast %25 : vector<64x8xf32> to vector<1x1x8x8x8xf32>
      %27 = arith.truncf %26 : vector<1x1x8x8x8xf32> to vector<1x1x8x8x8xbf16>
      %c0_11 = arith.constant 0 : index
      %c0_12 = arith.constant 0 : index
      %c0_13 = arith.constant 0 : index
      %c0_14 = arith.constant 0 : index
      %c0_15 = arith.constant 0 : index
      %28 = vector.load %arg7[%c0_11, %c0_12, %c0_13, %c0_14, %c0_15] : memref<1x1x8x8x8xbf16, #tpu.memory_space<vmem>>, vector<1x1x8x8x8xbf16>
      tpu.vector_store %arg7[%c0_11, %c0_12, %c0_13, %c0_14, %c0_15], %27 {strides = array<i32>} : memref<1x1x8x8x8xbf16, #tpu.memory_space<vmem>>, vector<1x1x8x8x8xbf16>,
      %cst = arith.constant dense<0.000000e+00> : vector<8xf32>
      %29 = vector.multi_reduction <add>, %25, %cst [0] : vector<64x8xf32> to vector<8xf32>
      %30 = vector.shape_cast %29 : vector<8xf32> to vector<1x8xf32>
      %31 = arith.mulf %25, %25 : vector<64x8xf32>
      %cst_16 = arith.constant dense<0.000000e+00> : vector<8xf32>
      %32 = vector.multi_reduction <add>, %31, %cst_16 [0] : vector<64x8xf32> to vector<8xf32>
      %33 = vector.shape_cast %32 : vector<8xf32> to vector<1x8xf32>
      %34 = tpu.concatenate %30, %33 in 0 : vector<1x8xf32>, vector<1x8xf32> -> vector<2x8xf32>
      %35 = vector.shape_cast %34 : vector<2x8xf32> to vector<1x2x8xf32>
      %c0_17 = arith.constant 0 : index
      %c0_18 = arith.constant 0 : index
      %c0_19 = arith.constant 0 : index
      %36 = vector.load %arg8[%c0_17, %c0_18, %c0_19] : memref<1x2x8xf32, #tpu.memory_space<vmem>>, vector<1x2x8xf32>
      %37 = arith.addf %36, %35 : vector<1x2x8xf32>
      %c0_20 = arith.constant 0 : index
      %c0_21 = arith.constant 0 : index
      %c0_22 = arith.constant 0 : index
      %38 = vector.load %arg8[%c0_20, %c0_21, %c0_22] : memref<1x2x8xf32, #tpu.memory_space<vmem>>, vector<1x2x8xf32>
      tpu.vector_store %arg8[%c0_20, %c0_21, %c0_22], %37 {strides = array<i32>} : memref<1x2x8xf32, #tpu.memory_space<vmem>>, vector<1x2x8xf32>,
      %cst_23 = arith.constant 0.000000e+00 : f32
      %39 = vector.broadcast %cst_23 : f32 to vector<64x8xf32>
      %40 = arith.index_cast %19 : i32 to index
      %c0_24 = arith.constant 0 : index
      %c0_25 = arith.constant 0 : index
      %41 = vector.load %arg10[%40, %c0_24, %c0_25] : memref<3x64x8xf32, #tpu.memory_space<vmem>>, vector<1x64x8xf32>
      %42 = vector.shape_cast %41 : vector<1x64x8xf32> to vector<64x8xf32>
      %43 = vector.shape_cast %39 : vector<64x8xf32> to vector<1x64x8xf32>
      tpu.vector_store %arg10[%40, %c0_24, %c0_25], %43 {strides = array<i32>} : memref<3x64x8xf32, #tpu.memory_space<vmem>>, vector<1x64x8xf32>,
    } else {
    }
    return
  }
  func.func @transform_0(%arg0: i32, %arg1: i32) -> (i32, i32, i32, i32, i32) {
    %c3_i32 = arith.constant 3 : i32
    %0 = arith.minsi %arg1, %c3_i32 : i32
    %c0_i32 = arith.constant 0 : i32
    %c0_i32_0 = arith.constant 0 : i32
    %c0_i32_1 = arith.constant 0 : i32
    %c0_i32_2 = arith.constant 0 : i32
    return %arg0, %0, %c0_i32, %c0_i32_0, %c0_i32_1 : i32, i32, i32, i32, i32
  }
  func.func @transform_1(%arg0: i32, %arg1: i32) -> (i32, i32) {
    %c0_i32 = arith.constant 0 : i32
    %c0_i32_0 = arith.constant 0 : i32
    %c0_i32_1 = arith.constant 0 : i32
    return %c0_i32, %c0_i32_0 : i32, i32
  }
  func.func @transform_2(%arg0: i32, %arg1: i32) -> (i32, i32) {
    %c0_i32 = arith.constant 0 : i32
    %c0_i32_0 = arith.constant 0 : i32
    %c0_i32_1 = arith.constant 0 : i32
    return %c0_i32, %c0_i32_0 : i32, i32
  }
  func.func @transform_3(%arg0: i32, %arg1: i32) -> (i32, i32, i32) {
    %c0_i32 = arith.constant 0 : i32
    %c0_i32_0 = arith.constant 0 : i32
    %c0_i32_1 = arith.constant 0 : i32
    return %arg0, %c0_i32, %c0_i32_0 : i32, i32, i32
  }
  func.func @transform_4(%arg0: i32, %arg1: i32) -> (i32, i32, i32) {
    %c0_i32 = arith.constant 0 : i32
    %c0_i32_0 = arith.constant 0 : i32
    %c0_i32_1 = arith.constant 0 : i32
    return %arg0, %c0_i32, %c0_i32_0 : i32, i32, i32
  }
  func.func @transform_5(%arg0: i32, %arg1: i32) -> (i32, i32, i32, i32, i32) {
    %c1_i32 = arith.constant 1 : i32
    %0 = arith.subi %arg1, %c1_i32 : i32
    %c0_i32 = arith.constant 0 : i32
    %1 = arith.maxsi %0, %c0_i32 : i32
    %c0_i32_0 = arith.constant 0 : i32
    %c0_i32_1 = arith.constant 0 : i32
    %c0_i32_2 = arith.constant 0 : i32
    %c0_i32_3 = arith.constant 0 : i32
    return %arg0, %1, %c0_i32_0, %c0_i32_1, %c0_i32_2 : i32, i32, i32, i32, i32
  }
  func.func @transform_6(%arg0: i32, %arg1: i32) -> (i32, i32, i32) {
    %c0_i32 = arith.constant 0 : i32
    %c0_i32_0 = arith.constant 0 : i32
    %c0_i32_1 = arith.constant 0 : i32
    return %arg0, %c0_i32, %c0_i32_0 : i32, i32, i32
  }
}

module attributes {stable_mosaic.version = 11 : i64} {
  func.func @_conv3d_scan_kernel(%arg0: i32, %arg1: i32, %arg2: memref<1x1x8x8x8xbf16, #tpu.memory_space<vmem>>, %arg3: memref<72x24xbf16, #tpu.memory_space<vmem>>, %arg4: memref<1x8xf32, #tpu.memory_space<vmem>>, %arg5: memref<1x1x8xf32, #tpu.memory_space<vmem>>, %arg6: memref<1x1x8xf32, #tpu.memory_space<vmem>>, %arg7: memref<1x1x8x8x8xbf16, #tpu.memory_space<vmem>>, %arg8: memref<1x2x8xf32, #tpu.memory_space<vmem>>, %arg9: memref<10x10x8xbf16, #tpu.memory_space<vmem>>, %arg10: memref<3x64x8xf32, #tpu.memory_space<vmem>>) attributes {dimension_semantics = [#tpu.dimension_semantics<parallel>, #tpu.dimension_semantics<arbitrary>], iteration_bounds = array<i64: 2, 5>, scalar_prefetch = 0 : i64, scratch_operands = 2 : i64, tpu.core_type = #tpu.core_type<tc>, window_params = [{transform_indices = @transform_0, window_bounds = array<i64: 1, 1, 8, 8, 8>}, {pipeline_mode = #tpu.pipeline_mode<synchronous>, transform_indices = @transform_1, window_bounds = array<i64: 72, 24>}, {pipeline_mode = #tpu.pipeline_mode<synchronous>, transform_indices = @transform_2, window_bounds = array<i64: 1, 8>}, {transform_indices = @transform_3, window_bounds = array<i64: 1, 1, 8>}, {transform_indices = @transform_4, window_bounds = array<i64: 1, 1, 8>}, {transform_indices = @transform_5, window_bounds = array<i64: 1, 1, 8, 8, 8>}, {transform_indices = @transform_6, window_bounds = array<i64: 1, 2, 8>}]} {
    %c0_i32 = arith.constant 0 : i32
    %0 = arith.cmpi eq, %arg1, %c0_i32 : i32
    %1 = arith.extui %0 : i1 to i32
    %c0_i32_0 = arith.constant 0 : i32
    %2 = arith.cmpi ne, %1, %c0_i32_0 : i32
    scf.if %2 {
      %cst = arith.constant 0.000000e+00 : f32
      %9 = vector.broadcast %cst : f32 to vector<3x64x8xf32>
      %c0 = arith.constant 0 : index
      %c0_4 = arith.constant 0 : index
      %c0_5 = arith.constant 0 : index
      %10 = vector.load %arg10[%c0, %c0_4, %c0_5] : memref<3x64x8xf32, #tpu.memory_space<vmem>>, vector<3x64x8xf32>
      tpu.vector_store %arg10[%c0, %c0_4, %c0_5], %9 {strides = array<i32>} : memref<3x64x8xf32, #tpu.memory_space<vmem>>, vector<3x64x8xf32>,
      %cst_6 = arith.constant 0.000000e+00 : f32
      %11 = vector.broadcast %cst_6 : f32 to vector<1x2x8xf32>
      %c0_7 = arith.constant 0 : index
      %c0_8 = arith.constant 0 : index
      %c0_9 = arith.constant 0 : index
      %12 = vector.load %arg8[%c0_7, %c0_8, %c0_9] : memref<1x2x8xf32, #tpu.memory_space<vmem>>, vector<1x2x8xf32>
      tpu.vector_store %arg8[%c0_7, %c0_8, %c0_9], %11 {strides = array<i32>} : memref<1x2x8xf32, #tpu.memory_space<vmem>>, vector<1x2x8xf32>,
      %cst_10 = arith.constant 0.000000e+00 : bf16
      %13 = vector.broadcast %cst_10 : bf16 to vector<10x10x8xbf16>
      %c0_11 = arith.constant 0 : index
      %c0_12 = arith.constant 0 : index
      %c0_13 = arith.constant 0 : index
      %14 = vector.load %arg9[%c0_11, %c0_12, %c0_13] : memref<10x10x8xbf16, #tpu.memory_space<vmem>>, vector<10x10x8xbf16>
      tpu.vector_store %arg9[%c0_11, %c0_12, %c0_13], %13 {strides = array<i32>} : memref<10x10x8xbf16, #tpu.memory_space<vmem>>, vector<10x10x8xbf16>,
    } else {
    }
    %c4_i32 = arith.constant 4 : i32
    %3 = arith.cmpi slt, %arg1, %c4_i32 : i32
    %4 = arith.extui %3 : i1 to i32
    %c0_i32_1 = arith.constant 0 : i32
    %5 = arith.cmpi ne, %4, %c0_i32_1 : i32
    scf.if %5 {
      %c0 = arith.constant 0 : index
      %c0_4 = arith.constant 0 : index
      %c0_5 = arith.constant 0 : index
      %c0_6 = arith.constant 0 : index
      %c0_7 = arith.constant 0 : index
      %9 = vector.load %arg2[%c0, %c0_4, %c0_5, %c0_6, %c0_7] : memref<1x1x8x8x8xbf16, #tpu.memory_space<vmem>>, vector<1x1x8x8x8xbf16>
      %10 = vector.shape_cast %9 : vector<1x1x8x8x8xbf16> to vector<8x8x8xbf16>
      %11 = arith.extf %10 : vector<8x8x8xbf16> to vector<8x8x8xf32>
      %c0_8 = arith.constant 0 : index
      %c0_9 = arith.constant 0 : index
      %c0_10 = arith.constant 0 : index
      %12 = vector.load %arg5[%c0_8, %c0_9, %c0_10] : memref<1x1x8xf32, #tpu.memory_space<vmem>>, vector<1x1x8xf32>
      %13 = vector.shape_cast %12 : vector<1x1x8xf32> to vector<1x8xf32>
      %14 = vector.shape_cast %13 : vector<1x8xf32> to vector<1x1x8xf32>
      %15 = vector.broadcast %14 : vector<1x1x8xf32> to vector<8x8x8xf32>
      %16 = arith.mulf %11, %15 : vector<8x8x8xf32>
      %c0_11 = arith.constant 0 : index
      %c0_12 = arith.constant 0 : index
      %c0_13 = arith.constant 0 : index
      %17 = vector.load %arg6[%c0_11, %c0_12, %c0_13] : memref<1x1x8xf32, #tpu.memory_space<vmem>>, vector<1x1x8xf32>
      %18 = vector.shape_cast %17 : vector<1x1x8xf32> to vector<1x8xf32>
      %19 = vector.shape_cast %18 : vector<1x8xf32> to vector<1x1x8xf32>
      %20 = vector.broadcast %19 : vector<1x1x8xf32> to vector<8x8x8xf32>
      %21 = arith.addf %16, %20 : vector<8x8x8xf32>
      %cst = arith.constant 0.000000e+00 : f32
      %22 = vector.broadcast %cst : f32 to vector<8x8x8xf32>
      %23 = arith.maximumf %21, %22 : vector<8x8x8xf32>
      %24 = arith.truncf %23 : vector<8x8x8xf32> to vector<8x8x8xbf16>
      %c1 = arith.constant 1 : index
      %c1_14 = arith.constant 1 : index
      %c0_15 = arith.constant 0 : index
      %25 = vector.load %arg9[%c1, %c1_14, %c0_15] : memref<10x10x8xbf16, #tpu.memory_space<vmem>>, vector<8x8x8xbf16>
      tpu.vector_store %arg9[%c1, %c1_14, %c0_15], %24 {strides = array<i32>} : memref<10x10x8xbf16, #tpu.memory_space<vmem>>, vector<8x8x8xbf16>,
      %c0_16 = arith.constant 0 : index
      %c0_17 = arith.constant 0 : index
      %c0_18 = arith.constant 0 : index
      %26 = vector.load %arg9[%c0_16, %c0_17, %c0_18] : memref<10x10x8xbf16, #tpu.memory_space<vmem>>, vector<8x8x8xbf16>
      %27 = vector.shape_cast %26 : vector<8x8x8xbf16> to vector<64x8xbf16>
      %c0_19 = arith.constant 0 : index
      %c1_20 = arith.constant 1 : index
      %c0_21 = arith.constant 0 : index
      %28 = vector.load %arg9[%c0_19, %c1_20, %c0_21] : memref<10x10x8xbf16, #tpu.memory_space<vmem>>, vector<8x8x8xbf16>
      %29 = vector.shape_cast %28 : vector<8x8x8xbf16> to vector<64x8xbf16>
      %c0_22 = arith.constant 0 : index
      %c2 = arith.constant 2 : index
      %c0_23 = arith.constant 0 : index
      %30 = vector.load %arg9[%c0_22, %c2, %c0_23] : memref<10x10x8xbf16, #tpu.memory_space<vmem>>, vector<8x8x8xbf16>
      %31 = vector.shape_cast %30 : vector<8x8x8xbf16> to vector<64x8xbf16>
      %c1_24 = arith.constant 1 : index
      %c0_25 = arith.constant 0 : index
      %c0_26 = arith.constant 0 : index
      %32 = vector.load %arg9[%c1_24, %c0_25, %c0_26] : memref<10x10x8xbf16, #tpu.memory_space<vmem>>, vector<8x8x8xbf16>
      %33 = vector.shape_cast %32 : vector<8x8x8xbf16> to vector<64x8xbf16>
      %c1_27 = arith.constant 1 : index
      %c1_28 = arith.constant 1 : index
      %c0_29 = arith.constant 0 : index
      %34 = vector.load %arg9[%c1_27, %c1_28, %c0_29] : memref<10x10x8xbf16, #tpu.memory_space<vmem>>, vector<8x8x8xbf16>
      %35 = vector.shape_cast %34 : vector<8x8x8xbf16> to vector<64x8xbf16>
      %c1_30 = arith.constant 1 : index
      %c2_31 = arith.constant 2 : index
      %c0_32 = arith.constant 0 : index
      %36 = vector.load %arg9[%c1_30, %c2_31, %c0_32] : memref<10x10x8xbf16, #tpu.memory_space<vmem>>, vector<8x8x8xbf16>
      %37 = vector.shape_cast %36 : vector<8x8x8xbf16> to vector<64x8xbf16>
      %c2_33 = arith.constant 2 : index
      %c0_34 = arith.constant 0 : index
      %c0_35 = arith.constant 0 : index
      %38 = vector.load %arg9[%c2_33, %c0_34, %c0_35] : memref<10x10x8xbf16, #tpu.memory_space<vmem>>, vector<8x8x8xbf16>
      %39 = vector.shape_cast %38 : vector<8x8x8xbf16> to vector<64x8xbf16>
      %c2_36 = arith.constant 2 : index
      %c1_37 = arith.constant 1 : index
      %c0_38 = arith.constant 0 : index
      %40 = vector.load %arg9[%c2_36, %c1_37, %c0_38] : memref<10x10x8xbf16, #tpu.memory_space<vmem>>, vector<8x8x8xbf16>
      %41 = vector.shape_cast %40 : vector<8x8x8xbf16> to vector<64x8xbf16>
      %c2_39 = arith.constant 2 : index
      %c2_40 = arith.constant 2 : index
      %c0_41 = arith.constant 0 : index
      %42 = vector.load %arg9[%c2_39, %c2_40, %c0_41] : memref<10x10x8xbf16, #tpu.memory_space<vmem>>, vector<8x8x8xbf16>
      %43 = vector.shape_cast %42 : vector<8x8x8xbf16> to vector<64x8xbf16>
      %44 = tpu.concatenate %27, %29, %31, %33, %35, %37, %39, %41, %43 in 1 : vector<64x8xbf16>, vector<64x8xbf16>, vector<64x8xbf16>, vector<64x8xbf16>, vector<64x8xbf16>, vector<64x8xbf16>, vector<64x8xbf16>, vector<64x8xbf16>, vector<64x8xbf16> -> vector<64x72xbf16>
      %c0_42 = arith.constant 0 : index
      %c0_43 = arith.constant 0 : index
      %45 = vector.load %arg3[%c0_42, %c0_43] : memref<72x24xbf16, #tpu.memory_space<vmem>>, vector<72x24xbf16>
      %cst_44 = arith.constant dense<0.000000e+00> : vector<64x24xf32>
      %46 = tpu.matmul %44, %45, %cst_44 {dimension_numbers = #tpu.dot_dimension_numbers<[1], [0], [0], [1], [0, 0, 1, 1], [], []>} : vector<64x72xbf16>, vector<72x24xbf16>, vector<64x24xf32> -> vector<64x24xf32>
      %c3_i32 = arith.constant 3 : i32
      %c0_i32_45 = arith.constant 0 : i32
      %47 = arith.cmpi eq, %c3_i32, %c0_i32_45 : i32
      %c1_i32 = arith.constant 1 : i32
      %48 = arith.select %47, %c1_i32, %c3_i32 : i32
      %49 = arith.remsi %arg1, %48 : i32
      %c0_i32_46 = arith.constant 0 : i32
      %50 = arith.cmpi ne, %49, %c0_i32_46 : i32
      %c0_i32_47 = arith.constant 0 : i32
      %51 = arith.cmpi slt, %49, %c0_i32_47 : i32
      %c0_i32_48 = arith.constant 0 : i32
      %52 = arith.cmpi slt, %48, %c0_i32_48 : i32
      %53 = arith.xori %51, %52 : i1
      %54 = arith.andi %53, %50 : i1
      %55 = arith.addi %49, %48 : i32
      %56 = arith.select %54, %55, %49 : i32
      %57 = arith.index_cast %56 : i32 to index
      %c0_49 = arith.constant 0 : index
      %c0_50 = arith.constant 0 : index
      %58 = vector.load %arg10[%57, %c0_49, %c0_50] : memref<3x64x8xf32, #tpu.memory_space<vmem>>, vector<1x64x8xf32>
      %59 = vector.shape_cast %58 : vector<1x64x8xf32> to vector<64x8xf32>
      %60 = vector.extract_strided_slice %46 {offsets = [0, 8], sizes = [64, 8], strides = [1, 1]} : vector<64x24xf32> to vector<64x8xf32>
      %61 = arith.addf %59, %60 : vector<64x8xf32>
      %62 = arith.index_cast %56 : i32 to index
      %c0_51 = arith.constant 0 : index
      %c0_52 = arith.constant 0 : index
      %63 = vector.load %arg10[%62, %c0_51, %c0_52] : memref<3x64x8xf32, #tpu.memory_space<vmem>>, vector<1x64x8xf32>
      %64 = vector.shape_cast %63 : vector<1x64x8xf32> to vector<64x8xf32>
      %65 = vector.shape_cast %61 : vector<64x8xf32> to vector<1x64x8xf32>
      tpu.vector_store %arg10[%62, %c0_51, %c0_52], %65 {strides = array<i32>} : memref<3x64x8xf32, #tpu.memory_space<vmem>>, vector<1x64x8xf32>,
      %c3_i32_53 = arith.constant 3 : i32
      %66 = arith.cmpi slt, %arg1, %c3_i32_53 : i32
      %67 = arith.extui %66 : i1 to i32
      %c0_i32_54 = arith.constant 0 : i32
      %68 = arith.cmpi ne, %67, %c0_i32_54 : i32
      scf.if %68 {
        %c1_i32_57 = arith.constant 1 : i32
        %72 = arith.addi %arg1, %c1_i32_57 : i32
        %c3_i32_58 = arith.constant 3 : i32
        %c0_i32_59 = arith.constant 0 : i32
        %73 = arith.cmpi eq, %c3_i32_58, %c0_i32_59 : i32
        %c1_i32_60 = arith.constant 1 : i32
        %74 = arith.select %73, %c1_i32_60, %c3_i32_58 : i32
        %75 = arith.remsi %72, %74 : i32
        %c0_i32_61 = arith.constant 0 : i32
        %76 = arith.cmpi ne, %75, %c0_i32_61 : i32
        %c0_i32_62 = arith.constant 0 : i32
        %77 = arith.cmpi slt, %75, %c0_i32_62 : i32
        %c0_i32_63 = arith.constant 0 : i32
        %78 = arith.cmpi slt, %74, %c0_i32_63 : i32
        %79 = arith.xori %77, %78 : i1
        %80 = arith.andi %79, %76 : i1
        %81 = arith.addi %75, %74 : i32
        %82 = arith.select %80, %81, %75 : i32
        %83 = arith.index_cast %82 : i32 to index
        %c0_64 = arith.constant 0 : index
        %c0_65 = arith.constant 0 : index
        %84 = vector.load %arg10[%83, %c0_64, %c0_65] : memref<3x64x8xf32, #tpu.memory_space<vmem>>, vector<1x64x8xf32>
        %85 = vector.shape_cast %84 : vector<1x64x8xf32> to vector<64x8xf32>
        %86 = vector.extract_strided_slice %46 {offsets = [0, 0], sizes = [64, 8], strides = [1, 1]} : vector<64x24xf32> to vector<64x8xf32>
        %87 = arith.addf %85, %86 : vector<64x8xf32>
        %88 = arith.index_cast %82 : i32 to index
        %c0_66 = arith.constant 0 : index
        %c0_67 = arith.constant 0 : index
        %89 = vector.load %arg10[%88, %c0_66, %c0_67] : memref<3x64x8xf32, #tpu.memory_space<vmem>>, vector<1x64x8xf32>
        %90 = vector.shape_cast %89 : vector<1x64x8xf32> to vector<64x8xf32>
        %91 = vector.shape_cast %87 : vector<64x8xf32> to vector<1x64x8xf32>
        tpu.vector_store %arg10[%88, %c0_66, %c0_67], %91 {strides = array<i32>} : memref<3x64x8xf32, #tpu.memory_space<vmem>>, vector<1x64x8xf32>,
      } else {
      }
      %c0_i32_55 = arith.constant 0 : i32
      %69 = arith.cmpi sgt, %arg1, %c0_i32_55 : i32
      %70 = arith.extui %69 : i1 to i32
      %c0_i32_56 = arith.constant 0 : i32
      %71 = arith.cmpi ne, %70, %c0_i32_56 : i32
      scf.if %71 {
        %c2_i32 = arith.constant 2 : i32
        %72 = arith.addi %arg1, %c2_i32 : i32
        %c3_i32_57 = arith.constant 3 : i32
        %c0_i32_58 = arith.constant 0 : i32
        %73 = arith.cmpi eq, %c3_i32_57, %c0_i32_58 : i32
        %c1_i32_59 = arith.constant 1 : i32
        %74 = arith.select %73, %c1_i32_59, %c3_i32_57 : i32
        %75 = arith.remsi %72, %74 : i32
        %c0_i32_60 = arith.constant 0 : i32
        %76 = arith.cmpi ne, %75, %c0_i32_60 : i32
        %c0_i32_61 = arith.constant 0 : i32
        %77 = arith.cmpi slt, %75, %c0_i32_61 : i32
        %c0_i32_62 = arith.constant 0 : i32
        %78 = arith.cmpi slt, %74, %c0_i32_62 : i32
        %79 = arith.xori %77, %78 : i1
        %80 = arith.andi %79, %76 : i1
        %81 = arith.addi %75, %74 : i32
        %82 = arith.select %80, %81, %75 : i32
        %83 = arith.index_cast %82 : i32 to index
        %c0_63 = arith.constant 0 : index
        %c0_64 = arith.constant 0 : index
        %84 = vector.load %arg10[%83, %c0_63, %c0_64] : memref<3x64x8xf32, #tpu.memory_space<vmem>>, vector<1x64x8xf32>
        %85 = vector.shape_cast %84 : vector<1x64x8xf32> to vector<64x8xf32>
        %86 = vector.extract_strided_slice %46 {offsets = [0, 16], sizes = [64, 8], strides = [1, 1]} : vector<64x24xf32> to vector<64x8xf32>
        %87 = arith.addf %85, %86 : vector<64x8xf32>
        %88 = arith.index_cast %82 : i32 to index
        %c0_65 = arith.constant 0 : index
        %c0_66 = arith.constant 0 : index
        %89 = vector.load %arg10[%88, %c0_65, %c0_66] : memref<3x64x8xf32, #tpu.memory_space<vmem>>, vector<1x64x8xf32>
        %90 = vector.shape_cast %89 : vector<1x64x8xf32> to vector<64x8xf32>
        %91 = vector.shape_cast %87 : vector<64x8xf32> to vector<1x64x8xf32>
        tpu.vector_store %arg10[%88, %c0_65, %c0_66], %91 {strides = array<i32>} : memref<3x64x8xf32, #tpu.memory_space<vmem>>, vector<1x64x8xf32>,
      } else {
      }
    } else {
    }
    %c0_i32_2 = arith.constant 0 : i32
    %6 = arith.cmpi sgt, %arg1, %c0_i32_2 : i32
    %7 = arith.extui %6 : i1 to i32
    %c0_i32_3 = arith.constant 0 : i32
    %8 = arith.cmpi ne, %7, %c0_i32_3 : i32
    scf.if %8 {
      %c2_i32 = arith.constant 2 : i32
      %9 = arith.addi %arg1, %c2_i32 : i32
      %c3_i32 = arith.constant 3 : i32
      %c0_i32_4 = arith.constant 0 : i32
      %10 = arith.cmpi eq, %c3_i32, %c0_i32_4 : i32
      %c1_i32 = arith.constant 1 : i32
      %11 = arith.select %10, %c1_i32, %c3_i32 : i32
      %12 = arith.remsi %9, %11 : i32
      %c0_i32_5 = arith.constant 0 : i32
      %13 = arith.cmpi ne, %12, %c0_i32_5 : i32
      %c0_i32_6 = arith.constant 0 : i32
      %14 = arith.cmpi slt, %12, %c0_i32_6 : i32
      %c0_i32_7 = arith.constant 0 : i32
      %15 = arith.cmpi slt, %11, %c0_i32_7 : i32
      %16 = arith.xori %14, %15 : i1
      %17 = arith.andi %16, %13 : i1
      %18 = arith.addi %12, %11 : i32
      %19 = arith.select %17, %18, %12 : i32
      %20 = arith.index_cast %19 : i32 to index
      %c0 = arith.constant 0 : index
      %c0_8 = arith.constant 0 : index
      %21 = vector.load %arg10[%20, %c0, %c0_8] : memref<3x64x8xf32, #tpu.memory_space<vmem>>, vector<1x64x8xf32>
      %22 = vector.shape_cast %21 : vector<1x64x8xf32> to vector<64x8xf32>
      %c0_9 = arith.constant 0 : index
      %c0_10 = arith.constant 0 : index
      %23 = vector.load %arg4[%c0_9, %c0_10] : memref<1x8xf32, #tpu.memory_space<vmem>>, vector<1x8xf32>
      %24 = vector.broadcast %23 : vector<1x8xf32> to vector<64x8xf32>
      %25 = arith.addf %22, %24 : vector<64x8xf32>
      %26 = vector.shape_cast %25 : vector<64x8xf32> to vector<1x1x8x8x8xf32>
      %27 = arith.truncf %26 : vector<1x1x8x8x8xf32> to vector<1x1x8x8x8xbf16>
      %c0_11 = arith.constant 0 : index
      %c0_12 = arith.constant 0 : index
      %c0_13 = arith.constant 0 : index
      %c0_14 = arith.constant 0 : index
      %c0_15 = arith.constant 0 : index
      %28 = vector.load %arg7[%c0_11, %c0_12, %c0_13, %c0_14, %c0_15] : memref<1x1x8x8x8xbf16, #tpu.memory_space<vmem>>, vector<1x1x8x8x8xbf16>
      tpu.vector_store %arg7[%c0_11, %c0_12, %c0_13, %c0_14, %c0_15], %27 {strides = array<i32>} : memref<1x1x8x8x8xbf16, #tpu.memory_space<vmem>>, vector<1x1x8x8x8xbf16>,
      %cst = arith.constant dense<0.000000e+00> : vector<8xf32>
      %29 = vector.multi_reduction <add>, %25, %cst [0] : vector<64x8xf32> to vector<8xf32>
      %30 = vector.shape_cast %29 : vector<8xf32> to vector<1x8xf32>
      %31 = arith.mulf %25, %25 : vector<64x8xf32>
      %cst_16 = arith.constant dense<0.000000e+00> : vector<8xf32>
      %32 = vector.multi_reduction <add>, %31, %cst_16 [0] : vector<64x8xf32> to vector<8xf32>
      %33 = vector.shape_cast %32 : vector<8xf32> to vector<1x8xf32>
      %34 = tpu.concatenate %30, %33 in 0 : vector<1x8xf32>, vector<1x8xf32> -> vector<2x8xf32>
      %35 = vector.shape_cast %34 : vector<2x8xf32> to vector<1x2x8xf32>
      %c0_17 = arith.constant 0 : index
      %c0_18 = arith.constant 0 : index
      %c0_19 = arith.constant 0 : index
      %36 = vector.load %arg8[%c0_17, %c0_18, %c0_19] : memref<1x2x8xf32, #tpu.memory_space<vmem>>, vector<1x2x8xf32>
      %37 = arith.addf %36, %35 : vector<1x2x8xf32>
      %c0_20 = arith.constant 0 : index
      %c0_21 = arith.constant 0 : index
      %c0_22 = arith.constant 0 : index
      %38 = vector.load %arg8[%c0_20, %c0_21, %c0_22] : memref<1x2x8xf32, #tpu.memory_space<vmem>>, vector<1x2x8xf32>
      tpu.vector_store %arg8[%c0_20, %c0_21, %c0_22], %37 {strides = array<i32>} : memref<1x2x8xf32, #tpu.memory_space<vmem>>, vector<1x2x8xf32>,
      %cst_23 = arith.constant 0.000000e+00 : f32
      %39 = vector.broadcast %cst_23 : f32 to vector<64x8xf32>
      %40 = arith.index_cast %19 : i32 to index
      %c0_24 = arith.constant 0 : index
      %c0_25 = arith.constant 0 : index
      %41 = vector.load %arg10[%40, %c0_24, %c0_25] : memref<3x64x8xf32, #tpu.memory_space<vmem>>, vector<1x64x8xf32>
      %42 = vector.shape_cast %41 : vector<1x64x8xf32> to vector<64x8xf32>
      %43 = vector.shape_cast %39 : vector<64x8xf32> to vector<1x64x8xf32>
      tpu.vector_store %arg10[%40, %c0_24, %c0_25], %43 {strides = array<i32>} : memref<3x64x8xf32, #tpu.memory_space<vmem>>, vector<1x64x8xf32>,
    } else {
    }
    return
  }
  func.func @transform_0(%arg0: i32, %arg1: i32) -> (i32, i32, i32, i32, i32) {
    %c3_i32 = arith.constant 3 : i32
    %0 = arith.minsi %arg1, %c3_i32 : i32
    %c0_i32 = arith.constant 0 : i32
    %c0_i32_0 = arith.constant 0 : i32
    %c0_i32_1 = arith.constant 0 : i32
    %c0_i32_2 = arith.constant 0 : i32
    return %arg0, %0, %c0_i32, %c0_i32_0, %c0_i32_1 : i32, i32, i32, i32, i32
  }
  func.func @transform_1(%arg0: i32, %arg1: i32) -> (i32, i32) {
    %c0_i32 = arith.constant 0 : i32
    %c0_i32_0 = arith.constant 0 : i32
    %c0_i32_1 = arith.constant 0 : i32
    return %c0_i32, %c0_i32_0 : i32, i32
  }
  func.func @transform_2(%arg0: i32, %arg1: i32) -> (i32, i32) {
    %c0_i32 = arith.constant 0 : i32
    %c0_i32_0 = arith.constant 0 : i32
    %c0_i32_1 = arith.constant 0 : i32
    return %c0_i32, %c0_i32_0 : i32, i32
  }
  func.func @transform_3(%arg0: i32, %arg1: i32) -> (i32, i32, i32) {
    %c0_i32 = arith.constant 0 : i32
    %c0_i32_0 = arith.constant 0 : i32
    %c0_i32_1 = arith.constant 0 : i32
    return %arg0, %c0_i32, %c0_i32_0 : i32, i32, i32
  }
  func.func @transform_4(%arg0: i32, %arg1: i32) -> (i32, i32, i32) {
    %c0_i32 = arith.constant 0 : i32
    %c0_i32_0 = arith.constant 0 : i32
    %c0_i32_1 = arith.constant 0 : i32
    return %arg0, %c0_i32, %c0_i32_0 : i32, i32, i32
  }
  func.func @transform_5(%arg0: i32, %arg1: i32) -> (i32, i32, i32, i32, i32) {
    %c1_i32 = arith.constant 1 : i32
    %0 = arith.subi %arg1, %c1_i32 : i32
    %c0_i32 = arith.constant 0 : i32
    %1 = arith.maxsi %0, %c0_i32 : i32
    %c0_i32_0 = arith.constant 0 : i32
    %c0_i32_1 = arith.constant 0 : i32
    %c0_i32_2 = arith.constant 0 : i32
    %c0_i32_3 = arith.constant 0 : i32
    return %arg0, %1, %c0_i32_0, %c0_i32_1, %c0_i32_2 : i32, i32, i32, i32, i32
  }
  func.func @transform_6(%arg0: i32, %arg1: i32) -> (i32, i32, i32) {
    %c0_i32 = arith.constant 0 : i32
    %c0_i32_0 = arith.constant 0 : i32
    %c0_i32_1 = arith.constant 0 : i32
    return %arg0, %c0_i32, %c0_i32_0 : i32, i32, i32
  }
}

module attributes {stable_mosaic.version = 11 : i64} {
  func.func @_in_residual_kernel(%arg0: i32, %arg1: memref<1x4x512xbf16, #tpu.memory_space<vmem>>, %arg2: memref<1x4x512xf32, #tpu.memory_space<vmem>>, %arg3: memref<1x1x512xf32, #tpu.memory_space<vmem>>, %arg4: memref<1x1x512xf32, #tpu.memory_space<vmem>>, %arg5: memref<1x4x512xf32, #tpu.memory_space<vmem>>) attributes {dimension_semantics = [#tpu.dimension_semantics<parallel>], iteration_bounds = array<i64: 2>, scalar_prefetch = 0 : i64, scratch_operands = 0 : i64, tpu.core_type = #tpu.core_type<tc>, window_params = [{transform_indices = @transform_0, window_bounds = array<i64: 1, 4, 512>}, {transform_indices = @transform_1, window_bounds = array<i64: 1, 4, 512>}, {transform_indices = @transform_2, window_bounds = array<i64: 1, 1, 512>}, {transform_indices = @transform_3, window_bounds = array<i64: 1, 1, 512>}, {transform_indices = @transform_4, window_bounds = array<i64: 1, 4, 512>}]} {
    %c0 = arith.constant 0 : index
    %c0_0 = arith.constant 0 : index
    %c0_1 = arith.constant 0 : index
    %0 = vector.load %arg1[%c0, %c0_0, %c0_1] : memref<1x4x512xbf16, #tpu.memory_space<vmem>>, vector<1x4x512xbf16>
    %1 = arith.extf %0 : vector<1x4x512xbf16> to vector<1x4x512xf32>
    %c0_2 = arith.constant 0 : index
    %c0_3 = arith.constant 0 : index
    %c0_4 = arith.constant 0 : index
    %2 = vector.load %arg3[%c0_2, %c0_3, %c0_4] : memref<1x1x512xf32, #tpu.memory_space<vmem>>, vector<1x1x512xf32>
    %3 = vector.broadcast %2 : vector<1x1x512xf32> to vector<1x4x512xf32>
    %4 = arith.mulf %1, %3 : vector<1x4x512xf32>
    %c0_5 = arith.constant 0 : index
    %c0_6 = arith.constant 0 : index
    %c0_7 = arith.constant 0 : index
    %5 = vector.load %arg4[%c0_5, %c0_6, %c0_7] : memref<1x1x512xf32, #tpu.memory_space<vmem>>, vector<1x1x512xf32>
    %6 = vector.broadcast %5 : vector<1x1x512xf32> to vector<1x4x512xf32>
    %7 = arith.addf %4, %6 : vector<1x4x512xf32>
    %c0_8 = arith.constant 0 : index
    %c0_9 = arith.constant 0 : index
    %c0_10 = arith.constant 0 : index
    %8 = vector.load %arg2[%c0_8, %c0_9, %c0_10] : memref<1x4x512xf32, #tpu.memory_space<vmem>>, vector<1x4x512xf32>
    %9 = arith.addf %7, %8 : vector<1x4x512xf32>
    %c0_11 = arith.constant 0 : index
    %c0_12 = arith.constant 0 : index
    %c0_13 = arith.constant 0 : index
    %10 = vector.load %arg5[%c0_11, %c0_12, %c0_13] : memref<1x4x512xf32, #tpu.memory_space<vmem>>, vector<1x4x512xf32>
    tpu.vector_store %arg5[%c0_11, %c0_12, %c0_13], %9 {strides = array<i32>} : memref<1x4x512xf32, #tpu.memory_space<vmem>>, vector<1x4x512xf32>,
    return
  }
  func.func @transform_0(%arg0: i32) -> (i32, i32, i32) {
    %c0_i32 = arith.constant 0 : i32
    %c0_i32_0 = arith.constant 0 : i32
    %c0_i32_1 = arith.constant 0 : i32
    return %arg0, %c0_i32, %c0_i32_0 : i32, i32, i32
  }
  func.func @transform_1(%arg0: i32) -> (i32, i32, i32) {
    %c0_i32 = arith.constant 0 : i32
    %c0_i32_0 = arith.constant 0 : i32
    %c0_i32_1 = arith.constant 0 : i32
    return %arg0, %c0_i32, %c0_i32_0 : i32, i32, i32
  }
  func.func @transform_2(%arg0: i32) -> (i32, i32, i32) {
    %c0_i32 = arith.constant 0 : i32
    %c0_i32_0 = arith.constant 0 : i32
    %c0_i32_1 = arith.constant 0 : i32
    return %arg0, %c0_i32, %c0_i32_0 : i32, i32, i32
  }
  func.func @transform_3(%arg0: i32) -> (i32, i32, i32) {
    %c0_i32 = arith.constant 0 : i32
    %c0_i32_0 = arith.constant 0 : i32
    %c0_i32_1 = arith.constant 0 : i32
    return %arg0, %c0_i32, %c0_i32_0 : i32, i32, i32
  }
  func.func @transform_4(%arg0: i32) -> (i32, i32, i32) {
    %c0_i32 = arith.constant 0 : i32
    %c0_i32_0 = arith.constant 0 : i32
    %c0_i32_1 = arith.constant 0 : i32
    return %arg0, %c0_i32, %c0_i32_0 : i32, i32, i32
  }
}

</mosaic_0001>

<bundles_post_ra>
// kernel: res_blocks_forward.8
= control target key start
LH: loop header
LB: loop body
LE: loop exit
PB: predicated region body
PF: predicated region fallthrough
CT: control target
= control target key end

     0   :  { %s440_s15 = smov 0   ;;  %s475_s0 = inlined_call_operand.vmem [shape: bf16[2,4,512], index: 0, kind: input, shape index: {}]   ;;  %s476_s1 = inlined_call_operand.vmem [shape: f32[2,4,512], index: 1, kind: input, shape index: {}]   ;;  %s477_s2 = inlined_call_operand.vmem [shape: f32[2,1,512], index: 2, kind: input, shape index: {}]   ;;  %s478_s3 = inlined_call_operand.vmem [shape: f32[2,1,512], index: 3, kind: input, shape index: {}]   ;;  %s479_s4 = inlined_call_operand.vmem [shape: f32[2,4,512], index: 4, kind: output, shape index: {}]  }
   0x1 LB: > { %s381_s16 = sadd.s32 4294967295, %s413_s15   ;;  %p385_p0 = scmp.ge.s32.totalorder %s413_s15, 1  ;;  %s413_s15 = sphi %s440_s15, %s14_s15  }
   0x2   : > { %p190_p1 = scmp.lt.s32.totalorder %s413_s15, 3 }
   0x4   : > { %p191_p2 = pnand %p385_p0, %p190_p1 }
   0x5   : > { %p229_p3 = scmp.lt.s32.totalorder (!%p191_p2), %s381_s16, 1 }
   0x6   : > { %194 = sbr.rel (%p191_p2) target bundleno = 29 (0x1d), region = 36 }
   0xb   : > { %s481_s16 = smov (!%p229_p3, %s381_s16), 1  ;;  %vm263_vm0 = vcmask 1043456  }
   0xc   : > { %s396_s17 = sshll.u32 %s481_s16, 3  ;;  %s390_s21 = sshll.u32 %s481_s16, 2 }
   0xd   : > { %s233_s20 = scalar_lea.vmem %s475_s0, %s396_s17  ;;  %s242_s24 = scalar_lea.vmem %s477_s2, %s390_s21 }
   0xe   : > { %v252_v0 = vld [vmem:[%s233_s20] sm:$0xff]  ;;  %s246_s27 = scalar_lea.vmem %s478_s3, %s390_s21  ;;  %s397_s28 = sshll.u32 %s481_s16, 4 }
   0xf   : > { %v253_v1 = vunpack.c.l.bf16 %v252_v0  ;;  %v255_v2 = vld [vmem:[%s242_s24] sm:$0xf]  ;;  %v254_v14 = vunpack.c.h.bf16 %v252_v0  ;;  %s238_s5 = scalar_lea.vmem %s476_s1, %s397_s28  ;;  %s251_s8 = scalar_lea.vmem %s479_s4, %s397_s28 }
  0x10   : > { %v270_v3 = vld [vmem:[%s246_s27] sm:$0xf]  ;;  %v257_v4 = vperm.slane %v255_v2, 0  ;;  %v258_v5 = vperm.slane %v255_v2, 1  ;;  %v259_v8 = vperm.slane %v255_v2, 2  ;;  %v260_v9 = vperm.slane %v255_v2, 3 }
  0x11   : > { %v272_v6 = vperm.slane %v270_v3, 0  ;;  %v273_v7 = vperm.slane %v270_v3, 1  ;;  %v274_v10 = vperm.slane %v270_v3, 2  ;;  %v275_v11 = vperm.slane %v270_v3, 3  ;;  %v284_v22 = vld [vmem:[%s238_s5] sm:$0xff]  ;;  %v285_v25 = vld [vmem:[%s238_s5 + $0x8] sm:$0xff] }
  0x12   : > { %v261_v12 = vrot.slane %v258_v5, 4  ;;  %v262_v15 = vrot.slane %v260_v9, 4 }
  0x13   : > { %v276_v13 = vrot.slane %v273_v7, 4  ;;  %v277_v16 = vrot.slane %v275_v11, 4 }
  0x14   : > { %v264_v17 = vsel %vm263_vm0, %v257_v4, %v261_v12  ;;  %v265_v20 = vsel %vm263_vm0, %v259_v8, %v262_v15 }
  0x15   : > { %v278_v18 = vsel %vm263_vm0, %v272_v6, %v276_v13  ;;  %v268_v19 = vmul.f32 %v264_v17, %v253_v1  ;;  %v279_v21 = vsel %vm263_vm0, %v274_v10, %v277_v16  ;;  %v269_v23 = vmul.f32 %v265_v20, %v254_v14 }
  0x17   : > { %v282_v24 = vadd.f32 %v278_v18, %v268_v19  ;;  %v283_v26 = vadd.f32 %v279_v21, %v269_v23 }
  0x19   : > { %v286_v27 = vadd.f32 %v284_v22, %v282_v24  ;;  %v287_v28 = vadd.f32 %v285_v25, %v283_v26 }
  0x1b   : > { %288 = vst [vmem:[%s251_s8] sm:$0xff] %v286_v27 }
  0x1c   : > { %289 = vst [vmem:[%s251_s8 + $0x8] sm:$0xff] %v287_v28 }
  0x1d PF: > { %s14_s15 = sadd.s32 1, %s413_s15  }
  0x1e   : > { %p11_p4 = scmp.ge.s32.totalorder %s14_s15, 4  }
  0x20   :  { %13 = sbr.rel (!%p11_p4) target bundleno = 1 (0x1), region = 75 }

// kernel: res_blocks_forward.6
= control target key start
LH: loop header
LB: loop body
LE: loop exit
PB: predicated region body
PF: predicated region fallthrough
CT: control target
= control target key end

     0   :  { %s2296_s21 = smov 0   ;;  %s2298_s22 = smov 0   ;;  %s2953_s0 = inlined_call_operand.vmem [shape: f32[2,4,8,8,8], index: 0, kind: input, shape index: {}]   ;;  %s2954_s1 = inlined_call_operand.vmem [shape: bf16[72,24], index: 1, kind: input, shape index: {}]   ;;  %s2955_s2 = inlined_call_operand.vmem [shape: f32[1,8], index: 2, kind: input, shape index: {}]   ;;  %s2956_s3 = inlined_call_operand.vmem [shape: f32[2,1,8], index: 3, kind: input, shape index: {}]   ;;  %s2957_s4 = inlined_call_operand.vmem [shape: f32[2,1,8], index: 4, kind: input, shape index: {}]   ;;  %s2958_s5 = inlined_call_operand.vmem [shape: bf16[2,4,8,8,8], index: 5, kind: output, shape index: {0}]   ;;  %s2959_s6 = inlined_call_operand.vmem [shape: f32[2,2,8], index: 6, kind: output, shape index: {1}]  }
   0x1   :  { %s2300_s23 = smov 0   ;;  %s2302_s24 = smov 0  }
   0x2   :  { %s2304_s25 = smov 0  }
   0x3 LB: > { %s26_s26 = sadd.s32 1, %s2238_s23  ;;  %s29_s27 = sadd.s32 1, %s2242_s24  ;;  %s2246_s25 = sphi %s2304_s25, %s17_s25   ;;  %s2242_s24 = sphi %s2302_s24, %s2973_s24   ;;  %s2238_s23 = sphi %s2300_s23, %s2972_s23   ;;  %s2234_s22 = sphi %s2298_s22, %s2971_s22   ;;  %s2230_s21 = sphi %s2296_s21, %s2970_s21  }
   0x4   : > { %p27_p0 = scmp.ge.s32.totalorder %s26_s26, 5  ;;  %p1971_p1 = scmp.ge.s32.totalorder %s2246_s25, 1 }
   0x5   : > { %p265_p2 = scmp.lt.s32.totalorder %s2246_s25, 11 }
   0x6   : > { %s2975_s26 = smov (%p27_p0, %s26_s26), 0  ;;  %s2977_s27 = smov (!%p27_p0, %s29_s27), %s2242_s24 }
   0x7   : > { %p266_p3 = pnand %p1971_p1, %p265_p2  ;;  %p31_p4 = scmp.ge.s32.totalorder %s2977_s27, 2 }
   0x8   : > { %p318_p5 = scmp.lt.s32.totalorder (!%p266_p3), %s2230_s21, 3  ;;  %p320_p6 = scmp.lt.s32.totalorder (!%p266_p3), %s2234_s22, 1 }
   0x9   : > { %s2979_s27 = smov (%p31_p4, %s2977_s27), 0  ;;  %269 = sbr.rel (%p266_p3) target bundleno = 803 (0x323), region = 40 }
   0xa   : > { %2960 = sst [smem:[#allocation4_spill]] %s2979_s27  ;;  %s1978_s28 = sadd.s32 (!%p266_p3), 4294967295, %s2230_s21 }
   0xb   : > { %p338_p7 = scmp.gt.s32.totalorder (!%p266_p3), %s1978_s28, 0  ;;  %p1979_p8 = scmp.lt.s32.totalorder (!%p266_p3), %s1978_s28, 3 }
   0xc   : > { %p1988_p9 = scmp.ne.s32.totalorder (!%p266_p3), %s2230_s21, 0 }
   0xe   : > { %s319_s29 = scalar_select %p318_p5, %s2230_s21, 3 }
   0xf   : > { %s2981_s22 = smov (!%p320_p6, %s2234_s22), 1  ;;  %s2985_s28 = smov (!%p338_p7, %s1978_s28), 0 }
  0x10   : > { %s2983_s29 = smov (!%p318_p5, %s319_s29), 3  ;;  %s1976_s30 = sshll.u32 %s2981_s22, 5 }
  0x11   : > { %s333_s9 = scalar_lea.vmem %s2956_s3, %s2981_s22  ;;  %s1975_s10 = sshll.u32 %s2983_s29, 3 }
  0x12   : > { %s336_s13 = scalar_lea.vmem %s2957_s4, %s2981_s22  ;;  %s326_s14 = sadd.s32 %s1976_s30, %s1975_s10 }
  0x13   : > { %s1977_s15 = sshll.u32 %s326_s14, 3  ;;  %s1987_s19 = sshll.u32 %s2981_s22, 1 }
  0x14   : > { %s2345_s18 = scalar_lea.vmem %s2953_s0, %s1977_s15  ;;  %s2351_s7 = scalar_lea.vmem %s2959_s6, %s1987_s19 }
  0x15   : > { %s2987_s28 = smov (!%p1979_p8, %s2985_s28), 3  ;;  %360 = sbr.rel (%p1988_p9) target bundleno = 72 (0x48), region = 44 }
  0x16   : > { %s1984_s29 = sshll.u32 %s2987_s28, 3 }
  0x17   : > { %s346_s8 = sadd.s32 %s1984_s29, %s1976_s30 }
  0x18   : > { %s1986_s11 = sshll.u32 %s346_s8, 2 }
  0x19   : > { %s2356_s14 = scalar_lea.vmem %s2958_s5, %s1986_s11 }
  0x1a   : > { %vm361_vm0 = vcmask 64512   ;;  %v2248_v0 = vmov 0.0   ;;  %vm386_vm1 = vcmask 58368   ;;  %vm388_vm2 = vcmask 60416  }
  0x1b   : > { %362 = vst.msk [vmem:[#allocation3] sm:$0xff] %vm361_vm0, %v2248_v0  ;;  %v2249_v1 = vmov 0   ;;  %vm390_vm3 = vcmask 57344  }
  0x1c   : > { %363 = vst.msk [vmem:[#allocation3 + $0x8] sm:$0xff] %vm361_vm0, %v2248_v0 }
  0x1d   : > { %364 = vst.msk [vmem:[#allocation3 + $0x10] sm:$0xff] %vm361_vm0, %v2248_v0 }
  0x1e   : > { %365 = vst.msk [vmem:[#allocation3 + $0x18] sm:$0xff] %vm361_vm0, %v2248_v0 }
  0x1f   : > { %366 = vst.msk [vmem:[#allocation3 + $0x20] sm:$0xff] %vm361_vm0, %v2248_v0 }
  0x20   : > { %367 = vst.msk [vmem:[#allocation3 + $0x28] sm:$0xff] %vm361_vm0, %v2248_v0 }
  0x21   : > { %368 = vst.msk [vmem:[#allocation3 + $0x30] sm:$0xff] %vm361_vm0, %v2248_v0 }
  0x22   : > { %369 = vst.msk [vmem:[#allocation3 + $0x38] sm:$0xff] %vm361_vm0, %v2248_v0 }
  0x23   : > { %370 = vst.msk [vmem:[#allocation3 + $0x40] sm:$0xff] %vm361_vm0, %v2248_v0 }
  0x24   : > { %371 = vst.msk [vmem:[#allocation3 + $0x48] sm:$0xff] %vm361_vm0, %v2248_v0 }
  0x25   : > { %372 = vst.msk [vmem:[#allocation3 + $0x50] sm:$0xff] %vm361_vm0, %v2248_v0 }
  0x26   : > { %373 = vst.msk [vmem:[#allocation3 + $0x58] sm:$0xff] %vm361_vm0, %v2248_v0 }
  0x27   : > { %374 = vst.msk [vmem:[#allocation3 + $0x60] sm:$0xff] %vm361_vm0, %v2248_v0 }
  0x28   : > { %375 = vst.msk [vmem:[#allocation3 + $0x68] sm:$0xff] %vm361_vm0, %v2248_v0 }
  0x29   : > { %376 = vst.msk [vmem:[#allocation3 + $0x70] sm:$0xff] %vm361_vm0, %v2248_v0 }
  0x2a   : > { %377 = vst.msk [vmem:[#allocation3 + $0x78] sm:$0xff] %vm361_vm0, %v2248_v0 }
  0x2b   : > { %378 = vst.msk [vmem:[#allocation3 + $0x80] sm:$0xff] %vm361_vm0, %v2248_v0 }
  0x2c   : > { %379 = vst.msk [vmem:[#allocation3 + $0x88] sm:$0xff] %vm361_vm0, %v2248_v0 }
  0x2d   : > { %380 = vst.msk [vmem:[#allocation3 + $0x90] sm:$0xff] %vm361_vm0, %v2248_v0 }
  0x2e   : > { %381 = vst.msk [vmem:[#allocation3 + $0x98] sm:$0xff] %vm361_vm0, %v2248_v0 }
  0x2f   : > { %382 = vst.msk [vmem:[#allocation3 + $0xa0] sm:$0xff] %vm361_vm0, %v2248_v0 }
  0x30   : > { %383 = vst.msk [vmem:[#allocation3 + $0xa8] sm:$0xff] %vm361_vm0, %v2248_v0 }
  0x31   : > { %384 = vst.msk [vmem:[#allocation3 + $0xb0] sm:$0xff] %vm361_vm0, %v2248_v0 }
  0x32   : > { %385 = vst.msk [vmem:[#allocation3 + $0xb8] sm:$0xff] %vm361_vm0, %v2248_v0 }
  0x33   : > { %387 = vst.msk [vmem:[%s2351_s7] sm:$0x3] %vm386_vm1, %v2248_v0 }
  0x34   : > { %389 = vst.msk [vmem:[#allocation2] sm:$0xf] %vm388_vm2, %v2249_v1 }
  0x35   : > { %392 = vst.msk [vmem:[#allocation2 + $0x8] sm:$0xf] %vm388_vm2, %v2249_v1 }
  0x36   : > { %394 = vst.msk [vmem:[#allocation2 + $0x10] sm:$0xf] %vm388_vm2, %v2249_v1 }
  0x37   : > { %396 = vst.msk [vmem:[#allocation2 + $0x18] sm:$0xf] %vm388_vm2, %v2249_v1 }
  0x38   : > { %398 = vst.msk [vmem:[#allocation2 + $0x20] sm:$0xf] %vm388_vm2, %v2249_v1 }
  0x39   : > { %400 = vst.msk [vmem:[#allocation2 + $0x28] sm:$0xf] %vm388_vm2, %v2249_v1 }
  0x3a   : > { %402 = vst.msk [vmem:[#allocation2 + $0x30] sm:$0xf] %vm388_vm2, %v2249_v1 }
  0x3b   : > { %404 = vst.msk [vmem:[#allocation2 + $0x38] sm:$0xf] %vm388_vm2, %v2249_v1 }
  0x3c   : > { %406 = vst.msk [vmem:[#allocation2 + $0x40] sm:$0xf] %vm388_vm2, %v2249_v1 }
  0x3d   : > { %408 = vst.msk [vmem:[#allocation2 + $0x48] sm:$0xf] %vm388_vm2, %v2249_v1 }
  0x3e   : > { %391 = vst.msk [vmem:[#allocation2 + $0x4] sm:$0x1] %vm390_vm3, %v2249_v1 }
  0x3f   : > { %393 = vst.msk [vmem:[#allocation2 + $0xc] sm:$0x1] %vm390_vm3, %v2249_v1 }
  0x40   : > { %395 = vst.msk [vmem:[#allocation2 + $0x14] sm:$0x1] %vm390_vm3, %v2249_v1 }
  0x41   : > { %397 = vst.msk [vmem:[#allocation2 + $0x1c] sm:$0x1] %vm390_vm3, %v2249_v1 }
  0x42   : > { %399 = vst.msk [vmem:[#allocation2 + $0x24] sm:$0x1] %vm390_vm3, %v2249_v1 }
  0x43   : > { %401 = vst.msk [vmem:[#allocation2 + $0x2c] sm:$0x1] %vm390_vm3, %v2249_v1 }
  0x44   : > { %403 = vst.msk [vmem:[#allocation2 + $0x34] sm:$0x1] %vm390_vm3, %v2249_v1 }
  0x45   : > { %405 = vst.msk [vmem:[#allocation2 + $0x3c] sm:$0x1] %vm390_vm3, %v2249_v1 }
  0x46   : > { %407 = vst.msk [vmem:[#allocation2 + $0x44] sm:$0x1] %vm390_vm3, %v2249_v1 }
  0x47   : > { %409 = vst.msk [vmem:[#allocation2 + $0x4c] sm:$0x1] %vm390_vm3, %v2249_v1 }
  0x48 PF: > { %p1989_p10 = scmp.ge.s32.totalorder %s2230_s21, 4 }
  0x49   : > { %s2250_s22 = smov (!%p1989_p10), 48   ;;  %s2253_s16 = smov (!%p1989_p10), 16  }
  0x4a   : > { %413 = sbr.rel (%p1989_p10) target bundleno = 744 (0x2e8), region = 48  ;;  %s2254_s17 = smov (!%p1989_p10), 8  }
  0x4b   : > { %s2256_s19 = smov (!%p1989_p10), 56   ;;  %s2257_s20 = smov (!%p1989_p10), 64  }
  0x4c   : > { %p1498_p11 = scmp.lt.s32.totalorder (!%p1989_p10), %s2230_s21, 0  ;;  %p2086_p13 = scmp.ge.s32.totalorder (!%p1989_p10), %s2230_s21, 3 }
  0x4f   : > { %v419_v2 = vld [vmem:[%s2345_s18 + $0x28] sm:$0xff]  ;;  %v420_v3 = vld [vmem:[%s2345_s18 + $0x30] sm:$0xff]  ;;  %v2392_v4 = vld [vmem:[%s333_s9] ss:$0 sm:$0xff]  ;;  %vm535_vm4 = vcmask 60416   ;;  %vm541_vm6 = vcmask 57344  }
  0x50   : > { %v2399_v5 = vld [vmem:[%s336_s13] ss:$0 sm:$0xff]  ;;  %v431_v6 = vmul.f32 %v2392_v4, %v419_v2  ;;  %v432_v7 = vmul.f32 %v2392_v4, %v420_v3  ;;  %v421_v8 = vld [vmem:[%s2345_s18 + $0x38] sm:$0xff]  ;;  %vm536_vm5 = vsmask.f32 7938  ;;  %v415_v22 = vld [vmem:[%s2345_s18 + $0x8] sm:$0xff] }
  0x51   : > { %v433_v9 = vmul.f32 %v2392_v4, %v421_v8  ;;  %v417_v12 = vld [vmem:[%s2345_s18 + $0x18] sm:$0xff]  ;;  %v418_v13 = vld [vmem:[%s2345_s18 + $0x20] sm:$0xff]  ;;  %vm542_vm7 = vsmask.f32 256  ;;  %v416_v31 = vld [vmem:[%s2345_s18 + $0x10] sm:$0xff]  ;;  %v427_v37 = vmul.f32 %v2392_v4, %v415_v22  ;;  %vm744_vm10 = vcmask 1042432  }
  0x52   : > { %v443_v10 = vadd.f32 %v2399_v5, %v431_v6  ;;  %v444_v11 = vadd.f32 %v2399_v5, %v432_v7  ;;  %v429_v15 = vmul.f32 %v2392_v4, %v417_v12  ;;  %v430_v16 = vmul.f32 %v2392_v4, %v418_v13  ;;  %vm2418_vm8 = vmand %vm535_vm4, %vm536_vm5  ;;  %v571_v35 = vld [vmem:[#allocation2 + $0x30] sm:$0xf]  ;;  %v577_v36 = vld [vmem:[#allocation2 + $0x38] sm:$0xf]  ;;  %s2251_s9 = smov 40   ;;  %s2252_s13 = smov 24  }
  0x53   : > { %v445_v14 = vadd.f32 %v2399_v5, %v433_v9  ;;  %vm2425_vm9 = vmand %vm541_vm6, %vm542_vm7  ;;  %v580_v40 = vld [vmem:[#allocation2 + $0x3c] sm:$0x1]  ;;  %v583_v47 = vld [vmem:[#allocation2 + $0x40] sm:$0xf]  ;;  %v428_v48 = vmul.f32 %v2392_v4, %v416_v31  ;;  %v439_v3 = vadd.f32 %v2399_v5, %v427_v37  ;;  %vm745_vm11 = vcmask 1046532   ;;  %s1573_s11 = sadd.s32 (!%p2086_p13), 1, %s2230_s21 }
  0x54   : > { %v451_v17 = vpack.c.bf16 %v443_v10, %v443_v10  ;;  %v452_v18 = vpack.c.bf16 %v444_v11, %v444_v11  ;;  %v441_v20 = vadd.f32 %v2399_v5, %v429_v15  ;;  %v442_v21 = vadd.f32 %v2399_v5, %v430_v16  ;;  %v586_v51 = vld [vmem:[#allocation2 + $0x44] sm:$0x1]  ;;  %v559_v58 = vld [vmem:[#allocation2 + $0x20] sm:$0xf]  ;;  %v565_v2 = vld [vmem:[#allocation2 + $0x28] sm:$0xf] }
  0x55   : > { %v453_v19 = vpack.c.bf16 %v445_v14, %v445_v14  ;;  %v562_v62 = vld [vmem:[#allocation2 + $0x24] sm:$0x1]  ;;  %v568_v8 = vld [vmem:[#allocation2 + $0x2c] sm:$0x1]  ;;  %v440_v9 = vadd.f32 %v2399_v5, %v428_v48  ;;  %v574_v11 = vld [vmem:[#allocation2 + $0x34] sm:$0x1]  ;;  %v2446_v12 = vpack.c.bf16 %v439_v3, %v439_v3 }
  0x56   : > { %v495_v23 = vshrl.u32 %v451_v17, 16  ;;  %v498_v24 = vshll.u32 %v451_v17, 16  ;;  %v503_v25 = vshrl.u32 %v452_v18, 16  ;;  %v506_v26 = vshll.u32 %v452_v18, 16  ;;  %v414_v13 = vld [vmem:[%s2345_s18] sm:$0xff]  ;;  %vm2464_vm14 = vmor %vm744_vm10, %vm745_vm11  ;;  %s2255_s18 = smov 32  }
  0x57   : > { %v511_v27 = vshrl.u32 %v453_v19, 16  ;;  %v514_v28 = vshll.u32 %v453_v19, 16  ;;  %v449_v29 = vpack.c.bf16 %v441_v20, %v441_v20  ;;  %v450_v30 = vpack.c.bf16 %v442_v21, %v442_v21  ;;  %s1575_s10 = ssub.s32 (!%p2086_p13), 0, %s1573_s11  ;;  %p1574_p0 = scmp.lt.s32.totalorder (!%p2086_p13), %s1573_s11, 0 }
  0x58   : > { %v497_v32 = vrot.slane %v495_v23, 7  ;;  %v505_v33 = vrot.slane %v503_v25, 7  ;;  %v2453_v16 = vpack.c.bf16 %v440_v9, %v440_v9  ;;  %v463_v18 = vshrl.u32 %v2446_v12, 16  ;;  %s2087_s12 = smin.u32 (!%p2086_p13), %s1575_s10, %s1573_s11 }
  0x59   : > { %v513_v38 = vrot.slane %v511_v27, 7  ;;  %v479_v41 = vshrl.u32 %v449_v29, 16  ;;  %v482_v42 = vshll.u32 %v449_v29, 16  ;;  %v487_v43 = vshrl.u32 %v450_v30, 16 }
  0x5a   : > { %v500_v44 = vor.u32 %v498_v24, %v497_v32  ;;  %v508_v45 = vor.u32 %v506_v26, %v505_v33  ;;  %v509_v46 = vrot.slane %v505_v33, 4  ;;  %v490_v57 = vshll.u32 %v450_v30, 16 }
  0x5b   : > { %v516_v49 = vor.u32 %v514_v28, %v513_v38  ;;  %v517_v50 = vrot.slane %v513_v38, 4  ;;  %v481_v52 = vrot.slane %v479_v41, 7  ;;  %v489_v53 = vrot.slane %v487_v43, 7 }
  0x5c   : > { %v572_v54 = vsel %vm2418_vm8, %v500_v44, %v571_v35  ;;  %v578_v55 = vsel %vm2418_vm8, %v508_v45, %v577_v36  ;;  %v581_v56 = vsel %vm2425_vm9, %v509_v46, %v580_v40  ;;  %v501_v6 = vrot.slane %v497_v32, 4 }
  0x5d   : > { %573 = vst [vmem:[#allocation2 + $0x30] sm:$0xf] %v572_v54  ;;  %v584_v59 = vsel %vm2418_vm8, %v516_v49, %v583_v47  ;;  %v484_v60 = vor.u32 %v482_v42, %v481_v52  ;;  %v485_v61 = vrot.slane %v481_v52, 4  ;;  %v587_v63 = vsel %vm2425_vm9, %v517_v50, %v586_v51 }
  0x5e   : > { %579 = vst [vmem:[#allocation2 + $0x38] sm:$0xf] %v578_v55  ;;  %v492_v0 = vor.u32 %v490_v57, %v489_v53  ;;  %v493_v1 = vrot.slane %v489_v53, 4  ;;  %v575_v17 = vsel %vm2425_vm9, %v501_v6, %v574_v11  ;;  %v466_v19 = vshll.u32 %v2446_v12, 16 }
  0x5f   : > { %582 = vst [vmem:[#allocation2 + $0x3c] sm:$0x1] %v581_v56  ;;  %v560_v7 = vsel %vm2418_vm8, %v484_v60, %v559_v58  ;;  %v563_v10 = vsel %vm2425_vm9, %v485_v61, %v562_v62  ;;  %v426_v20 = vmul.f32 %v2392_v4, %v414_v13  ;;  %vm605_vm12 = vsmask.f32 3328 }
  0x60   : > { %585 = vst [vmem:[#allocation2 + $0x40] sm:$0xf] %v584_v59  ;;  %v566_v14 = vsel %vm2418_vm8, %v492_v0, %v565_v2  ;;  %v569_v15 = vsel %vm2425_vm9, %v493_v1, %v568_v8  ;;  %vm606_vm13 = vsmask.f32 7440  ;;  %v471_v4 = vshrl.u32 %v2453_v16, 16 }
  0x61   : > { %588 = vst [vmem:[#allocation2 + $0x44] sm:$0x1] %v587_v63  ;;  %v474_v32 = vshll.u32 %v2453_v16, 16  ;;  %v438_v33 = vadd.f32 %v2399_v5, %v426_v20  ;;  %vm2496_vm15 = vmor %vm605_vm12, %vm606_vm13  ;;  %vm1465_vm0 = vcmask 1043456   ;;  %vm1344_vm1 = vcmask 64512  }
  0x62   : > { %561 = vst [vmem:[#allocation2 + $0x20] sm:$0xf] %v560_v7  ;;  %vm1357_vm2 = vcmask 130048   ;;  %vm1366_vm3 = vcmask 195584   ;;  %vm1375_vm4 = vcmask 261120   ;;  %vm1384_vm5 = vcmask 326656  }
  0x63   : > { %564 = vst [vmem:[#allocation2 + $0x24] sm:$0x1] %v563_v10  ;;  %v2488_v56 = vpack.c.bf16 %v438_v33, %v438_v33  ;;  %vm1393_vm6 = vcmask 392192   ;;  %vm1411_vm7 = vcmask 523264  }
  0x64   : > { %v2056_v21 = vld [vmem:[#allocation2 + $0x30] sm:$0xf]  ;;  %567 = vst [vmem:[#allocation2 + $0x28] sm:$0xf] %v566_v14 }
  0x65   : > { %v2460_v22 = vld [vmem:[#allocation2 + $0x30] sm:$0xe]  ;;  %v2115_v23 = vld [vmem:[#allocation2 + $0x34] sm:$0xf0]  ;;  %570 = vst [vmem:[#allocation2 + $0x2c] sm:$0x1] %v569_v15 }
  0x66   : > { %v913_v24 = vld [vmem:[#allocation2 + $0x38] sm:$0xe]  ;;  %v2057_v25 = vor.u32 %v2115_v23, %v2056_v21  ;;  %v2468_v27 = vld [vmem:[#allocation2 + $0x3c] sm:$0x1]  ;;  %576 = vst [vmem:[#allocation2 + $0x34] sm:$0x1] %v575_v17 }
  0x67   : > { %v2004_v28 = vrot.slane %v913_v24, 9  ;;  %v914_v29 = vld [vmem:[#allocation2 + $0x40] sm:$0xe]  ;;  %v957_v30 = vrot.slane %v2468_v27, 5  ;;  %v2472_v31 = vld [vmem:[#allocation2 + $0x3c] sm:$0x1] }
  0x68   : > { %1300 = vrot.lane.b32.xlu1 %v2057_v25, %s2250_s22  ;;  %v2477_v35 = vld [vmem:[#allocation2 + $0x44] sm:$0x1]  ;;  %v889_v36 = vshll.u32 %v2468_v27, 16  ;;  %v2005_v37 = vrot.slane %v914_v29, 9  ;;  %v1996_v38 = vrot.slane %v2460_v22, 9  ;;  %v777_v40 = vrot.slane %v2472_v31, 5 }
  0x69   : > { %v903_v41 = vshll.u32 %v2477_v35, 16  ;;  %v958_v42 = vsel %vm2464_vm14, %v2004_v28, %v957_v30  ;;  %v961_v43 = vrot.slane %v2477_v35, 5  ;;  %v724_v5 = vld [vmem:[#allocation2 + $0x20] sm:$0xe]  ;;  %v727_v55 = vld [vmem:[#allocation2 + $0x38] sm:$0xe] }
  0x6a   : > { %v593_v44 = vld [vmem:[#allocation2 + $0x20] sm:$0xf]  ;;  %v1262_v45 = vunpack.c.l.b16 %v958_v42  ;;  %v601_v46 = vld [vmem:[#allocation2 + $0x24] sm:$0x1]  ;;  %v1994_v47 = vrot.slane %v724_v5, 9  ;;  %v1997_v24 = vrot.slane %v727_v55, 9 }
  0x6b   : > { %v665_v48 = vshrl.u32 %v593_v44, 16  ;;  %v668_v49 = vshll.u32 %v593_v44, 16  ;;  %v962_v50 = vsel %vm2464_vm14, %v2005_v37, %v961_v43  ;;  %v725_v51 = vld [vmem:[#allocation2 + $0x28] sm:$0xe]  ;;  %v765_v52 = vrot.slane %v601_v46, 5 }
  0x6c   : > { %v594_v53 = vld [vmem:[#allocation2 + $0x28] sm:$0xf]  ;;  %v674_v54 = vshll.u32 %v601_v46, 16  ;;  %v1263_v57 = vunpack.c.l.b16 %v962_v50  ;;  %v602_v58 = vld [vmem:[#allocation2 + $0x2c] sm:$0x1]  ;;  %v1995_v59 = vrot.slane %v725_v51, 9  ;;  %v778_v5 = vsel %vm2464_vm14, %v1997_v24, %v777_v40 }
  0x6d   : > { %v667_v60 = vrot.slane %v665_v48, 4  ;;  %v670_v61 = vrot.slane %v668_v49, 5  ;;  %v766_v62 = vsel %vm2464_vm14, %v1994_v47, %v765_v52  ;;  %v769_v63 = vrot.slane %v602_v58, 5  ;;  %v603_v2 = vld [vmem:[#allocation2 + $0x34] sm:$0x1] }
  0x6e   : > { %v676_v0 = vrot.slane %v674_v54, 5  ;;  %v679_v1 = vshrl.u32 %v594_v53, 16  ;;  %v1267_v3 = vpack.c.b16 %v1263_v57, %v1262_v45  ;;  %v1192_v6 = vunpack.c.l.b16 %v766_v62  ;;  %v2040_v9 = vld [vmem:[#allocation2 + $0x28] sm:$0xf]  ;;  %v2111_v10 = vld [vmem:[#allocation2 + $0x2c] sm:$0xf0] }
  0x6f   : > { %v671_v7 = vor.u32 %v670_v61, %v667_v60  ;;  %v682_v8 = vshll.u32 %v594_v53, 16  ;;  %v770_v11 = vsel %vm2464_vm14, %v1995_v59, %v769_v63  ;;  %v688_v15 = vshll.u32 %v602_v58, 16  ;;  %v595_v20 = vld [vmem:[#allocation2 + $0x30] sm:$0xf]  ;;  %v596_v30 = vld [vmem:[#allocation2 + $0x38] sm:$0xf] }
  0x70   : > { %v681_v14 = vrot.slane %v679_v1, 4  ;;  %v773_v17 = vrot.slane %v603_v2, 5  ;;  %1274 = vrot.lane.b32.xlu0 %v1267_v3, %s2251_s9  ;;  %v1193_v21 = vunpack.c.l.b16 %v770_v11  ;;  %v2041_v29 = vor.u32 %v2111_v10, %v2040_v9  ;;  %v785_v44 = vld [vmem:[#allocation2 + $0x38] sm:$0xf]  ;;  %v786_v40 = vld [vmem:[#allocation2 + $0x40] sm:$0xf] }
  0x71   : > { %v672_v22 = vrot.slane %v671_v7, 4  ;;  %v684_v23 = vrot.slane %v682_v8, 5  ;;  %v690_v25 = vrot.slane %v688_v15, 5  ;;  %v693_v33 = vshrl.u32 %v595_v20, 16  ;;  %v2044_v61 = vld [vmem:[#allocation2 + $0x38] sm:$0xf] }
  0x72   : > { %v774_v28 = vsel %vm2464_vm14, %v1996_v38, %v773_v17  ;;  %v1198_v37 = vpack.c.b16 %v1193_v21, %v1192_v6  ;;  %v1195_v47 = vunpack.c.l.b16 %v778_v5  ;;  %1232 = vrot.lane.b32.xlu2 %v2041_v29, %s2252_s13  ;;  %v696_v49 = vshll.u32 %v595_v20, 16  ;;  %v2112_v3 = vld [vmem:[#allocation2 + $0x3c] sm:$0xf0]  ;;  %v783_v8 = vld [vmem:[#allocation2 + $0x28] sm:$0xf] }
  0x73   : > { %v677_v42 = vsel %vm2496_vm15, %v672_v22, %v676_v0  ;;  %v685_v43 = vor.u32 %v684_v23, %v681_v14  ;;  %v1194_v46 = vunpack.c.l.b16 %v774_v28  ;;  %v695_v48 = vrot.slane %v693_v33, 4  ;;  %v784_v15 = vld [vmem:[#allocation2 + $0x30] sm:$0xf]  ;;  %v2516_v17 = vld [vmem:[#allocation2 + $0x2c] sm:$0x1] }
  0x74   : > { %v1172_v45 = vunpack.c.l.b16 %v677_v42  ;;  %1204 = vrot.lane.b32.xlu1 %v1198_v37, %s2253_s16  ;;  %v702_v50 = vshll.u32 %v603_v2, 16  ;;  %v707_v51 = vshrl.u32 %v596_v30, 16  ;;  %v710_v53 = vshll.u32 %v596_v30, 16  ;;  %v2523_v28 = vld [vmem:[#allocation2 + $0x34] sm:$0x1] }
  0x75   : > { %v686_v38 = vrot.slane %v685_v43, 4  ;;  %v1199_v52 = vpack.c.b16 %v1195_v47, %v1194_v46  ;;  %v716_v54 = vshll.u32 %v2472_v31, 16  ;;  %v880_v55 = vshrl.u32 %v785_v44, 16 }
  0x76   : > { %v698_v58 = vrot.slane %v696_v49, 5  ;;  %v704_v59 = vrot.slane %v702_v50, 5  ;;  %v709_v60 = vrot.slane %v707_v51, 4  ;;  %v712_v63 = vrot.slane %v710_v53, 5 }
  0x77   : > { %v691_v57 = vsel %vm2496_vm15, %v686_v38, %v690_v25  ;;  %v718_v0 = vrot.slane %v716_v54, 5  ;;  %v882_v1 = vrot.slane %v880_v55, 4  ;;  %v883_v6 = vshll.u32 %v785_v44, 16  ;;  %v2060_v54 = vld [vmem:[#allocation2 + $0x40] sm:$0xf] }
  0x78   : > { %v1173_v62 = vunpack.c.l.b16 %v691_v57  ;;  %v699_v2 = vor.u32 %v698_v58, %v695_v48  ;;  %v891_v7 = vrot.slane %v889_v36, 5  ;;  %v894_v31 = vshrl.u32 %v786_v40, 16 }
  0x79   : > { %v713_v10 = vor.u32 %v712_v63, %v709_v60  ;;  %v897_v11 = vshll.u32 %v786_v40, 16  ;;  %v905_v14 = vrot.slane %v903_v41, 5  ;;  %v885_v21 = vrot.slane %v883_v6, 5  ;;  %v2116_v40 = vld [vmem:[#allocation2 + $0x44] sm:$0xf0] }
  0x7a   : > { %v1178_v9 = vpack.c.b16 %v1173_v62, %v1172_v45  ;;  %v700_v20 = vrot.slane %v699_v2, 4  ;;  %v896_v22 = vrot.slane %v894_v31, 4  ;;  %v2045_v23 = vor.u32 %v2112_v3, %v2044_v61  ;;  %v547_v60 = vld [vmem:[#allocation2 + $0x10] sm:$0xf]  ;;  %v550_v61 = vld [vmem:[#allocation2 + $0x14] sm:$0x1] }
  0x7b   : > { %v714_v27 = vrot.slane %v713_v10, 4  ;;  %v899_v36 = vrot.slane %v897_v11, 5  ;;  %v852_v24 = vshrl.u32 %v783_v8, 16  ;;  %v855_v25 = vshll.u32 %v783_v8, 16  ;;  %v556_v10 = vld [vmem:[#allocation2 + $0x1c] sm:$0x1] }
  0x7c   : > { %1184 = vrot.lane.b32.xlu0 %v1178_v9, %s2254_s17  ;;  %1206 = vrot.lane.b32.xlu1 %v1199_v52, %s2253_s16  ;;  %v705_v35 = vsel %vm2496_vm15, %v700_v20, %v704_v59  ;;  %v886_v41 = vor.u32 %v885_v21, %v882_v1  ;;  %v861_v29 = vshll.u32 %v2516_v17, 16  ;;  %v866_v30 = vshrl.u32 %v784_v15, 16  ;;  %v597_v11 = vld [vmem:[#allocation2 + $0x4] sm:$0x1]  ;;  %v538_v21 = vld [vmem:[#allocation2 + $0x8] sm:$0xf] }
  0x7d   : > { %1234 = vrot.lane.b32.xlu2 %v2045_v23, %s2252_s13  ;;  %v719_v33 = vsel %vm2496_vm15, %v714_v27, %v718_v0  ;;  %v1174_v37 = vunpack.c.l.b16 %v705_v35  ;;  %v900_v42 = vor.u32 %v899_v36, %v896_v22  ;;  %v854_v43 = vrot.slane %v852_v24, 4  ;;  %v720_v22 = vld [vmem:[#allocation2] sm:$0xe]  ;;  %v544_v35 = vld [vmem:[#allocation2 + $0xc] sm:$0x1] }
  0x7e   : > { %v1175_v5 = vunpack.c.l.b16 %v719_v33  ;;  %v887_v44 = vrot.slane %v886_v41, 4  ;;  %v857_v45 = vrot.slane %v855_v25, 5  ;;  %v863_v46 = vrot.slane %v861_v29, 5  ;;  %v911_v41 = vld [vmem:[#allocation2 + $0x28] sm:$0xe] }
  0x7f   : > { %v901_v47 = vrot.slane %v900_v42, 4  ;;  %v868_v48 = vrot.slane %v866_v30, 4  ;;  %v869_v38 = vshll.u32 %v784_v15, 16  ;;  %v875_v49 = vshll.u32 %v2523_v28, 16  ;;  %v2558_v29 = vld [vmem:[#allocation2 + $0x40] sm:$0xf] }
  0x80   : > { %v1179_v50 = vpack.c.b16 %v1175_v5, %v1174_v37  ;;  %v892_v51 = vsel %vm2496_vm15, %v887_v44, %v891_v7  ;;  %v858_v52 = vor.u32 %v857_v45, %v854_v43  ;;  %v465_v53 = vrot.slane %v463_v18, 7  ;;  %v589_v7 = vld [vmem:[#allocation2] sm:$0xf]  ;;  %v912_v42 = vld [vmem:[#allocation2 + $0x30] sm:$0xe] }
  0x81   : > { %v906_v55 = vsel %vm2496_vm15, %v901_v47, %v905_v14  ;;  %v1242_v57 = vunpack.c.l.b16 %v892_v51  ;;  %v871_v58 = vrot.slane %v869_v38, 5  ;;  %v877_v59 = vrot.slane %v875_v49, 5 }
  0x82   : > { %v1243_v62 = vunpack.c.l.b16 %v906_v55  ;;  %v859_v63 = vrot.slane %v858_v52, 4  ;;  %v468_v0 = vor.u32 %v466_v19, %v465_v53  ;;  %v469_v1 = vrot.slane %v465_v53, 4  ;;  %v553_v19 = vld [vmem:[#allocation2 + $0x18] sm:$0xf] }
  0x83   : > { %v872_v3 = vor.u32 %v871_v58, %v868_v48  ;;  %v473_v18 = vrot.slane %v471_v4, 7  ;;  %v2061_v2 = vor.u32 %v2116_v40, %v2060_v54  ;;  %v455_v6 = vshrl.u32 %v2488_v56, 16 }
  0x84   : > { %1186 = vrot.lane.b32.xlu0 %v1179_v50, %s2254_s17  ;;  %v1247_v31 = vpack.c.b16 %v1243_v62, %v1242_v57  ;;  %v864_v8 = vsel %vm2496_vm15, %v859_v63, %v863_v46  ;;  %v548_v9 = vsel %vm2418_vm8, %v468_v0, %v547_v60  ;;  %v551_v12 = vsel %vm2425_vm9, %v469_v1, %v550_v61 }
  0x85   : > { %v873_v14 = vrot.slane %v872_v3, 4  ;;  %v1240_v15 = vunpack.c.l.b16 %v864_v8  ;;  %v476_v4 = vor.u32 %v474_v32, %v473_v18  ;;  %v477_v20 = vrot.slane %v473_v18, 4  ;;  %549 = vst [vmem:[#allocation2 + $0x10] sm:$0xf] %v548_v9  ;;  %1302 = vrot.lane.b32.xlu2 %v2061_v2, %s2250_s22 }
  0x86   : > { %1254 = vrot.lane.b32.xlu1 %v1247_v31, %s2255_s18  ;;  %552 = vst [vmem:[#allocation2 + $0x14] sm:$0x1] %v551_v12  ;;  %v457_v23 = vrot.slane %v455_v6, 7  ;;  %v458_v27 = vshll.u32 %v2488_v56, 16  ;;  %v609_v36 = vshrl.u32 %v589_v7, 16  ;;  %v612_v24 = vshll.u32 %v589_v7, 16 }
  0x87   : > { %v878_v25 = vsel %vm2496_vm15, %v873_v14, %v877_v59  ;;  %v554_v16 = vsel %vm2418_vm8, %v476_v4, %v553_v19  ;;  %v557_v32 = vsel %vm2425_vm9, %v477_v20, %v556_v10  ;;  %v618_v5 = vshll.u32 %v597_v11, 16 }
  0x88   : > { %v1241_v30 = vunpack.c.l.b16 %v878_v25  ;;  %555 = vst [vmem:[#allocation2 + $0x18] sm:$0xf] %v554_v16  ;;  %v460_v33 = vor.u32 %v458_v27, %v457_v23  ;;  %v461_v37 = vrot.slane %v457_v23, 4  ;;  %v611_v56 = vrot.slane %v609_v36, 4  ;;  %v971_v27 = vld [vmem:[#allocation2 + $0x48] sm:$0xf] }
  0x89   : > { %558 = vst [vmem:[#allocation2 + $0x1c] sm:$0x1] %v557_v32  ;;  %v614_v43 = vrot.slane %v612_v24, 5  ;;  %v1990_v44 = vrot.slane %v720_v22, 9  ;;  %v2002_v48 = vrot.slane %v911_v41, 9  ;;  %v749_v49 = vrot.slane %v597_v11, 5 }
  0x8a   : > { %v1246_v45 = vpack.c.b16 %v1241_v30, %v1240_v15  ;;  %v539_v46 = vsel %vm2418_vm8, %v460_v33, %v538_v21  ;;  %v545_v47 = vsel %vm2425_vm9, %v461_v37, %v544_v35  ;;  %v949_v50 = vrot.slane %v2516_v17, 5  ;;  %v978_v32 = vld [vmem:[#allocation2 + $0x44] sm:$0x1]  ;;  %v979_v30 = vld [vmem:[#allocation2 + $0x4c] sm:$0x1] }
  0x8b   : > { %540 = vst [vmem:[#allocation2 + $0x8] sm:$0xf] %v539_v46  ;;  %v615_v38 = vor.u32 %v614_v43, %v611_v56  ;;  %v2003_v51 = vrot.slane %v912_v42, 9  ;;  %v953_v53 = vrot.slane %v2523_v28, 5  ;;  %v1065_v54 = vshrl.u32 %v2558_v29, 16 }
  0x8c   : > { %1252 = vrot.lane.b32.xlu0 %v1246_v45, %s2255_s18  ;;  %v591_v52 = vld [vmem:[#allocation2 + $0x10] sm:$0xf]  ;;  %546 = vst [vmem:[#allocation2 + $0xc] sm:$0x1] %v545_v47  ;;  %v620_v55 = vrot.slane %v618_v5, 5  ;;  %v950_v57 = vsel %vm2464_vm14, %v2002_v48, %v949_v50  ;;  %v2577_v63 = vsel %vm2464_vm14, %v1990_v44, %v749_v49  ;;  %v1068_v9 = vshll.u32 %v2558_v29, 16 }
  0x8d   : > { %v2568_v34 = vld [vmem:[#allocation2 + $0x14] sm:$0x1]  ;;  %v637_v40 = vshrl.u32 %v591_v52, 16  ;;  %v640_v39 = vshll.u32 %v591_v52, 16  ;;  %v616_v17 = vrot.slane %v615_v38, 4  ;;  %v954_v59 = vsel %vm2464_vm14, %v2003_v51, %v953_v53 }
  0x8e   : > { %v646_v58 = vshll.u32 %v2568_v34, 16  ;;  %v1260_v60 = vunpack.c.l.b16 %v950_v57  ;;  %v1261_v0 = vunpack.c.l.b16 %v954_v59  ;;  %v1067_v6 = vrot.slane %v1065_v54, 4  ;;  %v1098_v50 = vld [vmem:[#allocation2 + $0x40] sm:$0xe] }
  0x8f   : > { %v592_v61 = vld [vmem:[#allocation2 + $0x18] sm:$0xf]  ;;  %v639_v62 = vrot.slane %v637_v40, 4  ;;  %v642_v28 = vrot.slane %v640_v39, 5  ;;  %v621_v11 = vsel %vm2496_vm15, %v616_v17, %v620_v55  ;;  %v1188_v15 = vunpack.c.l.b16 %v2577_v63  ;;  %v1099_v40 = vld [vmem:[#allocation2 + $0x48] sm:$0xe] }
  0x90   : > { %v2579_v1 = vld [vmem:[#allocation2 + $0x1c] sm:$0x1]  ;;  %v648_v3 = vrot.slane %v646_v58, 5  ;;  %v651_v18 = vshrl.u32 %v592_v61, 16  ;;  %v654_v2 = vshll.u32 %v592_v61, 16  ;;  %v1266_v8 = vpack.c.b16 %v1261_v0, %v1260_v60 }
  0x91   : > { %v643_v7 = vor.u32 %v642_v28, %v639_v62  ;;  %v660_v31 = vshll.u32 %v2579_v1, 16  ;;  %v1070_v33 = vrot.slane %v1068_v9, 5  ;;  %v1168_v42 = vunpack.c.l.b16 %v621_v11  ;;  %v968_v17 = vld [vmem:[#allocation2 + $0x30] sm:$0xf] }
  0x92   : > { %v653_v12 = vrot.slane %v651_v18, 4  ;;  %v656_v19 = vrot.slane %v654_v2, 5  ;;  %v590_v10 = vld [vmem:[#allocation2 + $0x8] sm:$0xf]  ;;  %1272 = vrot.lane.b32.xlu2 %v1266_v8, %s2251_s9  ;;  %v1074_v46 = vshll.u32 %v978_v32, 16  ;;  %v1079_v48 = vshrl.u32 %v971_v27, 16 }
  0x93   : > { %v721_v14 = vld [vmem:[#allocation2 + $0x8] sm:$0xe]  ;;  %v644_v4 = vrot.slane %v643_v7, 4  ;;  %v662_v20 = vrot.slane %v660_v31, 5  ;;  %v598_v21 = vld [vmem:[#allocation2 + $0xc] sm:$0x1]  ;;  %v1071_v45 = vor.u32 %v1070_v33, %v1067_v6 }
  0x94   : > { %v623_v22 = vshrl.u32 %v590_v10, 16  ;;  %v626_v23 = vshll.u32 %v590_v10, 16  ;;  %v657_v36 = vor.u32 %v656_v19, %v653_v12  ;;  %v632_v24 = vshll.u32 %v598_v21, 16  ;;  %v969_v18 = vld [vmem:[#allocation2 + $0x38] sm:$0xf] }
  0x95   : > { %v1991_v25 = vrot.slane %v721_v14, 9  ;;  %v753_v16 = vrot.slane %v598_v21, 5  ;;  %v649_v35 = vsel %vm2496_vm15, %v644_v4, %v648_v3  ;;  %v1082_v38 = vshll.u32 %v971_v27, 16  ;;  %v976_v2 = vld [vmem:[#allocation2 + $0x34] sm:$0x1] }
  0x96   : > { %v625_v41 = vrot.slane %v623_v22, 4  ;;  %v628_v29 = vrot.slane %v626_v23, 5  ;;  %v658_v37 = vrot.slane %v657_v36, 4  ;;  %v1170_v56 = vunpack.c.l.b16 %v649_v35  ;;  %v977_v10 = vld [vmem:[#allocation2 + $0x3c] sm:$0x1] }
  0x97   : > { %v754_v43 = vsel %vm2464_vm14, %v1991_v25, %v753_v16  ;;  %v634_v44 = vrot.slane %v632_v24, 5  ;;  %v1088_v49 = vshll.u32 %v979_v30, 16  ;;  %v1072_v54 = vrot.slane %v1071_v45, 4  ;;  %v1096_v22 = vld [vmem:[#allocation2 + $0x30] sm:$0xe] }
  0x98   : > { %v629_v5 = vor.u32 %v628_v29, %v625_v41  ;;  %v663_v47 = vsel %vm2496_vm15, %v658_v37, %v662_v20  ;;  %v1189_v53 = vunpack.c.l.b16 %v754_v43  ;;  %v1076_v39 = vrot.slane %v1074_v46, 5  ;;  %v1097_v24 = vld [vmem:[#allocation2 + $0x38] sm:$0xe]  ;;  %v779_v41 = vld [vmem:[#allocation2 + $0x8] sm:$0xf] }
  0x99   : > { %v1171_v51 = vunpack.c.l.b16 %v663_v47  ;;  %v1081_v55 = vrot.slane %v1079_v48, 4  ;;  %v1084_v57 = vrot.slane %v1082_v38, 5  ;;  %v1090_v58 = vrot.slane %v1088_v49, 5  ;;  %v780_v29 = vld [vmem:[#allocation2 + $0x10] sm:$0xf] }
  0x9a   : > { %v630_v52 = vrot.slane %v629_v5, 4  ;;  %v2012_v61 = vrot.slane %v1098_v50, 9  ;;  %v1142_v62 = vrot.slane %v978_v32, 5  ;;  %v1077_v63 = vsel %vm2496_vm15, %v1072_v54, %v1076_v39 }
  0x9b   : > { %v1177_v59 = vpack.c.b16 %v1171_v51, %v1170_v56  ;;  %v1085_v0 = vor.u32 %v1084_v57, %v1081_v55  ;;  %v2013_v3 = vrot.slane %v1099_v40, 9  ;;  %v1196_v6 = vpack.c.b16 %v1189_v53, %v1188_v15  ;;  %v2615_v55 = vld [vmem:[#allocation2 + $0x14] sm:$0x1] }
  0x9c   : > { %v635_v60 = vsel %vm2496_vm15, %v630_v52, %v634_v44  ;;  %v1143_v7 = vsel %vm2464_vm14, %v2012_v61, %v1142_v62  ;;  %v1146_v31 = vrot.slane %v979_v30, 5  ;;  %v1037_v8 = vshrl.u32 %v968_v17, 16  ;;  %v723_v61 = vld [vmem:[#allocation2 + $0x18] sm:$0xe] }
  0x9d   : > { %v1169_v28 = vunpack.c.l.b16 %v635_v60  ;;  %1182 = vrot.lane.b32.xlu1 %v1177_v59, %s2254_s17  ;;  %v1086_v12 = vrot.slane %v1085_v0, 4  ;;  %v1310_v19 = vunpack.c.l.b16 %v1077_v63  ;;  %v1040_v11 = vshll.u32 %v968_v17, 16  ;;  %v722_v60 = vld [vmem:[#allocation2 + $0x10] sm:$0xe] }
  0x9e   : > { %v1147_v14 = vsel %vm2464_vm14, %v2013_v3, %v1146_v31  ;;  %v1039_v4 = vrot.slane %v1037_v8, 4  ;;  %v1046_v20 = vshll.u32 %v976_v2, 16  ;;  %v1051_v21 = vshrl.u32 %v969_v18, 16 }
  0x9f   : > { %v1176_v9 = vpack.c.b16 %v1169_v28, %v1168_v42  ;;  %v1091_v15 = vsel %vm2496_vm15, %v1086_v12, %v1090_v58  ;;  %v1330_v23 = vunpack.c.l.b16 %v1143_v7  ;;  %v1042_v27 = vrot.slane %v1040_v11, 5  ;;  %v2605_v42 = vld [vmem:[#allocation2 + $0xc] sm:$0x1]  ;;  %v909_v7 = vld [vmem:[#allocation2 + $0x18] sm:$0xe] }
  0xa0   : > { %v1054_v36 = vshll.u32 %v969_v18, 16  ;;  %v1311_v25 = vunpack.c.l.b16 %v1091_v15  ;;  %v1331_v16 = vunpack.c.l.b16 %v1147_v14  ;;  %v1053_v32 = vrot.slane %v1051_v21, 4 }
  0xa1   : > { %1180 = vrot.lane.b32.xlu0 %v1176_v9, %s2254_s17  ;;  %v1060_v35 = vshll.u32 %v977_v10, 16  ;;  %v1043_v30 = vor.u32 %v1042_v27, %v1039_v4  ;;  %v1048_v33 = vrot.slane %v1046_v20, 5  ;;  %v2010_v56 = vrot.slane %v1096_v22, 9  ;;  %v910_v20 = vld [vmem:[#allocation2 + $0x20] sm:$0xe]  ;;  %s2258_s17 = smov 120  }
  0xa2   : > { %v1056_v37 = vrot.slane %v1054_v36, 5  ;;  %v1315_v43 = vpack.c.b16 %v1311_v25, %v1310_v19  ;;  %v1134_v44 = vrot.slane %v976_v2, 5  ;;  %v2011_v45 = vrot.slane %v1097_v24, 9  ;;  %v2622_v19 = vld [vmem:[#allocation2 + $0x1c] sm:$0x1] }
  0xa3   : > { %v1062_v5 = vrot.slane %v1060_v35, 5  ;;  %v1044_v46 = vrot.slane %v1043_v30, 4  ;;  %v1138_v48 = vrot.slane %v977_v10, 5  ;;  %v796_v38 = vshrl.u32 %v779_v41, 16  ;;  %v907_v25 = vld [vmem:[#allocation2 + $0x8] sm:$0xe] }
  0xa4   : > { %v1057_v47 = vor.u32 %v1056_v37, %v1053_v32  ;;  %v1135_v49 = vsel %vm2464_vm14, %v2010_v56, %v1134_v44  ;;  %v799_v50 = vshll.u32 %v779_v41, 16  ;;  %v805_v51 = vshll.u32 %v2605_v42, 16  ;;  %v908_v41 = vld [vmem:[#allocation2 + $0x10] sm:$0xe]  ;;  %v2036_v30 = vld [vmem:[#allocation2 + $0x18] sm:$0xf] }
  0xa5   : > { %1200 = vrot.lane.b32.xlu1 %v1196_v6, %s2253_s16  ;;  %v810_v52 = vshrl.u32 %v780_v29, 16  ;;  %v1049_v53 = vsel %vm2496_vm15, %v1044_v46, %v1048_v33  ;;  %v1139_v40 = vsel %vm2464_vm14, %v2011_v45, %v1138_v48  ;;  %v1328_v39 = vunpack.c.l.b16 %v1135_v49  ;;  %v964_v37 = vld [vmem:[#allocation2 + $0x10] sm:$0xf]  ;;  %v2643_v46 = vld [vmem:[#allocation2 + $0x14] sm:$0x1] }
  0xa6   : > { %v1058_v54 = vrot.slane %v1057_v47, 4  ;;  %v1308_v57 = vunpack.c.l.b16 %v1049_v53  ;;  %v1329_v58 = vunpack.c.l.b16 %v1139_v40  ;;  %v798_v17 = vrot.slane %v796_v38, 4 }
  0xa7   : > { %v801_v59 = vrot.slane %v799_v50, 5  ;;  %v1335_v62 = vpack.c.b16 %v1331_v16, %v1330_v23  ;;  %v812_v63 = vrot.slane %v810_v52, 4  ;;  %v813_v0 = vshll.u32 %v780_v29, 16  ;;  %v2627_v23 = vld [vmem:[#allocation2 + $0x24] sm:$0x1] }
  0xa8   : > { %v1063_v28 = vsel %vm2496_vm15, %v1058_v54, %v1062_v5  ;;  %v807_v2 = vrot.slane %v805_v51, 5  ;;  %v819_v6 = vshll.u32 %v2615_v55, 16  ;;  %v1992_v8 = vrot.slane %v722_v60, 9  ;;  %v965_v51 = vld [vmem:[#allocation2 + $0x18] sm:$0xf] }
  0xa9   : > { %1322 = vrot.lane.b32.xlu0 %v1315_v43, %s2256_s19  ;;  %v1309_v3 = vunpack.c.l.b16 %v1063_v28  ;;  %v802_v18 = vor.u32 %v801_v59, %v798_v17  ;;  %v815_v31 = vrot.slane %v813_v0, 5  ;;  %v757_v9 = vrot.slane %v2568_v34, 5  ;;  %v2110_v43 = vld [vmem:[#allocation2 + $0x1c] sm:$0xf0]  ;;  %v2648_v52 = vld [vmem:[#allocation2 + $0x1c] sm:$0x1] }
  0xaa   : > { %v1993_v12 = vrot.slane %v723_v61, 9  ;;  %v1334_v11 = vpack.c.b16 %v1329_v58, %v1328_v39  ;;  %v761_v4 = vrot.slane %v2579_v1, 5  ;;  %v821_v22 = vrot.slane %v819_v6, 5  ;;  %v2655_v60 = vld [vmem:[#allocation2 + $0x24] sm:$0x1] }
  0xab   : > { %v1314_v10 = vpack.c.b16 %v1309_v3, %v1308_v57  ;;  %v803_v14 = vrot.slane %v802_v18, 4  ;;  %v816_v21 = vor.u32 %v815_v31, %v812_v63  ;;  %v758_v15 = vsel %vm2464_vm14, %v1992_v8, %v757_v9  ;;  %v1094_v0 = vld [vmem:[#allocation2 + $0x20] sm:$0xe]  ;;  %v2032_v3 = vld [vmem:[#allocation2 + $0x8] sm:$0xf] }
  0xac   : > { %v2000_v27 = vrot.slane %v909_v7, 9  ;;  %v762_v1 = vsel %vm2464_vm14, %v1993_v12, %v761_v4  ;;  %v1190_v36 = vunpack.c.l.b16 %v758_v15  ;;  %v941_v24 = vrot.slane %v2622_v19, 5  ;;  %v2109_v18 = vld [vmem:[#allocation2 + $0xc] sm:$0xf0]  ;;  %v2660_v12 = vld [vmem:[#allocation2 + $0x2c] sm:$0x1] }
  0xad   : > { %1342 = vrot.lane.b32.xlu1 %v1335_v62, %s2257_s20  ;;  %1320 = vrot.lane.b32.xlu2 %v1314_v10, %s2256_s19  ;;  %v808_v34 = vsel %vm2496_vm15, %v803_v14, %v807_v2  ;;  %v817_v16 = vrot.slane %v816_v21, 4  ;;  %v1191_v32 = vunpack.c.l.b16 %v762_v1  ;;  %v2001_v35 = vrot.slane %v910_v20, 9 }
  0xae   : > { %v1236_v29 = vunpack.c.l.b16 %v808_v34  ;;  %v945_v33 = vrot.slane %v2627_v23, 5  ;;  %v942_v5 = vsel %vm2464_vm14, %v2000_v27, %v941_v24  ;;  %v1998_v44 = vrot.slane %v907_v25, 9  ;;  %v1092_v27 = vld [vmem:[#allocation2 + $0x10] sm:$0xe]  ;;  %v781_v34 = vld [vmem:[#allocation2 + $0x18] sm:$0xf] }
  0xaf   : > { %v822_v56 = vsel %vm2496_vm15, %v817_v16, %v821_v22  ;;  %v933_v45 = vrot.slane %v2605_v42, 5  ;;  %v1197_v48 = vpack.c.b16 %v1191_v32, %v1190_v36  ;;  %v1999_v38 = vrot.slane %v908_v41, 9  ;;  %v782_v32 = vld [vmem:[#allocation2 + $0x20] sm:$0xf]  ;;  %v1093_v41 = vld [vmem:[#allocation2 + $0x18] sm:$0xe] }
  0xb0   : > { %v1237_v47 = vunpack.c.l.b16 %v822_v56  ;;  %v937_v49 = vrot.slane %v2615_v55, 5  ;;  %v946_v50 = vsel %vm2464_vm14, %v2001_v35, %v945_v33  ;;  %v981_v53 = vshrl.u32 %v964_v37, 16 }
  0xb1   : > { %1340 = vrot.lane.b32.xlu0 %v1334_v11, %s2257_s20  ;;  %v984_v54 = vshll.u32 %v964_v37, 16  ;;  %v2037_v39 = vor.u32 %v2110_v43, %v2036_v30  ;;  %v1258_v57 = vunpack.c.l.b16 %v942_v5  ;;  %v990_v42 = vshll.u32 %v2643_v46, 16  ;;  %v1095_v11 = vld [vmem:[#allocation2 + $0x28] sm:$0xe]  ;;  %v2052_v43 = vld [vmem:[#allocation2 + $0x20] sm:$0xf] }
  0xb2   : > { %v1244_v40 = vpack.c.b16 %v1237_v47, %v1236_v29  ;;  %v934_v58 = vsel %vm2464_vm14, %v1998_v44, %v933_v45  ;;  %v938_v17 = vsel %vm2464_vm14, %v1999_v38, %v937_v49  ;;  %v983_v55 = vrot.slane %v981_v53, 4  ;;  %v2114_v5 = vld [vmem:[#allocation2 + $0x24] sm:$0xf0] }
  0xb3   : > { %v986_v59 = vrot.slane %v984_v54, 5  ;;  %v1259_v61 = vunpack.c.l.b16 %v946_v50  ;;  %v995_v62 = vshrl.u32 %v965_v51, 16  ;;  %v998_v28 = vshll.u32 %v965_v51, 16  ;;  %v966_v50 = vld [vmem:[#allocation2 + $0x20] sm:$0xf] }
  0xb4   : > { %v1004_v63 = vshll.u32 %v2648_v52, 16  ;;  %v992_v6 = vrot.slane %v990_v42, 5  ;;  %v1256_v7 = vunpack.c.l.b16 %v934_v58  ;;  %v1257_v31 = vunpack.c.l.b16 %v938_v17 }
  0xb5   : > { %1248 = vrot.lane.b32.xlu1 %v1244_v40, %s2255_s18  ;;  %1202 = vrot.lane.b32.xlu2 %v1197_v48, %s2253_s16  ;;  %v987_v2 = vor.u32 %v986_v59, %v983_v55  ;;  %v997_v8 = vrot.slane %v995_v62, 4  ;;  %v1000_v9 = vrot.slane %v998_v28, 5  ;;  %v2008_v14 = vrot.slane %v1094_v0, 9 }
  0xb6   : > { %v1126_v4 = vrot.slane %v2655_v60, 5  ;;  %v1265_v20 = vpack.c.b16 %v1259_v61, %v1258_v57  ;;  %v2033_v21 = vor.u32 %v2109_v18, %v2032_v3  ;;  %v1006_v15 = vrot.slane %v1004_v63, 5 }
  0xb7   : > { %v988_v10 = vrot.slane %v987_v2, 4  ;;  %v1001_v22 = vor.u32 %v1000_v9, %v997_v8  ;;  %v1264_v36 = vpack.c.b16 %v1257_v31, %v1256_v7  ;;  %v2009_v25 = vrot.slane %v1095_v11, 9 }
  0xb8   : > { %v1130_v16 = vrot.slane %v2660_v12, 5  ;;  %v1127_v35 = vsel %vm2464_vm14, %v2008_v14, %v1126_v4  ;;  %v2006_v29 = vrot.slane %v1092_v27, 9  ;;  %v824_v30 = vshrl.u32 %v781_v34, 16 }
  0xb9   : > { %1230 = vrot.lane.b32.xlu0 %v2037_v39, %s2252_s13  ;;  %v993_v1 = vsel %vm2496_vm15, %v988_v10, %v992_v6  ;;  %v1002_v24 = vrot.slane %v1001_v22, 4  ;;  %v827_v33 = vshll.u32 %v781_v34, 16  ;;  %v1118_v44 = vrot.slane %v2643_v46, 5  ;;  %v967_v39 = vld [vmem:[#allocation2 + $0x28] sm:$0xf] }
  0xba   : > { %v1304_v56 = vunpack.c.l.b16 %v993_v1  ;;  %v833_v45 = vshll.u32 %v2622_v19, 16  ;;  %v826_v48 = vrot.slane %v824_v30, 4  ;;  %v838_v49 = vshrl.u32 %v782_v32, 16 }
  0xbb   : > { %v1007_v37 = vsel %vm2496_vm15, %v1002_v24, %v1006_v15  ;;  %v829_v38 = vrot.slane %v827_v33, 5  ;;  %v1131_v51 = vsel %vm2464_vm14, %v2009_v25, %v1130_v16  ;;  %v2007_v53 = vrot.slane %v1093_v41, 9  ;;  %v2048_v24 = vld [vmem:[#allocation2 + $0x10] sm:$0xf]  ;;  %v2113_v25 = vld [vmem:[#allocation2 + $0x14] sm:$0xf0] }
  0xbc   : > { %v1305_v47 = vunpack.c.l.b16 %v1007_v37  ;;  %v841_v54 = vshll.u32 %v782_v32, 16  ;;  %v847_v40 = vshll.u32 %v2627_v23, 16  ;;  %v1122_v57 = vrot.slane %v2648_v52, 5 }
  0xbd   : > { %1270 = vrot.lane.b32.xlu1 %v1265_v20, %s2251_s9  ;;  %1228 = vrot.lane.b32.xlu2 %v2033_v21, %s2252_s13  ;;  %v830_v46 = vor.u32 %v829_v38, %v826_v48  ;;  %v835_v42 = vrot.slane %v833_v45, 5  ;;  %v840_v19 = vrot.slane %v838_v49, 4  ;;  %v1009_v55 = vshrl.u32 %v966_v50, 16  ;;  %v2120_v38 = vld [vmem:[%s2954_s1 + $0x18] sm:$0xff] }
  0xbe   : > { %v1312_v58 = vpack.c.b16 %v1305_v47, %v1304_v56  ;;  %v843_v17 = vrot.slane %v841_v54, 5  ;;  %v1012_v59 = vshll.u32 %v966_v50, 16  ;;  %v2053_v61 = vor.u32 %v2114_v5, %v2052_v43  ;;  %v1428_v5 = vld [vmem:[%s2954_s1 + $0x20] sm:$0xf]  ;;  %v2119_v50 = vld [vmem:[%s2954_s1 + $0x10] sm:$0xff]  ;;  %v2118_v54 = vld [vmem:[%s2954_s1 + $0x8] sm:$0xff] }
  0xbf   : > { %v831_v62 = vrot.slane %v830_v46, 4  ;;  %v1023_v28 = vshrl.u32 %v967_v39, 16  ;;  %v1026_v63 = vshll.u32 %v967_v39, 16  ;;  %v1326_v0 = vunpack.c.l.b16 %v1127_v35  ;;  %v2117_v39 = vld [vmem:[%s2954_s1] sm:$0xff] }
  0xc0   : > { %v1327_v3 = vunpack.c.l.b16 %v1131_v51  ;;  %v844_v18 = vor.u32 %v843_v17, %v840_v19  ;;  %v849_v23 = vrot.slane %v847_v40, 5  ;;  %v1119_v2 = vsel %vm2464_vm14, %v2006_v29, %v1118_v44  ;;  %v2028_v19 = vld [vmem:[#allocation2 + $0x30] sm:$0xf] }
  0xc1   : > { %1268 = vrot.lane.b32.xlu0 %v1264_v36, %s2251_s9  ;;  %v1123_v52 = vsel %vm2464_vm14, %v2007_v53, %v1122_v57  ;;  %v836_v6 = vsel %vm2496_vm15, %v831_v62, %v835_v42  ;;  %v1011_v7 = vrot.slane %v1009_v55, 4  ;;  %v1014_v8 = vrot.slane %v1012_v59, 5  ;;  %v2024_v59 = vld [vmem:[#allocation2 + $0x20] sm:$0xf]  ;;  %s1499_s9 = ssub.s32 0, %s2230_s21 }
  0xc2   : > { %v845_v31 = vrot.slane %v844_v18, 4  ;;  %v1025_v9 = vrot.slane %v1023_v28, 4  ;;  %v1028_v10 = vrot.slane %v1026_v63, 5  ;;  %v1238_v11 = vunpack.c.l.b16 %v836_v6  ;;  %s2082_s13 = smin.u32 %s2230_s21, %s1499_s9 }
  0xc3   : > { %v1333_v4 = vpack.c.b16 %v1327_v3, %v1326_v0  ;;  %v1324_v20 = vunpack.c.l.b16 %v1119_v2  ;;  %v1325_v26 = vunpack.c.l.b16 %v1123_v52  ;;  %v1015_v22 = vor.u32 %v1014_v8, %v1011_v7  ;;  %2195 = sdivrem.u32 %s2082_s13, 3 }
  0xc4   : > { %v850_v14 = vsel %vm2496_vm15, %v845_v31, %v849_v23  ;;  %v1018_v15 = vshll.u32 %v2655_v60, 16  ;;  %v1029_v27 = vor.u32 %v1028_v10, %v1025_v9  ;;  %v1032_v34 = vshll.u32 %v2660_v12, 16  ;;  %2198 = sdivrem.u32 (!%p2086_p13), %s2087_s12, 3 }
  0xc5   : > { %1316 = vrot.lane.b32.xlu1 %v1312_v58, %s2256_s19  ;;  %v1239_v21 = vunpack.c.l.b16 %v850_v14  ;;  %v1332_v36 = vpack.c.b16 %v1325_v26, %v1324_v20  ;;  %v1016_v16 = vrot.slane %v1015_v22, 4  ;;  %v2049_v29 = vor.u32 %v2113_v25, %v2048_v24  ;;  %v2108_v58 = vld [vmem:[#allocation2 + $0x34] sm:$0xf0]  ;;  %v2020_v25 = vld [vmem:[#allocation2 + $0x10] sm:$0xf] }
  0xc6   : > { %v1020_v32 = vrot.slane %v1018_v15, 5  ;;  %v1030_v35 = vrot.slane %v1029_v27, 4  ;;  %v1034_v41 = vrot.slane %v1032_v34, 5  ;;  %v1446_v44 = vunpack.c.l.b16 %v1428_v5 }
  0xc7   : > { %v1245_v1 = vpack.c.b16 %v1239_v21, %v1238_v11  ;;  %v2029_v62 = vor.u32 %v2108_v58, %v2028_v19  ;;  %vm1402_vm8 = vcmask 457728   ;;  %vm1456_vm9 = vcmask 588800  }
  0xc8   : > { %v1021_v60 = vsel %vm2496_vm15, %v1016_v16, %v1020_v32  ;;  %v1035_v12 = vsel %vm2496_vm15, %v1030_v35, %v1034_v41  ;;  %v1451_v13 = vpack.c.b16 %v1446_v44, %v1446_v44  ;;  %v2106_v16 = vld [vmem:[#allocation2 + $0x14] sm:$0xf0]  ;;  %v2016_v41 = vld [vmem:[#allocation2] sm:$0xf] }
  0xc9   : > { %1298 = vrot.lane.b32.xlu0 %v2053_v61, %s2250_s22  ;;  %1250 = vrot.lane.b32.xlu2 %v1245_v1, %s2255_s18  ;;  %v1306_v30 = vunpack.c.l.b16 %v1021_v60  ;;  %v1307_v33 = vunpack.c.l.b16 %v1035_v12  ;;  %v2107_v61 = vld [vmem:[#allocation2 + $0x24] sm:$0xf0]  ;;  %v2021_v35 = vor.u32 %v2106_v16, %v2020_v25 }
  0xca   : > { %v1467_v48 = vsel %vm1465_vm0, %v1451_v13, 0  ;;  %v2025_v28 = vor.u32 %v2107_v61, %v2024_v59 }
  0xcb   : > { %v1313_v37 = vpack.c.b16 %v1307_v33, %v1306_v30  ;;  %2123 = vmatpush.bf16.msra.mxu3 %v1467_v48  ;;  %2122 = vmatpush.bf16.msra.mxu2 %v1467_v48 }
  0xcc   : > { %v2701_v56 = vpop.permute.xlu2 %1232  ;;  %2121 = vmatpush.bf16.msra.mxu1 %v1467_v48  ;;  %1472 = vmatpush.bf16.msra.mxu0 %v1467_v48  ;;  %s2196_s16 = spop.drf %2195 }
  0xcd   : > { %1338 = vrot.lane.b32.xlu1 %v1333_v4, %s2257_s20  ;;  %s2197_s18 = spop.drf %2195 }
  0xce   : > { %s2199_s27 = spop.drf (!%p2086_p13), %2198 }
  0xcf   : > { %2126 = vmatpush.bf16.msra.mxu3 %v2120_v38  ;;  %2125 = vmatpush.bf16.msra.mxu2 %v2120_v38  ;;  %s2200_s28 = spop.drf (!%p2086_p13), %2198 }
  0xd0   : > { %2124 = vmatpush.bf16.msra.mxu1 %v2120_v38  ;;  %1473 = vmatpush.bf16.msra.mxu0 %v2120_v38  ;;  %s1579_s30 = ssub.s32 (!%p2086_p13), 0, %s2200_s28 }
  0xd1   : > { %1336 = vrot.lane.b32.xlu0 %v1332_v36, %s2257_s20  ;;  %1296 = vrot.lane.b32.xlu2 %v2049_v29, %s2250_s22  ;;  %v2105_v29 = vld [vmem:[#allocation2 + $0x4] sm:$0xf0] }
  0xd2   : > { %v2017_v33 = vor.u32 %v2105_v29, %v2016_v41 }
  0xd3   : > { %2129 = vmatpush.bf16.msra.mxu3 %v2119_v50  ;;  %2128 = vmatpush.bf16.msra.mxu2 %v2119_v50 }
  0xd4   : > { %2127 = vmatpush.bf16.msra.mxu1 %v2119_v50  ;;  %1474 = vmatpush.bf16.msra.mxu0 %v2119_v50 }
  0xd7   : > { %v1235_v47 = vpop.permute.xlu2 %1234  ;;  %2132 = vmatpush.bf16.msra.mxu3 %v2118_v54  ;;  %2131 = vmatpush.bf16.msra.mxu2 %v2118_v54 }
  0xd8   : > { %2130 = vmatpush.bf16.msra.mxu1 %v2118_v54  ;;  %1475 = vmatpush.bf16.msra.mxu0 %v2118_v54 }
  0xd9   : > { %1318 = vrot.lane.b32.xlu2 %v1313_v37, %s2256_s19  ;;  %s1503_s19 = ssub.s32 0, %s2197_s18 }
  0xda   : > { %v2703_v43 = vpop.permute.xlu1 %1300  ;;  %s2989_s19 = smov (!%p1498_p11, %s1503_s19), %s2197_s18 }
  0xdb   : > { %2135 = vmatpush.bf16.msra.mxu3 %v2117_v39  ;;  %2134 = vmatpush.bf16.msra.mxu2 %v2117_v39  ;;  %p2084_p12 = scmp.lt.s32.totalorder %s2989_s19, 0  ;;  %s1509_s20 = sadd.s32 3, %s2989_s19 }
  0xdc   : > { %2133 = vmatpush.bf16.msra.mxu1 %v2117_v39  ;;  %1476 = vmatpush.bf16.msra.mxu0 %v2117_v39 }
  0xdd   : > { %s2991_s20 = smov (!%p2084_p12, %s1509_s20), %s2989_s19 }
  0xde   : > { %s2085_s29 = sshll.u32 %s2991_s20, 6 }
  0xdf   : > { %v1303_v53 = vpop.permute.xlu2 %1302  ;;  %s2785_s8 = scalar_lea.vmem [#allocation3], %s2085_s29 }
  0xe2   : > { %v1275_v45 = vpop.permute.xlu0 %1274 }
  0xe6   : > { %v1205_v49 = vpop.permute.xlu1 %1204 }
  0xec   : > { %v1273_v46 = vpop.permute.xlu2 %1272 }
  0xee   : > { %v1185_v51 = vpop.permute.xlu0 %1184  ;;  %v1207_v40 = vpop.permute.xlu1 %1206 }
  0xef   : > { %v1353_v3 = vsel %vm1344_vm1, %v2025_v28, %v1185_v51 }
  0xf0   : > { %v1363_v52 = vsel %vm1357_vm2, %v1353_v3, %v1205_v49 }
  0xf1   : > { %v1372_v8 = vsel %vm1366_vm3, %v1363_v52, %v2701_v56 }
  0xf6   : > { %v1187_v57 = vpop.permute.xlu0 %1186 }
  0xf7   : > { %v1356_v63 = vsel %vm1344_vm1, %v2029_v62, %v1187_v57 }
  0xf8   : > { %v1255_v42 = vpop.permute.xlu1 %1254  ;;  %v1365_v18 = vsel %vm1357_vm2, %v1356_v63, %v1207_v40 }
  0xf9   : > { %v1374_v6 = vsel %vm1366_vm3, %v1365_v18, %v1235_v47  ;;  %v1513_v18 = vld [vmem:[%s2785_s8] sm:$0xff] }
  0xfa   : > { %v1383_v31 = vsel %vm1375_vm4, %v1374_v6, %v1255_v42  ;;  %v1516_v6 = vld [vmem:[%s2785_s8 + $0x18] sm:$0xff] }
  0xfb   : > { %v1392_v11 = vsel %vm1384_vm5, %v1383_v31, %v1275_v45 }
  0xfc   : > { %v1401_v20 = vsel %vm1393_vm6, %v1392_v11, %v1303_v53  ;;  %v1515_v11 = vld [vmem:[%s2785_s8 + $0x10] sm:$0xff] }
  0xfe   : > { %v1253_v17 = vpop.permute.xlu0 %1252 }
  0xff   : > { %v1381_v9 = vsel %vm1375_vm4, %v1372_v8, %v1253_v17  ;;  %v1519_v8 = vld [vmem:[%s2785_s8 + $0x30] sm:$0xff] }
 0x100   : > { %v1390_v14 = vsel %vm1384_vm5, %v1381_v9, %v1273_v46 }
 0x101   : > { %v1399_v22 = vsel %vm1393_vm6, %v1390_v14, %v2703_v43 }
 0x107   : > { %v1321_v55 = vpop.permute.xlu2 %1320 }
 0x108   : > { %v1408_v34 = vsel %vm1402_vm8, %v1399_v22, %v1321_v55  ;;  %v1514_v22 = vld [vmem:[%s2785_s8 + $0x8] sm:$0xff] }
 0x10f   : > { %v1183_v0 = vpop.permute.xlu1 %1182  ;;  %v1203_v2 = vpop.permute.xlu2 %1202 }
 0x110   : > { %v1350_v12 = vsel %vm1344_vm1, %v2021_v35, %v1183_v0  ;;  %v1517_v0 = vld [vmem:[%s2785_s8 + $0x20] sm:$0xff] }
 0x111   : > { %v1361_v56 = vsel %vm1357_vm2, %v1350_v12, %v1203_v2 }
 0x113   : > { %v1181_v23 = vpop.permute.xlu0 %1180 }
 0x114   : > { %v1347_v5 = vsel %vm1344_vm1, %v2017_v33, %v1181_v23 }
 0x117   : > { %v1201_v7 = vpop.permute.xlu1 %1200  ;;  %v1229_v4 = vpop.permute.xlu2 %1228 }
 0x118   : > { %v1359_v44 = vsel %vm1357_vm2, %v1347_v5, %v1201_v7 }
 0x119   : > { %v1368_v47 = vsel %vm1366_vm3, %v1359_v44, %v1229_v4 }
 0x11b   : > { %v1323_v10 = vpop.permute.xlu0 %1322 }
 0x11c   : > { %v1410_v26 = vsel %vm1402_vm8, %v1401_v20, %v1323_v10  ;;  %v1518_v20 = vld [vmem:[%s2785_s8 + $0x28] sm:$0xff] }
 0x11f   : > { %v1343_v21 = vpop.permute.xlu1 %1342 }
 0x120   : > { %v1419_v15 = vsel %vm1411_vm7, %v1410_v26, %v1343_v21 }
 0x121   : > { %2081 = vmatmul.msk.bf16.vlgmr.msra.gmra.mxu3 %vm1456_vm9, %v1419_v15 }
 0x123   : > { %v1341_v27 = vpop.permute.xlu0 %1340  ;;  %v1251_v36 = vpop.permute.xlu2 %1250 }
 0x124   : > { %v1417_v1 = vsel %vm1411_vm7, %v1408_v34, %v1341_v27  ;;  %v1520_v34 = vld [vmem:[%s2785_s8 + $0x38] sm:$0xff] }
 0x125   : > { %2080 = vmatmul.msk.bf16.vlgmr.msra.gmra.mxu2 %vm1456_vm9, %v1417_v1 }
 0x127   : > { %v1249_v24 = vpop.permute.xlu1 %1248 }
 0x128   : > { %v1377_v50 = vsel %vm1375_vm4, %v1368_v47, %v1249_v24 }
 0x12b   : > { %v1231_v32 = vpop.permute.xlu0 %1230  ;;  %v1297_v30 = vpop.permute.xlu2 %1296 }
 0x12c   : > { %v1370_v43 = vsel %vm1366_vm3, %v1361_v56, %v1231_v32 }
 0x12d   : > { %v1379_v45 = vsel %vm1375_vm4, %v1370_v43, %v1251_v36 }
 0x12f   : > { %v1271_v60 = vpop.permute.xlu1 %1270 }
 0x130   : > { %v1388_v48 = vsel %vm1384_vm5, %v1379_v45, %v1271_v60 }
 0x133   : > { %v1269_v37 = vpop.permute.xlu0 %1268  ;;  %v1319_v49 = vpop.permute.xlu2 %1318 }
 0x134   : > { %v1386_v53 = vsel %vm1384_vm5, %v1377_v50, %v1269_v37 }
 0x135   : > { %v1395_v40 = vsel %vm1393_vm6, %v1386_v53, %v1297_v30 }
 0x137   : > { %v1317_v13 = vpop.permute.xlu1 %1316 }
 0x138   : > { %v1404_v46 = vsel %vm1402_vm8, %v1395_v40, %v1317_v13 }
 0x13b   : > { %v1299_v38 = vpop.permute.xlu0 %1298 }
 0x13c   : > { %v1397_v51 = vsel %vm1393_vm6, %v1388_v48, %v1299_v38 }
 0x13d   : > { %v1406_v54 = vsel %vm1402_vm8, %v1397_v51, %v1319_v49 }
 0x13f   : > { %v1339_v39 = vpop.permute.xlu1 %1338 }
 0x140   : > { %v1415_v57 = vsel %vm1411_vm7, %v1406_v54, %v1339_v39 }
 0x141   : > { %2079 = vmatmul.msk.bf16.vlgmr.msra.gmra.mxu1 %vm1456_vm9, %v1415_v57 }
 0x143   : > { %v1337_v42 = vpop.permute.xlu0 %1336 }
 0x144   : > { %v1413_v19 = vsel %vm1411_vm7, %v1404_v46, %v1337_v42 }
 0x145   : > { %2078 = vmatmul.msk.bf16.vlgmr.msra.gmra.mxu0 %vm1456_vm9, %v1413_v19 }
 0x1a4   : > { %v2771_v61 = vpop.f32.mrf.mxu3 }
 0x1a8   : > { %v2760_v58 = vpop.f32.mrf.mxu2 }
 0x1a9   : > { %1537 = vrot.lane.b32.xlu0 %v2760_v58, %s2258_s17 }
 0x1ac   : > { %v2780_v63 = vpop.f32.mrf.mxu3 }
 0x1b0   : > { %v2769_v59 = vpop.f32.mrf.mxu2 }
 0x1be   : > { %v2763_v17 = vpop.f32.mrf.mxu1 }
 0x1bf   : > { %1533 = vrot.lane.b32.xlu1 %v2763_v17, %s2258_s17 }
 0x1c2   : > { %v2766_v55 = vpop.f32.mrf.mxu0 }
 0x1c3   : > { %1529 = vrot.lane.b32.xlu2 %v2766_v55, %s2258_s17 }
 0x1c6   : > { %v2774_v62 = vpop.f32.mrf.mxu1 }
 0x1c7   : > { %1539 = vrot.lane.b32.xlu1 %v2769_v59, %s2258_s17 }
 0x1ca   : > { %v2776_v28 = vpop.f32.mrf.mxu0 }
 0x1cb   : > { %1535 = vrot.lane.b32.xlu2 %v2774_v62, %s2258_s17  ;;  %1531 = vrot.lane.b32.xlu0 %v2776_v28, %s2258_s17 }
 0x1d3   : > { %1541 = vrot.lane.b32.xlu2 %v2771_v61, %s2258_s17  ;;  %1543 = vrot.lane.b32.xlu0 %v2780_v63, %s2258_s17 }
 0x21b   : > { %v1538_v3 = vpop.permute.xlu0 %1537 }
 0x21c   : > { %v1557_v23 = vadd.f32 %v1538_v3, %v1517_v0 }
 0x21d   : > { %v1530_v2 = vpop.permute.xlu2 %1529 }
 0x21e   : > { %1565 = vst.msk [vmem:[%s2785_s8 + $0x20] sm:$0xff] %vm1344_vm1, %v1557_v23  ;;  %v1553_v52 = vadd.f32 %v1530_v2, %v1513_v18 }
 0x220   : > { %1561 = vst.msk [vmem:[%s2785_s8] sm:$0xff] %vm1344_vm1, %v1553_v52 }
 0x225   : > { %v1536_v7 = vpop.permute.xlu2 %1535 }
 0x226   : > { %v1556_v31 = vadd.f32 %v1536_v7, %v1516_v6 }
 0x228   : > { %1564 = vst.msk [vmem:[%s2785_s8 + $0x18] sm:$0xff] %vm1344_vm1, %v1556_v31 }
 0x22d   : > { %v1542_v9 = vpop.permute.xlu2 %1541 }
 0x22e   : > { %v1559_v10 = vadd.f32 %v1542_v9, %v1519_v8 }
 0x230   : > { %1567 = vst.msk [vmem:[%s2785_s8 + $0x30] sm:$0xff] %vm1344_vm1, %v1559_v10 }
 0x231   : > { %v1534_v14 = vpop.permute.xlu1 %1533 }
 0x232   : > { %v1555_v4 = vadd.f32 %v1534_v14, %v1515_v11 }
 0x234   : > { %1563 = vst.msk [vmem:[%s2785_s8 + $0x10] sm:$0xff] %vm1344_vm1, %v1555_v4 }
 0x239   : > { %v1540_v26 = vpop.permute.xlu1 %1539 }
 0x23a   : > { %v1558_v21 = vadd.f32 %v1540_v26, %v1518_v20 }
 0x23c   : > { %1566 = vst.msk [vmem:[%s2785_s8 + $0x28] sm:$0xff] %vm1344_vm1, %v1558_v21 }
 0x23d   : > { %v1532_v15 = vpop.permute.xlu0 %1531 }
 0x23e   : > { %v1554_v27 = vadd.f32 %v1532_v15, %v1514_v22 }
 0x240   : > { %1562 = vst.msk [vmem:[%s2785_s8 + $0x8] sm:$0xff] %vm1344_vm1, %v1554_v27 }
 0x244   : > { %1572 = sbr.rel (%p2086_p13) target bundleno = 602 (0x25a), region = 52 }
 0x245   : > { %v1544_v1 = vpop.permute.xlu0 %1543 }
 0x246   : > { %v1560_v36 = vadd.f32 %v1544_v1, %v1520_v34 }
 0x248   : > { %1568 = vst.msk [vmem:[%s2785_s8 + $0x38] sm:$0xff] %vm1344_vm1, %v1560_v36 }
 0x249   : > { %s2993_s30 = smov (!%p1574_p0, %s1579_s30), %s2200_s28 }
 0x24a   : > { %p2089_p1 = scmp.lt.s32.totalorder %s2993_s30, 0  ;;  %s1585_s15 = sadd.s32 3, %s2993_s30 }
 0x24c   : > { %s2995_s15 = smov (!%p2089_p1, %s1585_s15), %s2993_s30 }
 0x24d   : > { %s2090_s22 = sshll.u32 %s2995_s15, 6 }
 0x24e   : > { %s1588_s9 = scalar_lea.vmem [#allocation3], %s2090_s22 }
 0x24f   : > { %v1589_v24 = vld [vmem:[%s1588_s9] sm:$0xff]  ;;  %v1590_v25 = vld [vmem:[%s1588_s9 + $0x8] sm:$0xff]  ;;  %v1591_v16 = vld [vmem:[%s1588_s9 + $0x10] sm:$0xff] }
 0x250   : > { %v1597_v32 = vadd.f32 %v1589_v24, %v2766_v55  ;;  %v1598_v35 = vadd.f32 %v1590_v25, %v2776_v28  ;;  %v1599_v41 = vadd.f32 %v1591_v16, %v2763_v17  ;;  %v1592_v29 = vld [vmem:[%s1588_s9 + $0x18] sm:$0xff]  ;;  %v1593_v60 = vld [vmem:[%s1588_s9 + $0x20] sm:$0xff]  ;;  %v1594_v12 = vld [vmem:[%s1588_s9 + $0x28] sm:$0xff] }
 0x251   : > { %v1600_v30 = vadd.f32 %v1592_v29, %v2774_v62  ;;  %v1595_v33 = vld [vmem:[%s1588_s9 + $0x30] sm:$0xff]  ;;  %v1601_v37 = vadd.f32 %v1593_v60, %v2760_v58  ;;  %v1596_v56 = vld [vmem:[%s1588_s9 + $0x38] sm:$0xff]  ;;  %v1602_v43 = vadd.f32 %v1594_v12, %v2769_v59 }
 0x252   : > { %1605 = vst.msk [vmem:[%s1588_s9] sm:$0xff] %vm1344_vm1, %v1597_v32  ;;  %v1603_v5 = vadd.f32 %v1595_v33, %v2771_v61  ;;  %v1604_v44 = vadd.f32 %v1596_v56, %v2780_v63 }
 0x253   : > { %1606 = vst.msk [vmem:[%s1588_s9 + $0x8] sm:$0xff] %vm1344_vm1, %v1598_v35 }
 0x254   : > { %1607 = vst.msk [vmem:[%s1588_s9 + $0x10] sm:$0xff] %vm1344_vm1, %v1599_v41 }
 0x255   : > { %1608 = vst.msk [vmem:[%s1588_s9 + $0x18] sm:$0xff] %vm1344_vm1, %v1600_v30 }
 0x256   : > { %1609 = vst.msk [vmem:[%s1588_s9 + $0x20] sm:$0xff] %vm1344_vm1, %v1601_v37 }
 0x257   : > { %1610 = vst.msk [vmem:[%s1588_s9 + $0x28] sm:$0xff] %vm1344_vm1, %v1602_v43 }
 0x258   : > { %1611 = vst.msk [vmem:[%s1588_s9 + $0x30] sm:$0xff] %vm1344_vm1, %v1603_v5 }
 0x259   : > { %1612 = vst.msk [vmem:[%s1588_s9 + $0x38] sm:$0xff] %vm1344_vm1, %v1604_v44 }
 0x25a PF: > { %p2091_p2 = scmp.le.s32.totalorder %s2230_s21, 0 }
 0x25b   : > { %s1617_s13 = sadd.s32 (!%p2091_p2), 2, %s2230_s21  ;;  %s2259_s16 = smov (!%p2091_p2), 112  }
 0x25c   : > { %1616 = sbr.rel (%p2091_p2) target bundleno = 744 (0x2e8), region = 56  ;;  %s1619_s17 = ssub.s32 (!%p2091_p2), 0, %s1617_s13 }
 0x25d   : > { %s2092_s18 = smin.u32 (!%p2091_p2), %s1619_s17, %s1617_s13  ;;  %p1618_p3 = scmp.lt.s32.totalorder (!%p2091_p2), %s1617_s13, 0 }
 0x25e   : > { %2201 = sdivrem.u32 (!%p2091_p2), %s2092_s18, 3 }
 0x261   : > { %1645 = vrot.lane.b32.xlu1 %v2763_v17, %s2259_s16  ;;  %1641 = vrot.lane.b32.xlu0 %v2766_v55, %s2259_s16 }
 0x262   : > { %1649 = vrot.lane.b32.xlu2 %v2760_v58, %s2259_s16 }
 0x267   : > { %s2202_s19 = spop.drf %2201 }
 0x268   : > { %s2203_s20 = spop.drf %2201 }
 0x269   : > { %1647 = vrot.lane.b32.xlu1 %v2774_v62, %s2259_s16  ;;  %1643 = vrot.lane.b32.xlu0 %v2776_v28, %s2259_s16  ;;  %s1623_s29 = ssub.s32 0, %s2203_s20 }
 0x26a   : > { %1651 = vrot.lane.b32.xlu2 %v2769_v59, %s2259_s16  ;;  %s2997_s29 = smov (!%p1618_p3, %s1623_s29), %s2203_s20 }
 0x26b   : > { %p2094_p4 = scmp.lt.s32.totalorder %s2997_s29, 0  ;;  %s1629_s8 = sadd.s32 3, %s2997_s29 }
 0x26d   : > { %s2999_s8 = smov (!%p2094_p4, %s1629_s8), %s2997_s29 }
 0x26e   : > { %s2095_s11 = sshll.u32 %s2999_s8, 6 }
 0x26f   : > { %s2839_s10 = scalar_lea.vmem [#allocation3], %s2095_s11 }
 0x270   : > { %v1637_v45 = vld [vmem:[%s2839_s10 + $0x20] sm:$0xff]  ;;  %v1638_v48 = vld [vmem:[%s2839_s10 + $0x28] sm:$0xff]  ;;  %v1635_v50 = vld [vmem:[%s2839_s10 + $0x10] sm:$0xff] }
 0x271   : > { %1655 = vrot.lane.b32.xlu1 %v2780_v63, %s2259_s16  ;;  %1653 = vrot.lane.b32.xlu0 %v2771_v61, %s2259_s16  ;;  %v1633_v51 = vld [vmem:[%s2839_s10] sm:$0xff]  ;;  %v1636_v57 = vld [vmem:[%s2839_s10 + $0x18] sm:$0xff] }
 0x272   : > { %v1634_v46 = vld [vmem:[%s2839_s10 + $0x8] sm:$0xff]  ;;  %v1640_v59 = vld [vmem:[%s2839_s10 + $0x38] sm:$0xff]  ;;  %v1639_v62 = vld [vmem:[%s2839_s10 + $0x30] sm:$0xff] }
 0x2bc   : > { %v1650_v13 = vpop.permute.xlu2 %1649 }
 0x2bd   : > { %v1669_v47 = vadd.f32 %v1650_v13, %v1637_v45 }
 0x2bf   : > { %1677 = vst.msk [vmem:[%s2839_s10 + $0x20] sm:$0xff] %vm1344_vm1, %v1669_v47 }
 0x2c4   : > { %v1652_v38 = vpop.permute.xlu2 %1651 }
 0x2c5   : > { %v1670_v49 = vadd.f32 %v1652_v38, %v1638_v48 }
 0x2c7   : > { %1678 = vst.msk [vmem:[%s2839_s10 + $0x28] sm:$0xff] %vm1344_vm1, %v1670_v49 }
 0x2d3   : > { %v1646_v53 = vpop.permute.xlu1 %1645  ;;  %v1642_v54 = vpop.permute.xlu0 %1641 }
 0x2d4   : > { %v1667_v40 = vadd.f32 %v1646_v53, %v1635_v50  ;;  %v1665_v39 = vadd.f32 %v1642_v54, %v1633_v51 }
 0x2d6   : > { %1675 = vst.msk [vmem:[%s2839_s10 + $0x10] sm:$0xff] %vm1344_vm1, %v1667_v40 }
 0x2d7   : > { %1673 = vst.msk [vmem:[%s2839_s10] sm:$0xff] %vm1344_vm1, %v1665_v39 }
 0x2db   : > { %v1648_v42 = vpop.permute.xlu1 %1647  ;;  %v1644_v19 = vpop.permute.xlu0 %1643 }
 0x2dc   : > { %v1668_v58 = vadd.f32 %v1648_v42, %v1636_v57  ;;  %v1666_v17 = vadd.f32 %v1644_v19, %v1634_v46 }
 0x2de   : > { %1676 = vst.msk [vmem:[%s2839_s10 + $0x18] sm:$0xff] %vm1344_vm1, %v1668_v58 }
 0x2df   : > { %1674 = vst.msk [vmem:[%s2839_s10 + $0x8] sm:$0xff] %vm1344_vm1, %v1666_v17 }
 0x2e3   : > { %v1656_v55 = vpop.permute.xlu1 %1655  ;;  %v1654_v61 = vpop.permute.xlu0 %1653 }
 0x2e4   : > { %v1672_v28 = vadd.f32 %v1656_v55, %v1640_v59  ;;  %v1671_v63 = vadd.f32 %v1654_v61, %v1639_v62 }
 0x2e6   : > { %1680 = vst.msk [vmem:[%s2839_s10 + $0x38] sm:$0xff] %vm1344_vm1, %v1672_v28 }
 0x2e7   : > { %1679 = vst.msk [vmem:[%s2839_s10 + $0x30] sm:$0xff] %vm1344_vm1, %v1671_v63 }
 0x2e8 PF: > { %p2096_p5 = scmp.le.s32.totalorder %s2230_s21, 0 }
 0x2e9   : > { %s1685_s12 = sadd.s32 (!%p2096_p5), 2, %s2230_s21 }
 0x2ea   : > { %1684 = sbr.rel (%p2096_p5) target bundleno = 803 (0x323), region = 60  ;;  %s1687_s27 = ssub.s32 (!%p2096_p5), 0, %s1685_s12 }
 0x2eb   : > { %s2097_s28 = smin.u32 (!%p2096_p5), %s1687_s27, %s1685_s12  ;;  %p1686_p6 = scmp.lt.s32.totalorder (!%p2096_p5), %s1685_s12, 0 }
 0x2ec   : > { %2205 = sdivrem.u32 (!%p2096_p5), %s2097_s28, 3 }
 0x2ef   : > { %v2204_v0 = vld [vmem:[%s2955_s2] ss:$0 sm:$0xff]  ;;  %vm1738_vm10 = vcmask 64512   ;;  %v2260_v9 = vmov 0.0   ;;  %vm1729_vm11 = vcmask 60416   ;;  %vm1789_vm12 = vcmask 1040384  }
 0x2f0   : > { %vm1793_vm13 = vcmask 58368  }
 0x2f5   : > { %s2206_s30 = spop.drf %2205 }
 0x2f6   : > { %s2207_s15 = spop.drf %2205 }
 0x2f7   : > { %s1691_s22 = ssub.s32 0, %s2207_s15 }
 0x2f8   : > { %s3001_s22 = smov (!%p1686_p6, %s1691_s22), %s2207_s15 }
 0x2f9   : > { %p2099_p7 = scmp.lt.s32.totalorder %s3001_s22, 0  ;;  %s1697_s9 = sadd.s32 3, %s3001_s22 }
 0x2fb   : > { %s3003_s9 = smov (!%p2099_p7, %s1697_s9), %s3001_s22 }
 0x2fc   : > { %s2100_s17 = sshll.u32 %s3003_s9, 6 }
 0x2fd   : > { %s2870_s18 = scalar_lea.vmem [#allocation3], %s2100_s17 }
 0x2fe   : > { %v1701_v3 = vld [vmem:[%s2870_s18] sm:$0xff]  ;;  %v1702_v18 = vld [vmem:[%s2870_s18 + $0x8] sm:$0xff]  ;;  %v1703_v23 = vld [vmem:[%s2870_s18 + $0x10] sm:$0xff] }
 0x2ff   : > { %v1713_v2 = vadd.f32 %v2204_v0, %v1701_v3  ;;  %v1714_v52 = vadd.f32 %v2204_v0, %v1702_v18  ;;  %v1715_v6 = vadd.f32 %v2204_v0, %v1703_v23  ;;  %v1704_v7 = vld [vmem:[%s2870_s18 + $0x18] sm:$0xff]  ;;  %v1705_v31 = vld [vmem:[%s2870_s18 + $0x20] sm:$0xff]  ;;  %v1706_v8 = vld [vmem:[%s2870_s18 + $0x28] sm:$0xff]  ;;  %1795 = vst.msk [vmem:[%s2870_s18] sm:$0xff] %vm1738_vm10, %v2260_v9 }
 0x300   : > { %v1716_v10 = vadd.f32 %v2204_v0, %v1704_v7  ;;  %v1717_v11 = vadd.f32 %v2204_v0, %v1705_v31  ;;  %1796 = vst.msk [vmem:[%s2870_s18 + $0x8] sm:$0xff] %vm1738_vm10, %v2260_v9  ;;  %v1718_v27 = vadd.f32 %v2204_v0, %v1706_v8  ;;  %v1707_v41 = vld [vmem:[%s2870_s18 + $0x30] sm:$0xff]  ;;  %v1708_v12 = vld [vmem:[%s2870_s18 + $0x38] sm:$0xff] }
 0x301   : > { %v1721_v14 = vpack.c.bf16 %v1713_v2, %v1713_v2  ;;  %v1739_v4 = vsel %vm1738_vm10, %v1713_v2, 0.0  ;;  %v1760_v20 = vmul.f32 %v1713_v2, %v1713_v2  ;;  %v1722_v26 = vpack.c.bf16 %v1714_v52, %v1714_v52  ;;  %1797 = vst.msk [vmem:[%s2870_s18 + $0x10] sm:$0xff] %vm1738_vm10, %v2260_v9 }
 0x302   : > { %v1740_v21 = vsel %vm1738_vm10, %v1714_v52, 0.0  ;;  %v1761_v22 = vmul.f32 %v1714_v52, %v1714_v52  ;;  %v1723_v15 = vpack.c.bf16 %v1715_v6, %v1715_v6  ;;  %1798 = vst.msk [vmem:[%s2870_s18 + $0x18] sm:$0xff] %vm1738_vm10, %v2260_v9  ;;  %v1762_v36 = vmul.f32 %v1715_v6, %v1715_v6 }
 0x303   : > { %1730 = vst.msk [vmem:[%s2356_s14] sm:$0xf] %vm1729_vm11, %v1721_v14  ;;  %v1768_v34 = vsel %vm1738_vm10, %v1760_v20, 0.0  ;;  %v1741_v1 = vadd.f32 %v1740_v21, %v1739_v4  ;;  %v1724_v24 = vpack.c.bf16 %v1716_v10, %v1716_v10  ;;  %v1742_v16 = vsel %vm1738_vm10, %v1715_v6, 0.0 }
 0x304   : > { %1731 = vst.msk [vmem:[%s2356_s14 + $0x4] sm:$0xf] %vm1729_vm11, %v1722_v26  ;;  %v1769_v25 = vsel %vm1738_vm10, %v1761_v22, 0.0  ;;  %v1763_v32 = vmul.f32 %v1716_v10, %v1716_v10  ;;  %v1725_v35 = vpack.c.bf16 %v1717_v11, %v1717_v11  ;;  %v1771_v30 = vsel %vm1738_vm10, %v1762_v36, 0.0 }
 0x305   : > { %v1770_v29 = vadd.f32 %v1769_v25, %v1768_v34  ;;  %1732 = vst.msk [vmem:[%s2356_s14 + $0x8] sm:$0xf] %vm1729_vm11, %v1723_v15  ;;  %v1743_v60 = vadd.f32 %v1742_v16, %v1741_v1  ;;  %v1744_v33 = vsel %vm1738_vm10, %v1716_v10, 0.0  ;;  %v1764_v37 = vmul.f32 %v1717_v11, %v1717_v11 }
 0x306   : > { %1733 = vst.msk [vmem:[%s2356_s14 + $0xc] sm:$0xf] %vm1729_vm11, %v1724_v24  ;;  %v1726_v56 = vpack.c.bf16 %v1718_v27, %v1718_v27  ;;  %v1719_v44 = vadd.f32 %v2204_v0, %v1707_v41  ;;  %v1773_v45 = vsel %vm1738_vm10, %v1763_v32, 0.0  ;;  %v1746_v13 = vsel %vm1738_vm10, %v1717_v11, 0.0  ;;  %v1791_v11 = vld [vmem:[%s2351_s7] sm:$0x3] }
 0x307   : > { %v1772_v43 = vadd.f32 %v1771_v30, %v1770_v29  ;;  %v1745_v5 = vadd.f32 %v1744_v33, %v1743_v60  ;;  %1734 = vst.msk [vmem:[%s2356_s14 + $0x10] sm:$0xf] %vm1729_vm11, %v1725_v35  ;;  %v1765_v47 = vmul.f32 %v1718_v27, %v1718_v27  ;;  %v1720_v48 = vadd.f32 %v2204_v0, %v1708_v12 }
 0x308   : > { %1735 = vst.msk [vmem:[%s2356_s14 + $0x14] sm:$0xf] %vm1729_vm11, %v1726_v56  ;;  %v1727_v50 = vpack.c.bf16 %v1719_v44, %v1719_v44  ;;  %v1775_v51 = vsel %vm1738_vm10, %v1764_v37, 0.0  ;;  %v1748_v53 = vsel %vm1738_vm10, %v1718_v27, 0.0  ;;  %v1766_v54 = vmul.f32 %v1719_v44, %v1719_v44 }
 0x309   : > { %v1774_v38 = vadd.f32 %v1773_v45, %v1772_v43  ;;  %v1747_v49 = vadd.f32 %v1746_v13, %v1745_v5  ;;  %1799 = vst.msk [vmem:[%s2870_s18 + $0x20] sm:$0xff] %vm1738_vm10, %v2260_v9  ;;  %v1728_v40 = vpack.c.bf16 %v1720_v48, %v1720_v48  ;;  %v1777_v46 = vsel %vm1738_vm10, %v1765_v47, 0.0 }
 0x30a   : > { %1800 = vst.msk [vmem:[%s2870_s18 + $0x28] sm:$0xff] %vm1738_vm10, %v2260_v9  ;;  %v1750_v42 = vsel %vm1738_vm10, %v1719_v44, 0.0  ;;  %v1767_v19 = vmul.f32 %v1720_v48, %v1720_v48  ;;  %v1779_v55 = vsel %vm1738_vm10, %v1766_v54, 0.0  ;;  %v1752_v59 = vsel %vm1738_vm10, %v1720_v48, 0.0 }
 0x30b   : > { %v1776_v39 = vadd.f32 %v1775_v51, %v1774_v38  ;;  %v1749_v57 = vadd.f32 %v1748_v53, %v1747_v49  ;;  %1736 = vst.msk [vmem:[%s2356_s14 + $0x18] sm:$0xf] %vm1729_vm11, %v1727_v50 }
 0x30c   : > { %1737 = vst.msk [vmem:[%s2356_s14 + $0x1c] sm:$0xf] %vm1729_vm11, %v1728_v40  ;;  %v1781_v28 = vsel %vm1738_vm10, %v1767_v19, 0.0 }
 0x30d   : > { %v1778_v58 = vadd.f32 %v1777_v46, %v1776_v39  ;;  %v1751_v17 = vadd.f32 %v1750_v42, %v1749_v57  ;;  %1801 = vst.msk [vmem:[%s2870_s18 + $0x30] sm:$0xff] %vm1738_vm10, %v2260_v9 }
 0x30e   : > { %1802 = vst.msk [vmem:[%s2870_s18 + $0x38] sm:$0xff] %vm1738_vm10, %v2260_v9 }
 0x30f   : > { %v1780_v61 = vadd.f32 %v1779_v55, %v1778_v58  ;;  %v1753_v62 = vadd.f32 %v1752_v59, %v1751_v17 }
 0x311   : > { %v1754_v63 = vrot.slane %v1753_v62, 4  ;;  %v1782_v0 = vadd.f32 %v1781_v28, %v1780_v61 }
 0x313   : > { %v1755_v3 = vadd.f32 %v1754_v63, %v1753_v62  ;;  %v1783_v18 = vrot.slane %v1782_v0, 4 }
 0x315   : > { %v1756_v23 = vrot.slane %v1755_v3, 2  ;;  %v1784_v2 = vadd.f32 %v1783_v18, %v1782_v0 }
 0x317   : > { %v1757_v52 = vadd.f32 %v1756_v23, %v1755_v3  ;;  %v1785_v6 = vrot.slane %v1784_v2, 2 }
 0x319   : > { %v1758_v7 = vrot.slane %v1757_v52, 1  ;;  %v1786_v31 = vadd.f32 %v1785_v6, %v1784_v2 }
 0x31b   : > { %v1787_v8 = vrot.slane %v1786_v31, 1  ;;  %v1759_v10 = vadd.f32 %v1758_v7, %v1757_v52 }
 0x31d   : > { %v1788_v9 = vadd.f32 %v1787_v8, %v1786_v31 }
 0x31f   : > { %v1790_v14 = vsel %vm1789_vm12, %v1759_v10, %v1788_v9 }
 0x320   : > { %v1792_v4 = vadd.f32 %v1791_v11, %v1790_v14 }
 0x322   : > { %1794 = vst.msk [vmem:[%s2351_s7] sm:$0x3] %vm1793_vm13, %v1792_v4 }
 0x323 PF: > { %s17_s25 = sadd.s32 1, %s2246_s25   ;;  %s2969_s14 = sld [smem:[#allocation4_spill]] }
 0x324   : > { %p14_p8 = scmp.ge.s32.totalorder %s17_s25, 12   ;;  %s2970_s21 = smov %s2238_s23 }
 0x325   : > { %s2971_s22 = smov %s2242_s24  ;;  %s2972_s23 = smov %s2975_s26 }
 0x326   :  { %16 = sbr.rel (!%p14_p8) target bundleno = 3 (0x3), region = 114 }
 0x329   : > { %s2973_s24 = smov %s2969_s14 }

// kernel: res_blocks_forward.7
= control target key start
LH: loop header
LB: loop body
LE: loop exit
PB: predicated region body
PF: predicated region fallthrough
CT: control target
= control target key end

     0   :  { %s2331_s21 = smov 0   ;;  %s2333_s22 = smov 0   ;;  %s2992_s0 = inlined_call_operand.vmem [shape: bf16[2,4,8,8,8], index: 0, kind: input, shape index: {}]   ;;  %s2993_s1 = inlined_call_operand.vmem [shape: bf16[72,24], index: 1, kind: input, shape index: {}]   ;;  %s2994_s2 = inlined_call_operand.vmem [shape: f32[1,8], index: 2, kind: input, shape index: {}]   ;;  %s2995_s3 = inlined_call_operand.vmem [shape: f32[2,1,8], index: 3, kind: input, shape index: {}]   ;;  %s2996_s4 = inlined_call_operand.vmem [shape: f32[2,1,8], index: 4, kind: input, shape index: {}]   ;;  %s2997_s5 = inlined_call_operand.vmem [shape: bf16[2,4,8,8,8], index: 5, kind: output, shape index: {0}]   ;;  %s2998_s6 = inlined_call_operand.vmem [shape: f32[2,2,8], index: 6, kind: output, shape index: {1}]  }
   0x1   :  { %s2335_s23 = smov 0   ;;  %s2337_s24 = smov 0  }
   0x2   :  { %s2339_s25 = smov 0  }
   0x3 LB: > { %s26_s26 = sadd.s32 1, %s2273_s23  ;;  %s29_s27 = sadd.s32 1, %s2277_s24  ;;  %s2281_s25 = sphi %s2339_s25, %s17_s25   ;;  %s2277_s24 = sphi %s2337_s24, %s3012_s24   ;;  %s2273_s23 = sphi %s2335_s23, %s3011_s23   ;;  %s2269_s22 = sphi %s2333_s22, %s3010_s22   ;;  %s2265_s21 = sphi %s2331_s21, %s3009_s21  }
   0x4   : > { %p27_p0 = scmp.ge.s32.totalorder %s26_s26, 5  ;;  %p1987_p1 = scmp.ge.s32.totalorder %s2281_s25, 1 }
   0x5   : > { %p265_p2 = scmp.lt.s32.totalorder %s2281_s25, 11 }
   0x6   : > { %s3014_s26 = smov (%p27_p0, %s26_s26), 0  ;;  %s3016_s27 = smov (!%p27_p0, %s29_s27), %s2277_s24 }
   0x7   : > { %p266_p3 = pnand %p1987_p1, %p265_p2  ;;  %p31_p4 = scmp.ge.s32.totalorder %s3016_s27, 2 }
   0x8   : > { %p318_p5 = scmp.lt.s32.totalorder (!%p266_p3), %s2265_s21, 3  ;;  %p320_p6 = scmp.lt.s32.totalorder (!%p266_p3), %s2269_s22, 1 }
   0x9   : > { %s3018_s27 = smov (%p31_p4, %s3016_s27), 0  ;;  %269 = sbr.rel (%p266_p3) target bundleno = 811 (0x32b), region = 40 }
   0xa   : > { %2999 = sst [smem:[#allocation4_spill]] %s3018_s27  ;;  %s1994_s28 = sadd.s32 (!%p266_p3), 4294967295, %s2265_s21 }
   0xb   : > { %p338_p7 = scmp.gt.s32.totalorder (!%p266_p3), %s1994_s28, 0  ;;  %p1995_p8 = scmp.lt.s32.totalorder (!%p266_p3), %s1994_s28, 3 }
   0xc   : > { %p2004_p9 = scmp.ne.s32.totalorder (!%p266_p3), %s2265_s21, 0 }
   0xe   : > { %s319_s29 = scalar_select %p318_p5, %s2265_s21, 3 }
   0xf   : > { %s3020_s22 = smov (!%p320_p6, %s2269_s22), 1  ;;  %s3024_s28 = smov (!%p338_p7, %s1994_s28), 0 }
  0x10   : > { %s3022_s29 = smov (!%p318_p5, %s319_s29), 3  ;;  %s1992_s30 = sshll.u32 %s3020_s22, 5 }
  0x11   : > { %s333_s9 = scalar_lea.vmem %s2995_s3, %s3020_s22  ;;  %s1991_s10 = sshll.u32 %s3022_s29, 3 }
  0x12   : > { %s336_s13 = scalar_lea.vmem %s2996_s4, %s3020_s22  ;;  %s326_s14 = sadd.s32 %s1992_s30, %s1991_s10 }
  0x13   : > { %s1993_s15 = sshll.u32 %s326_s14, 2  ;;  %s2003_s19 = sshll.u32 %s3020_s22, 1 }
  0x14   : > { %s2380_s18 = scalar_lea.vmem %s2992_s0, %s1993_s15  ;;  %s2386_s7 = scalar_lea.vmem %s2998_s6, %s2003_s19 }
  0x15   : > { %s3026_s28 = smov (!%p1995_p8, %s3024_s28), 3  ;;  %360 = sbr.rel (%p2004_p9) target bundleno = 72 (0x48), region = 44 }
  0x16   : > { %s2000_s29 = sshll.u32 %s3026_s28, 3 }
  0x17   : > { %s346_s8 = sadd.s32 %s2000_s29, %s1992_s30 }
  0x18   : > { %s2002_s11 = sshll.u32 %s346_s8, 2 }
  0x19   : > { %s2391_s14 = scalar_lea.vmem %s2997_s5, %s2002_s11 }
  0x1a   : > { %vm361_vm0 = vcmask 64512   ;;  %v2283_v0 = vmov 0.0   ;;  %vm386_vm1 = vcmask 58368   ;;  %vm388_vm2 = vcmask 60416  }
  0x1b   : > { %362 = vst.msk [vmem:[#allocation3] sm:$0xff] %vm361_vm0, %v2283_v0  ;;  %v2284_v1 = vmov 0   ;;  %vm390_vm3 = vcmask 57344  }
  0x1c   : > { %363 = vst.msk [vmem:[#allocation3 + $0x8] sm:$0xff] %vm361_vm0, %v2283_v0 }
  0x1d   : > { %364 = vst.msk [vmem:[#allocation3 + $0x10] sm:$0xff] %vm361_vm0, %v2283_v0 }
  0x1e   : > { %365 = vst.msk [vmem:[#allocation3 + $0x18] sm:$0xff] %vm361_vm0, %v2283_v0 }
  0x1f   : > { %366 = vst.msk [vmem:[#allocation3 + $0x20] sm:$0xff] %vm361_vm0, %v2283_v0 }
  0x20   : > { %367 = vst.msk [vmem:[#allocation3 + $0x28] sm:$0xff] %vm361_vm0, %v2283_v0 }
  0x21   : > { %368 = vst.msk [vmem:[#allocation3 + $0x30] sm:$0xff] %vm361_vm0, %v2283_v0 }
  0x22   : > { %369 = vst.msk [vmem:[#allocation3 + $0x38] sm:$0xff] %vm361_vm0, %v2283_v0 }
  0x23   : > { %370 = vst.msk [vmem:[#allocation3 + $0x40] sm:$0xff] %vm361_vm0, %v2283_v0 }
  0x24   : > { %371 = vst.msk [vmem:[#allocation3 + $0x48] sm:$0xff] %vm361_vm0, %v2283_v0 }
  0x25   : > { %372 = vst.msk [vmem:[#allocation3 + $0x50] sm:$0xff] %vm361_vm0, %v2283_v0 }
  0x26   : > { %373 = vst.msk [vmem:[#allocation3 + $0x58] sm:$0xff] %vm361_vm0, %v2283_v0 }
  0x27   : > { %374 = vst.msk [vmem:[#allocation3 + $0x60] sm:$0xff] %vm361_vm0, %v2283_v0 }
  0x28   : > { %375 = vst.msk [vmem:[#allocation3 + $0x68] sm:$0xff] %vm361_vm0, %v2283_v0 }
  0x29   : > { %376 = vst.msk [vmem:[#allocation3 + $0x70] sm:$0xff] %vm361_vm0, %v2283_v0 }
  0x2a   : > { %377 = vst.msk [vmem:[#allocation3 + $0x78] sm:$0xff] %vm361_vm0, %v2283_v0 }
  0x2b   : > { %378 = vst.msk [vmem:[#allocation3 + $0x80] sm:$0xff] %vm361_vm0, %v2283_v0 }
  0x2c   : > { %379 = vst.msk [vmem:[#allocation3 + $0x88] sm:$0xff] %vm361_vm0, %v2283_v0 }
  0x2d   : > { %380 = vst.msk [vmem:[#allocation3 + $0x90] sm:$0xff] %vm361_vm0, %v2283_v0 }
  0x2e   : > { %381 = vst.msk [vmem:[#allocation3 + $0x98] sm:$0xff] %vm361_vm0, %v2283_v0 }
  0x2f   : > { %382 = vst.msk [vmem:[#allocation3 + $0xa0] sm:$0xff] %vm361_vm0, %v2283_v0 }
  0x30   : > { %383 = vst.msk [vmem:[#allocation3 + $0xa8] sm:$0xff] %vm361_vm0, %v2283_v0 }
  0x31   : > { %384 = vst.msk [vmem:[#allocation3 + $0xb0] sm:$0xff] %vm361_vm0, %v2283_v0 }
  0x32   : > { %385 = vst.msk [vmem:[#allocation3 + $0xb8] sm:$0xff] %vm361_vm0, %v2283_v0 }
  0x33   : > { %387 = vst.msk [vmem:[%s2386_s7] sm:$0x3] %vm386_vm1, %v2283_v0 }
  0x34   : > { %389 = vst.msk [vmem:[#allocation2] sm:$0xf] %vm388_vm2, %v2284_v1 }
  0x35   : > { %392 = vst.msk [vmem:[#allocation2 + $0x8] sm:$0xf] %vm388_vm2, %v2284_v1 }
  0x36   : > { %394 = vst.msk [vmem:[#allocation2 + $0x10] sm:$0xf] %vm388_vm2, %v2284_v1 }
  0x37   : > { %396 = vst.msk [vmem:[#allocation2 + $0x18] sm:$0xf] %vm388_vm2, %v2284_v1 }
  0x38   : > { %398 = vst.msk [vmem:[#allocation2 + $0x20] sm:$0xf] %vm388_vm2, %v2284_v1 }
  0x39   : > { %400 = vst.msk [vmem:[#allocation2 + $0x28] sm:$0xf] %vm388_vm2, %v2284_v1 }
  0x3a   : > { %402 = vst.msk [vmem:[#allocation2 + $0x30] sm:$0xf] %vm388_vm2, %v2284_v1 }
  0x3b   : > { %404 = vst.msk [vmem:[#allocation2 + $0x38] sm:$0xf] %vm388_vm2, %v2284_v1 }
  0x3c   : > { %406 = vst.msk [vmem:[#allocation2 + $0x40] sm:$0xf] %vm388_vm2, %v2284_v1 }
  0x3d   : > { %408 = vst.msk [vmem:[#allocation2 + $0x48] sm:$0xf] %vm388_vm2, %v2284_v1 }
  0x3e   : > { %391 = vst.msk [vmem:[#allocation2 + $0x4] sm:$0x1] %vm390_vm3, %v2284_v1 }
  0x3f   : > { %393 = vst.msk [vmem:[#allocation2 + $0xc] sm:$0x1] %vm390_vm3, %v2284_v1 }
  0x40   : > { %395 = vst.msk [vmem:[#allocation2 + $0x14] sm:$0x1] %vm390_vm3, %v2284_v1 }
  0x41   : > { %397 = vst.msk [vmem:[#allocation2 + $0x1c] sm:$0x1] %vm390_vm3, %v2284_v1 }
  0x42   : > { %399 = vst.msk [vmem:[#allocation2 + $0x24] sm:$0x1] %vm390_vm3, %v2284_v1 }
  0x43   : > { %401 = vst.msk [vmem:[#allocation2 + $0x2c] sm:$0x1] %vm390_vm3, %v2284_v1 }
  0x44   : > { %403 = vst.msk [vmem:[#allocation2 + $0x34] sm:$0x1] %vm390_vm3, %v2284_v1 }
  0x45   : > { %405 = vst.msk [vmem:[#allocation2 + $0x3c] sm:$0x1] %vm390_vm3, %v2284_v1 }
  0x46   : > { %407 = vst.msk [vmem:[#allocation2 + $0x44] sm:$0x1] %vm390_vm3, %v2284_v1 }
  0x47   : > { %409 = vst.msk [vmem:[#allocation2 + $0x4c] sm:$0x1] %vm390_vm3, %v2284_v1 }
  0x48 PF: > { %p2005_p10 = scmp.ge.s32.totalorder %s2265_s21, 4 }
  0x49   : > { %s2285_s22 = smov (!%p2005_p10), 48   ;;  %s2288_s16 = smov (!%p2005_p10), 16  }
  0x4a   : > { %413 = sbr.rel (%p2005_p10) target bundleno = 752 (0x2f0), region = 48  ;;  %s2289_s17 = smov (!%p2005_p10), 8  }
  0x4b   : > { %s2291_s19 = smov (!%p2005_p10), 56   ;;  %s2292_s20 = smov (!%p2005_p10), 64  }
  0x4c   : > { %p1514_p11 = scmp.lt.s32.totalorder (!%p2005_p10), %s2265_s21, 0  ;;  %p2102_p13 = scmp.ge.s32.totalorder (!%p2005_p10), %s2265_s21, 3 }
  0x4f   : > { %v2154_v2 = vld [vmem:[%s2380_s18 + $0x10] sm:$0xff]   ;;  %v2155_v3 = vld [vmem:[%s2380_s18 + $0x18] sm:$0xff]   ;;  %v2427_v7 = vld [vmem:[%s333_s9] ss:$0 sm:$0xff]  ;;  %vm551_vm4 = vcmask 60416   ;;  %vm557_vm6 = vcmask 57344  }
  0x50   : > { %v2148_v4 = vunpack.c.h.bf16 %v2154_v2  ;;  %v2151_v5 = vunpack.c.l.bf16 %v2155_v3  ;;  %v2152_v6 = vunpack.c.h.bf16 %v2155_v3  ;;  %v2434_v8 = vld [vmem:[%s336_s13] ss:$0 sm:$0xff]  ;;  %v2147_v9 = vunpack.c.l.bf16 %v2154_v2  ;;  %v2153_v17 = vld [vmem:[%s2380_s18 + $0x8] sm:$0xff]   ;;  %v587_v45 = vld [vmem:[#allocation2 + $0x30] sm:$0xf]  ;;  %s2286_s9 = smov 40  }
  0x51   : > { %v2144_v18 = vunpack.c.h.bf16 %v2153_v17  ;;  %v2143_v20 = vunpack.c.l.bf16 %v2153_v17  ;;  %v2446_v24 = vld [vmem:[%s2380_s18] sm:$0xff]   ;;  %vm552_vm5 = vsmask.f32 7938  ;;  %vm558_vm7 = vsmask.f32 256  ;;  %s2287_s13 = smov 24  }
  0x52   : > { %v439_v10 = vmul.f32 %v2427_v7, %v2148_v4  ;;  %v440_v11 = vmul.f32 %v2427_v7, %v2151_v5  ;;  %v438_v12 = vmul.f32 %v2427_v7, %v2147_v9  ;;  %v441_v13 = vmul.f32 %v2427_v7, %v2152_v6  ;;  %vm2454_vm8 = vmand %vm551_vm4, %vm552_vm5  ;;  %v593_v47 = vld [vmem:[#allocation2 + $0x38] sm:$0xf]  ;;  %v596_v50 = vld [vmem:[#allocation2 + $0x3c] sm:$0x1]  ;;  %s2290_s18 = smov 32   ;;  %s1589_s11 = sadd.s32 (!%p2102_p13), 1, %s2265_s21 }
  0x53   : > { %v437_v25 = vmul.f32 %v2427_v7, %v2144_v18  ;;  %v2140_v32 = vunpack.c.h.bf16 %v2446_v24  ;;  %v436_v33 = vmul.f32 %v2427_v7, %v2143_v20  ;;  %vm2460_vm9 = vmand %vm557_vm6, %vm558_vm7  ;;  %v599_v57 = vld [vmem:[#allocation2 + $0x40] sm:$0xf]  ;;  %v602_v61 = vld [vmem:[#allocation2 + $0x44] sm:$0x1]  ;;  %vm760_vm10 = vcmask 1042432   ;;  %s1591_s10 = ssub.s32 (!%p2102_p13), 0, %s1589_s11 }
  0x54   : > { %v451_v14 = vadd.f32 %v2434_v8, %v439_v10  ;;  %v452_v15 = vadd.f32 %v2434_v8, %v440_v11  ;;  %v453_v16 = vadd.f32 %v2434_v8, %v441_v13  ;;  %v450_v19 = vadd.f32 %v2434_v8, %v438_v12  ;;  %v575_v3 = vld [vmem:[#allocation2 + $0x20] sm:$0xf]  ;;  %v578_v9 = vld [vmem:[#allocation2 + $0x24] sm:$0x1]  ;;  %v581_v12 = vld [vmem:[#allocation2 + $0x28] sm:$0xf]  ;;  %s2103_s12 = smin.u32 (!%p2102_p13), %s1591_s10, %s1589_s11 }
  0x55   : > { %v449_v30 = vadd.f32 %v2434_v8, %v437_v25  ;;  %v435_v53 = vmul.f32 %v2427_v7, %v2140_v32  ;;  %v448_v58 = vadd.f32 %v2434_v8, %v436_v33  ;;  %v584_v17 = vld [vmem:[#allocation2 + $0x2c] sm:$0x1]  ;;  %vm761_vm11 = vcmask 1046532   ;;  %p1590_p0 = scmp.lt.s32.totalorder (!%p2102_p13), %s1589_s11, 0 }
  0x56   : > { %v459_v21 = vmax.f32 %v451_v14, 0.0  ;;  %v460_v22 = vmax.f32 %v452_v15, 0.0  ;;  %v461_v23 = vmax.f32 %v453_v16, 0.0  ;;  %v458_v26 = vmax.f32 %v450_v19, 0.0  ;;  %v590_v19 = vld [vmem:[#allocation2 + $0x34] sm:$0x1]  ;;  %vm2493_vm14 = vmor %vm760_vm10, %vm761_vm11 }
  0x57   : > { %v457_v40 = vmax.f32 %v449_v30, 0.0  ;;  %v456_v13 = vmax.f32 %v448_v58, 0.0  ;;  %v447_v18 = vadd.f32 %v2434_v8, %v435_v53  ;;  %vm621_vm12 = vsmask.f32 3328 }
  0x58   : > { %v467_v27 = vpack.c.bf16 %v459_v21, %v459_v21  ;;  %v468_v28 = vpack.c.bf16 %v460_v22, %v460_v22  ;;  %v469_v29 = vpack.c.bf16 %v461_v23, %v461_v23  ;;  %v466_v31 = vpack.c.bf16 %v458_v26, %v458_v26 }
  0x59   : > { %v465_v51 = vpack.c.bf16 %v457_v40, %v457_v40  ;;  %v2485_v25 = vpack.c.bf16 %v456_v13, %v456_v13  ;;  %vm622_vm13 = vsmask.f32 7440  ;;  %vm1481_vm0 = vcmask 1043456  }
  0x5a   : > { %v511_v34 = vshrl.u32 %v467_v27, 16  ;;  %v514_v35 = vshll.u32 %v467_v27, 16  ;;  %v519_v36 = vshrl.u32 %v468_v28, 16  ;;  %v522_v37 = vshll.u32 %v468_v28, 16  ;;  %vm2528_vm15 = vmor %vm621_vm12, %vm622_vm13 }
  0x5b   : > { %v527_v38 = vshrl.u32 %v469_v29, 16  ;;  %v530_v39 = vshll.u32 %v469_v29, 16  ;;  %v503_v41 = vshrl.u32 %v466_v31, 16  ;;  %v506_v46 = vshll.u32 %v466_v31, 16 }
  0x5c   : > { %v513_v42 = vrot.slane %v511_v34, 7  ;;  %v521_v43 = vrot.slane %v519_v36, 7  ;;  %v495_v62 = vshrl.u32 %v465_v51, 16  ;;  %v498_v63 = vshll.u32 %v465_v51, 16 }
  0x5d   : > { %v529_v48 = vrot.slane %v527_v38, 7  ;;  %v505_v52 = vrot.slane %v503_v41, 7  ;;  %v455_v27 = vmax.f32 %v447_v18, 0.0  ;;  %v2139_v28 = vunpack.c.l.bf16 %v2446_v24 }
  0x5e   : > { %v516_v54 = vor.u32 %v514_v35, %v513_v42  ;;  %v524_v55 = vor.u32 %v522_v37, %v521_v43  ;;  %v525_v56 = vrot.slane %v521_v43, 4  ;;  %v497_v5 = vrot.slane %v495_v62, 7 }
  0x5f   : > { %v532_v59 = vor.u32 %v530_v39, %v529_v48  ;;  %v533_v60 = vrot.slane %v529_v48, 4  ;;  %v508_v6 = vor.u32 %v506_v46, %v505_v52  ;;  %v509_v11 = vrot.slane %v505_v52, 4 }
  0x60   : > { %v588_v0 = vsel %vm2454_vm8, %v516_v54, %v587_v45  ;;  %v594_v1 = vsel %vm2454_vm8, %v524_v55, %v593_v47  ;;  %v597_v2 = vsel %vm2460_vm9, %v525_v56, %v596_v50  ;;  %v517_v14 = vrot.slane %v513_v42, 4 }
  0x61   : > { %589 = vst [vmem:[#allocation2 + $0x30] sm:$0xf] %v588_v0  ;;  %v600_v4 = vsel %vm2454_vm8, %v532_v59, %v599_v57  ;;  %v603_v10 = vsel %vm2460_vm9, %v533_v60, %v602_v61  ;;  %v500_v15 = vor.u32 %v498_v63, %v497_v5  ;;  %v501_v16 = vrot.slane %v497_v5, 4 }
  0x62   : > { %595 = vst [vmem:[#allocation2 + $0x38] sm:$0xf] %v594_v1  ;;  %v582_v22 = vsel %vm2454_vm8, %v508_v6, %v581_v12  ;;  %v585_v23 = vsel %vm2460_vm9, %v509_v11, %v584_v17  ;;  %v591_v26 = vsel %vm2460_vm9, %v517_v14, %v590_v19  ;;  %v487_v24 = vshrl.u32 %v2485_v25, 16 }
  0x63   : > { %598 = vst [vmem:[#allocation2 + $0x3c] sm:$0x1] %v597_v2  ;;  %v576_v20 = vsel %vm2454_vm8, %v500_v15, %v575_v3  ;;  %v579_v21 = vsel %vm2460_vm9, %v501_v16, %v578_v9  ;;  %v490_v40 = vshll.u32 %v2485_v25, 16  ;;  %v434_v41 = vmul.f32 %v2427_v7, %v2139_v28 }
  0x64   : > { %601 = vst [vmem:[#allocation2 + $0x40] sm:$0xf] %v600_v4  ;;  %v2515_v53 = vpack.c.bf16 %v455_v27, %v455_v27  ;;  %vm1360_vm1 = vcmask 64512   ;;  %vm1373_vm2 = vcmask 130048   ;;  %vm1382_vm3 = vcmask 195584  }
  0x65   : > { %604 = vst [vmem:[#allocation2 + $0x44] sm:$0x1] %v603_v10  ;;  %v2520_v1 = vadd.f32 %v2434_v8, %v434_v41  ;;  %vm1391_vm4 = vcmask 261120   ;;  %vm1400_vm5 = vcmask 326656   ;;  %vm1409_vm6 = vcmask 392192  }
  0x66   : > { %577 = vst [vmem:[#allocation2 + $0x20] sm:$0xf] %v576_v20  ;;  %vm1427_vm7 = vcmask 523264  }
  0x67   : > { %580 = vst [vmem:[#allocation2 + $0x24] sm:$0x1] %v579_v21 }
  0x68   : > { %v2072_v29 = vld [vmem:[#allocation2 + $0x30] sm:$0xf]  ;;  %583 = vst [vmem:[#allocation2 + $0x28] sm:$0xf] %v582_v22 }
  0x69   : > { %v2490_v30 = vld [vmem:[#allocation2 + $0x30] sm:$0xe]  ;;  %v2131_v31 = vld [vmem:[#allocation2 + $0x34] sm:$0xf0]  ;;  %586 = vst [vmem:[#allocation2 + $0x2c] sm:$0x1] %v585_v23 }
  0x6a   : > { %v929_v32 = vld [vmem:[#allocation2 + $0x38] sm:$0xe]  ;;  %v2073_v33 = vor.u32 %v2131_v31, %v2072_v29  ;;  %v2497_v35 = vld [vmem:[#allocation2 + $0x3c] sm:$0x1]  ;;  %592 = vst [vmem:[#allocation2 + $0x34] sm:$0x1] %v591_v26 }
  0x6b   : > { %v2020_v36 = vrot.slane %v929_v32, 9  ;;  %v930_v37 = vld [vmem:[#allocation2 + $0x40] sm:$0xe]  ;;  %v973_v38 = vrot.slane %v2497_v35, 5  ;;  %v2501_v39 = vld [vmem:[#allocation2 + $0x3c] sm:$0x1] }
  0x6c   : > { %1316 = vrot.lane.b32.xlu1 %v2073_v33, %s2285_s22  ;;  %v2506_v42 = vld [vmem:[#allocation2 + $0x44] sm:$0x1]  ;;  %v905_v43 = vshll.u32 %v2497_v35, 16  ;;  %v2021_v45 = vrot.slane %v930_v37, 9  ;;  %v2012_v46 = vrot.slane %v2490_v30, 9  ;;  %v793_v47 = vrot.slane %v2501_v39, 5 }
  0x6d   : > { %v919_v48 = vshll.u32 %v2506_v42, 16  ;;  %v974_v50 = vsel %vm2493_vm14, %v2020_v36, %v973_v38  ;;  %v977_v51 = vrot.slane %v2506_v42, 5  ;;  %v740_v7 = vld [vmem:[#allocation2 + $0x20] sm:$0xe]  ;;  %v743_v0 = vld [vmem:[#allocation2 + $0x38] sm:$0xe] }
  0x6e   : > { %v609_v52 = vld [vmem:[#allocation2 + $0x20] sm:$0xf]  ;;  %v1278_v54 = vunpack.c.l.b16 %v974_v50  ;;  %v617_v55 = vld [vmem:[#allocation2 + $0x24] sm:$0x1]  ;;  %v2010_v56 = vrot.slane %v740_v7, 9  ;;  %v2013_v30 = vrot.slane %v743_v0, 9 }
  0x6f   : > { %v681_v57 = vshrl.u32 %v609_v52, 16  ;;  %v684_v58 = vshll.u32 %v609_v52, 16  ;;  %v978_v59 = vsel %vm2493_vm14, %v2021_v45, %v977_v51  ;;  %v741_v60 = vld [vmem:[#allocation2 + $0x28] sm:$0xe]  ;;  %v781_v61 = vrot.slane %v617_v55, 5 }
  0x70   : > { %v610_v62 = vld [vmem:[#allocation2 + $0x28] sm:$0xf]  ;;  %v690_v63 = vshll.u32 %v617_v55, 16  ;;  %v1279_v2 = vunpack.c.l.b16 %v978_v59  ;;  %v618_v3 = vld [vmem:[#allocation2 + $0x2c] sm:$0x1]  ;;  %v2011_v4 = vrot.slane %v741_v60, 9  ;;  %v794_v50 = vsel %vm2493_vm14, %v2013_v30, %v793_v47 }
  0x71   : > { %v683_v5 = vrot.slane %v681_v57, 4  ;;  %v686_v6 = vrot.slane %v684_v58, 5  ;;  %v782_v9 = vsel %vm2493_vm14, %v2010_v56, %v781_v61  ;;  %v785_v10 = vrot.slane %v618_v3, 5  ;;  %v619_v13 = vld [vmem:[#allocation2 + $0x34] sm:$0x1] }
  0x72   : > { %v692_v11 = vrot.slane %v690_v63, 5  ;;  %v695_v12 = vshrl.u32 %v610_v62, 16  ;;  %v1283_v14 = vpack.c.b16 %v1279_v2, %v1278_v54  ;;  %v1208_v15 = vunpack.c.l.b16 %v782_v9  ;;  %v2056_v18 = vld [vmem:[#allocation2 + $0x28] sm:$0xf]  ;;  %v2127_v19 = vld [vmem:[#allocation2 + $0x2c] sm:$0xf0] }
  0x73   : > { %v687_v16 = vor.u32 %v686_v6, %v683_v5  ;;  %v698_v17 = vshll.u32 %v610_v62, 16  ;;  %v786_v8 = vsel %vm2493_vm14, %v2011_v4, %v785_v10  ;;  %v704_v22 = vshll.u32 %v618_v3, 16  ;;  %v611_v26 = vld [vmem:[#allocation2 + $0x30] sm:$0xf]  ;;  %v612_v36 = vld [vmem:[#allocation2 + $0x38] sm:$0xf] }
  0x74   : > { %v697_v21 = vrot.slane %v695_v12, 4  ;;  %v789_v23 = vrot.slane %v619_v13, 5  ;;  %1290 = vrot.lane.b32.xlu0 %v1283_v14, %s2286_s9  ;;  %v1209_v27 = vunpack.c.l.b16 %v786_v8  ;;  %v2057_v33 = vor.u32 %v2127_v19, %v2056_v18  ;;  %v801_v51 = vld [vmem:[#allocation2 + $0x38] sm:$0xf]  ;;  %v802_v47 = vld [vmem:[#allocation2 + $0x40] sm:$0xf] }
  0x75   : > { %v688_v28 = vrot.slane %v687_v16, 4  ;;  %v700_v29 = vrot.slane %v698_v17, 5  ;;  %v706_v31 = vrot.slane %v704_v22, 5  ;;  %v709_v37 = vshrl.u32 %v611_v26, 16  ;;  %v2060_v4 = vld [vmem:[#allocation2 + $0x38] sm:$0xf] }
  0x76   : > { %v790_v32 = vsel %vm2493_vm14, %v2012_v46, %v789_v23  ;;  %v1214_v38 = vpack.c.b16 %v1209_v27, %v1208_v15  ;;  %v1211_v54 = vunpack.c.l.b16 %v794_v50  ;;  %1248 = vrot.lane.b32.xlu2 %v2057_v33, %s2287_s13  ;;  %v712_v56 = vshll.u32 %v611_v26, 16  ;;  %v799_v15 = vld [vmem:[#allocation2 + $0x28] sm:$0xf]  ;;  %v800_v8 = vld [vmem:[#allocation2 + $0x30] sm:$0xf] }
  0x77   : > { %v693_v41 = vsel %vm2528_vm15, %v688_v28, %v692_v11  ;;  %v701_v45 = vor.u32 %v700_v29, %v697_v21  ;;  %v1210_v52 = vunpack.c.l.b16 %v790_v32  ;;  %v711_v55 = vrot.slane %v709_v37, 4  ;;  %v2128_v11 = vld [vmem:[#allocation2 + $0x3c] sm:$0xf0]  ;;  %v2548_v21 = vld [vmem:[#allocation2 + $0x2c] sm:$0x1] }
  0x78   : > { %v1188_v7 = vunpack.c.l.b16 %v693_v41  ;;  %1220 = vrot.lane.b32.xlu1 %v1214_v38, %s2288_s16  ;;  %v718_v57 = vshll.u32 %v619_v13, 16  ;;  %v723_v58 = vshrl.u32 %v612_v36, 16  ;;  %v726_v60 = vshll.u32 %v612_v36, 16  ;;  %v2555_v30 = vld [vmem:[#allocation2 + $0x34] sm:$0x1] }
  0x79   : > { %v702_v46 = vrot.slane %v701_v45, 4  ;;  %v1215_v59 = vpack.c.b16 %v1211_v54, %v1210_v52  ;;  %v732_v61 = vshll.u32 %v2501_v39, 16  ;;  %v896_v62 = vshrl.u32 %v801_v51, 16 }
  0x7a   : > { %v714_v0 = vrot.slane %v712_v56, 5  ;;  %v720_v2 = vrot.slane %v718_v57, 5  ;;  %v725_v3 = vrot.slane %v723_v58, 4  ;;  %v728_v6 = vrot.slane %v726_v60, 5  ;;  %v2132_v60 = vld [vmem:[#allocation2 + $0x44] sm:$0xf0] }
  0x7b   : > { %v707_v63 = vsel %vm2528_vm15, %v702_v46, %v706_v31  ;;  %v734_v9 = vrot.slane %v732_v61, 5  ;;  %v898_v10 = vrot.slane %v896_v62, 4  ;;  %v899_v13 = vshll.u32 %v801_v51, 16 }
  0x7c   : > { %v1189_v5 = vunpack.c.l.b16 %v707_v63  ;;  %v715_v12 = vor.u32 %v714_v0, %v711_v55  ;;  %v907_v14 = vrot.slane %v905_v43, 5  ;;  %v910_v39 = vshrl.u32 %v802_v47, 16 }
  0x7d   : > { %v729_v17 = vor.u32 %v728_v6, %v725_v3  ;;  %v913_v18 = vshll.u32 %v802_v47, 16  ;;  %v921_v19 = vrot.slane %v919_v48, 5  ;;  %v901_v23 = vrot.slane %v899_v13, 5  ;;  %v605_v13 = vld [vmem:[#allocation2] sm:$0xf] }
  0x7e   : > { %v1194_v16 = vpack.c.b16 %v1189_v5, %v1188_v7  ;;  %v716_v22 = vrot.slane %v715_v12, 4  ;;  %v912_v26 = vrot.slane %v910_v39, 4  ;;  %v2061_v27 = vor.u32 %v2128_v11, %v2060_v4  ;;  %v563_v5 = vld [vmem:[#allocation2 + $0x10] sm:$0xf] }
  0x7f   : > { %v730_v35 = vrot.slane %v729_v17, 4  ;;  %v915_v43 = vrot.slane %v913_v18, 5  ;;  %v868_v28 = vshrl.u32 %v799_v15, 16  ;;  %v871_v29 = vshll.u32 %v799_v15, 16  ;;  %v569_v17 = vld [vmem:[#allocation2 + $0x18] sm:$0xf] }
  0x80   : > { %1200 = vrot.lane.b32.xlu0 %v1194_v16, %s2289_s17  ;;  %1222 = vrot.lane.b32.xlu1 %v1215_v59, %s2288_s16  ;;  %v721_v42 = vsel %vm2528_vm15, %v716_v22, %v720_v2  ;;  %v902_v48 = vor.u32 %v901_v23, %v898_v10  ;;  %v877_v31 = vshll.u32 %v2548_v21, 16  ;;  %v882_v32 = vshrl.u32 %v800_v8, 16  ;;  %v2076_v59 = vld [vmem:[#allocation2 + $0x40] sm:$0xf]  ;;  %v566_v10 = vld [vmem:[#allocation2 + $0x14] sm:$0x1] }
  0x81   : > { %1250 = vrot.lane.b32.xlu2 %v2061_v27, %s2287_s13  ;;  %v735_v33 = vsel %vm2528_vm15, %v730_v35, %v734_v9  ;;  %v1190_v36 = vunpack.c.l.b16 %v721_v42  ;;  %v916_v37 = vor.u32 %v915_v43, %v912_v26  ;;  %v870_v38 = vrot.slane %v868_v28, 4  ;;  %v736_v35 = vld [vmem:[#allocation2] sm:$0xe]  ;;  %v927_v43 = vld [vmem:[#allocation2 + $0x28] sm:$0xe] }
  0x82   : > { %v1191_v41 = vunpack.c.l.b16 %v735_v33  ;;  %v903_v45 = vrot.slane %v902_v48, 4  ;;  %v873_v50 = vrot.slane %v871_v29, 5  ;;  %v879_v51 = vrot.slane %v877_v31, 5  ;;  %v928_v42 = vld [vmem:[#allocation2 + $0x30] sm:$0xe] }
  0x83   : > { %v917_v7 = vrot.slane %v916_v37, 4  ;;  %v884_v52 = vrot.slane %v882_v32, 4  ;;  %v885_v54 = vshll.u32 %v800_v8, 16  ;;  %v891_v55 = vshll.u32 %v2555_v30, 16  ;;  %v560_v37 = vld [vmem:[#allocation2 + $0xc] sm:$0x1] }
  0x84   : > { %v1195_v46 = vpack.c.b16 %v1191_v41, %v1190_v36  ;;  %v908_v56 = vsel %vm2528_vm15, %v903_v45, %v907_v14  ;;  %v874_v57 = vor.u32 %v873_v50, %v870_v38  ;;  %v479_v58 = vshrl.u32 %v2515_v53, 16  ;;  %v554_v36 = vld [vmem:[#allocation2 + $0x8] sm:$0xf]  ;;  %v986_v45 = vld [vmem:[#allocation2 + $0x40] sm:$0xf] }
  0x85   : > { %v922_v61 = vsel %vm2528_vm15, %v917_v7, %v921_v19  ;;  %v1258_v47 = vunpack.c.l.b16 %v908_v56  ;;  %v887_v62 = vrot.slane %v885_v54, 5  ;;  %v893_v63 = vrot.slane %v891_v55, 5  ;;  %v2588_v56 = vld [vmem:[#allocation2 + $0x44] sm:$0x1] }
  0x86   : > { %v1259_v0 = vunpack.c.l.b16 %v922_v61  ;;  %v875_v2 = vrot.slane %v874_v57, 4  ;;  %v481_v3 = vrot.slane %v479_v58, 7  ;;  %v482_v4 = vshll.u32 %v2515_v53, 16  ;;  %v572_v53 = vld [vmem:[#allocation2 + $0x1c] sm:$0x1] }
  0x87   : > { %v888_v6 = vor.u32 %v887_v62, %v884_v52  ;;  %v489_v9 = vrot.slane %v487_v24, 7  ;;  %v2077_v11 = vor.u32 %v2132_v60, %v2076_v59  ;;  %v454_v12 = vmax.f32 %v2520_v1, 0.0  ;;  %v613_v24 = vld [vmem:[#allocation2 + $0x4] sm:$0x1] }
  0x88   : > { %1202 = vrot.lane.b32.xlu0 %v1195_v46, %s2289_s17  ;;  %v1263_v14 = vpack.c.b16 %v1259_v0, %v1258_v47  ;;  %v880_v39 = vsel %vm2528_vm15, %v875_v2, %v879_v51  ;;  %v484_v15 = vor.u32 %v482_v4, %v481_v3  ;;  %v485_v16 = vrot.slane %v481_v3, 4 }
  0x89   : > { %v889_v18 = vrot.slane %v888_v6, 4  ;;  %v1256_v19 = vunpack.c.l.b16 %v880_v39  ;;  %v492_v8 = vor.u32 %v490_v40, %v489_v9  ;;  %v493_v22 = vrot.slane %v489_v9, 4  ;;  %1318 = vrot.lane.b32.xlu2 %v2077_v11, %s2285_s22 }
  0x8a   : > { %1270 = vrot.lane.b32.xlu1 %v1263_v14, %s2290_s18  ;;  %v564_v1 = vsel %vm2454_vm8, %v484_v15, %v563_v5  ;;  %v567_v23 = vsel %vm2460_vm9, %v485_v16, %v566_v10  ;;  %v462_v26 = vpack.c.bf16 %v454_v12, %v454_v12  ;;  %v625_v27 = vshrl.u32 %v605_v13, 16  ;;  %v987_v10 = vld [vmem:[#allocation2 + $0x48] sm:$0xf] }
  0x8b   : > { %v894_v25 = vsel %vm2528_vm15, %v889_v18, %v893_v63  ;;  %565 = vst [vmem:[#allocation2 + $0x10] sm:$0xf] %v564_v1  ;;  %v570_v40 = vsel %vm2454_vm8, %v492_v8, %v569_v17  ;;  %v573_v28 = vsel %vm2460_vm9, %v493_v22, %v572_v53  ;;  %v628_v29 = vshll.u32 %v605_v13, 16  ;;  %v2613_v8 = vld [vmem:[#allocation2 + $0x4c] sm:$0x1] }
  0x8c   : > { %v1257_v48 = vunpack.c.l.b16 %v894_v25  ;;  %568 = vst [vmem:[#allocation2 + $0x14] sm:$0x1] %v567_v23  ;;  %v471_v31 = vshrl.u32 %v462_v26, 16  ;;  %v474_v32 = vshll.u32 %v462_v26, 16  ;;  %v627_v33 = vrot.slane %v625_v27, 4 }
  0x8d   : > { %571 = vst [vmem:[#allocation2 + $0x18] sm:$0xf] %v570_v40  ;;  %v630_v38 = vrot.slane %v628_v29, 5  ;;  %v634_v41 = vshll.u32 %v613_v24, 16  ;;  %v2018_v7 = vrot.slane %v927_v43, 9  ;;  %v965_v52 = vrot.slane %v2548_v21, 5 }
  0x8e   : > { %v1262_v50 = vpack.c.b16 %v1257_v48, %v1256_v19  ;;  %574 = vst [vmem:[#allocation2 + $0x1c] sm:$0x1] %v573_v28  ;;  %v473_v51 = vrot.slane %v471_v31, 7  ;;  %v2006_v54 = vrot.slane %v736_v35, 9  ;;  %v765_v55 = vrot.slane %v613_v24, 5 }
  0x8f   : > { %v2019_v46 = vrot.slane %v928_v42, 9  ;;  %v631_v59 = vor.u32 %v630_v38, %v627_v33  ;;  %v966_v60 = vsel %vm2493_vm14, %v2018_v7, %v965_v52  ;;  %v2593_v61 = vrot.slane %v634_v41, 5  ;;  %v1114_v48 = vld [vmem:[#allocation2 + $0x40] sm:$0xe] }
  0x90   : > { %1268 = vrot.lane.b32.xlu0 %v1262_v50, %s2290_s18  ;;  %v476_v57 = vor.u32 %v474_v32, %v473_v51  ;;  %v477_v58 = vrot.slane %v473_v51, 4  ;;  %v969_v47 = vrot.slane %v2555_v30, 5  ;;  %v1276_v62 = vunpack.c.l.b16 %v966_v60  ;;  %v1115_v60 = vld [vmem:[#allocation2 + $0x48] sm:$0xe] }
  0x91   : > { %v1081_v63 = vshrl.u32 %v986_v45, 16  ;;  %v1084_v3 = vshll.u32 %v986_v45, 16  ;;  %v1090_v4 = vshll.u32 %v2588_v56, 16  ;;  %v2608_v44 = vsel %vm2493_vm14, %v2006_v54, %v765_v55 }
  0x92   : > { %v607_v21 = vld [vmem:[#allocation2 + $0x10] sm:$0xf]  ;;  %v555_v0 = vsel %vm2454_vm8, %v476_v57, %v554_v36  ;;  %v561_v2 = vsel %vm2460_vm9, %v477_v58, %v560_v37  ;;  %v970_v30 = vsel %vm2493_vm14, %v2019_v46, %v969_v47  ;;  %v632_v18 = vrot.slane %v631_v59, 4 }
  0x93   : > { %v2601_v5 = vld [vmem:[#allocation2 + $0x14] sm:$0x1]  ;;  %v653_v6 = vshrl.u32 %v607_v21, 16  ;;  %v656_v9 = vshll.u32 %v607_v21, 16  ;;  %556 = vst [vmem:[#allocation2 + $0x8] sm:$0xf] %v555_v0  ;;  %v1277_v49 = vunpack.c.l.b16 %v970_v30  ;;  %v1204_v36 = vunpack.c.l.b16 %v2608_v44 }
  0x94   : > { %v608_v11 = vld [vmem:[#allocation2 + $0x18] sm:$0xf]  ;;  %v662_v12 = vshll.u32 %v2601_v5, 16  ;;  %562 = vst [vmem:[#allocation2 + $0xc] sm:$0x1] %v561_v2  ;;  %v1083_v13 = vrot.slane %v1081_v63, 4  ;;  %v637_v32 = vsel %vm2528_vm15, %v632_v18, %v2593_v61 }
  0x95   : > { %v2610_v14 = vld [vmem:[#allocation2 + $0x1c] sm:$0x1]  ;;  %v655_v39 = vrot.slane %v653_v6, 4  ;;  %v658_v15 = vrot.slane %v656_v9, 5  ;;  %v667_v16 = vshrl.u32 %v608_v11, 16  ;;  %v670_v17 = vshll.u32 %v608_v11, 16 }
  0x96   : > { %v676_v53 = vshll.u32 %v2610_v14, 16  ;;  %v1282_v19 = vpack.c.b16 %v1277_v49, %v1276_v62  ;;  %v1086_v22 = vrot.slane %v1084_v3, 5  ;;  %v664_v1 = vrot.slane %v662_v12, 5  ;;  %v984_v0 = vld [vmem:[#allocation2 + $0x30] sm:$0xf] }
  0x97   : > { %v659_v24 = vor.u32 %v658_v15, %v655_v39  ;;  %v669_v23 = vrot.slane %v667_v16, 4  ;;  %v672_v26 = vrot.slane %v670_v17, 5  ;;  %v1092_v43 = vrot.slane %v1090_v4, 5  ;;  %v992_v9 = vld [vmem:[#allocation2 + $0x34] sm:$0x1] }
  0x98   : > { %v678_v27 = vrot.slane %v676_v53, 5  ;;  %1288 = vrot.lane.b32.xlu2 %v1282_v19, %s2286_s9  ;;  %v1087_v35 = vor.u32 %v1086_v22, %v1083_v13  ;;  %v1095_v25 = vshrl.u32 %v987_v10, 16  ;;  %v1098_v29 = vshll.u32 %v987_v10, 16  ;;  %v985_v17 = vld [vmem:[#allocation2 + $0x38] sm:$0xf] }
  0x99   : > { %v660_v40 = vrot.slane %v659_v24, 4  ;;  %v673_v28 = vor.u32 %v672_v26, %v669_v23  ;;  %v1104_v42 = vshll.u32 %v2613_v8, 16  ;;  %v2028_v61 = vrot.slane %v1114_v48, 9  ;;  %v993_v24 = vld [vmem:[#allocation2 + $0x3c] sm:$0x1] }
  0x9a   : > { %v606_v31 = vld [vmem:[#allocation2 + $0x8] sm:$0xf]  ;;  %v1088_v37 = vrot.slane %v1087_v35, 4  ;;  %v1097_v38 = vrot.slane %v1095_v25, 4  ;;  %v1100_v21 = vrot.slane %v1098_v29, 5  ;;  %v1158_v11 = vrot.slane %v2588_v56, 5 }
  0x9b   : > { %v737_v33 = vld [vmem:[#allocation2 + $0x8] sm:$0xe]  ;;  %v665_v41 = vsel %vm2528_vm15, %v660_v40, %v664_v1  ;;  %v674_v45 = vrot.slane %v673_v28, 4  ;;  %v614_v50 = vld [vmem:[#allocation2 + $0xc] sm:$0x1]  ;;  %v639_v51 = vshrl.u32 %v606_v31, 16  ;;  %v1184_v49 = vunpack.c.l.b16 %v637_v32 }
  0x9c   : > { %v642_v7 = vshll.u32 %v606_v31, 16  ;;  %v1186_v52 = vunpack.c.l.b16 %v665_v41  ;;  %v648_v54 = vshll.u32 %v614_v50, 16  ;;  %v2007_v55 = vrot.slane %v737_v33, 9  ;;  %v1112_v35 = vld [vmem:[#allocation2 + $0x30] sm:$0xe] }
  0x9d   : > { %v769_v46 = vrot.slane %v614_v50, 5  ;;  %v679_v57 = vsel %vm2528_vm15, %v674_v45, %v678_v27  ;;  %v641_v58 = vrot.slane %v639_v51, 4  ;;  %v1093_v63 = vsel %vm2528_vm15, %v1088_v37, %v1092_v43  ;;  %v1113_v29 = vld [vmem:[#allocation2 + $0x38] sm:$0xe]  ;;  %v795_v33 = vld [vmem:[#allocation2 + $0x8] sm:$0xf] }
  0x9e   : > { %v644_v59 = vrot.slane %v642_v7, 5  ;;  %v1187_v47 = vunpack.c.l.b16 %v679_v57  ;;  %v650_v3 = vrot.slane %v648_v54, 5  ;;  %v1106_v6 = vrot.slane %v1104_v42, 5  ;;  %v796_v37 = vld [vmem:[#allocation2 + $0x10] sm:$0xf] }
  0x9f   : > { %v770_v62 = vsel %vm2493_vm14, %v2007_v55, %v769_v46  ;;  %v1101_v10 = vor.u32 %v1100_v21, %v1097_v38  ;;  %v2029_v12 = vrot.slane %v1115_v60, 9  ;;  %v1162_v13 = vrot.slane %v2613_v8, 5  ;;  %v2642_v50 = vld [vmem:[#allocation2 + $0xc] sm:$0x1] }
  0xa0   : > { %v645_v2 = vor.u32 %v644_v59, %v641_v58  ;;  %v1205_v4 = vunpack.c.l.b16 %v770_v62  ;;  %v1193_v30 = vpack.c.b16 %v1187_v47, %v1186_v52  ;;  %v1053_v39 = vshrl.u32 %v984_v0, 16 }
  0xa1   : > { %v1102_v15 = vrot.slane %v1101_v10, 4  ;;  %v1159_v16 = vsel %vm2493_vm14, %v2028_v61, %v1158_v11  ;;  %v1056_v53 = vshll.u32 %v984_v0, 16  ;;  %v1062_v18 = vshll.u32 %v992_v9, 16  ;;  %v2650_v61 = vld [vmem:[#allocation2 + $0x14] sm:$0x1] }
  0xa2   : > { %v646_v44 = vrot.slane %v645_v2, 4  ;;  %1198 = vrot.lane.b32.xlu1 %v1193_v30, %s2289_s17  ;;  %v2636_v22 = vunpack.c.l.b16 %v1093_v63  ;;  %v1163_v56 = vsel %vm2493_vm14, %v2029_v12, %v1162_v13  ;;  %v1055_v8 = vrot.slane %v1053_v39, 4  ;;  %v739_v10 = vld [vmem:[#allocation2 + $0x18] sm:$0xe] }
  0xa3   : > { %v1212_v23 = vpack.c.b16 %v1205_v4, %v1204_v36  ;;  %v1107_v26 = vsel %vm2528_vm15, %v1102_v15, %v1106_v6  ;;  %v1058_v27 = vrot.slane %v1056_v53, 5  ;;  %v1346_v43 = vunpack.c.l.b16 %v1159_v16  ;;  %v925_v53 = vld [vmem:[#allocation2 + $0x18] sm:$0xe] }
  0xa4   : > { %v651_v19 = vsel %vm2528_vm15, %v646_v44, %v650_v3  ;;  %v1347_v25 = vunpack.c.l.b16 %v1163_v56  ;;  %v1067_v40 = vshrl.u32 %v985_v17, 16  ;;  %v1070_v28 = vshll.u32 %v985_v17, 16  ;;  %v738_v3 = vld [vmem:[#allocation2 + $0x10] sm:$0xe]  ;;  %v2659_v17 = vld [vmem:[#allocation2 + $0x1c] sm:$0x1] }
  0xa5   : > { %v1185_v1 = vunpack.c.l.b16 %v651_v19  ;;  %v1059_v48 = vor.u32 %v1058_v27, %v1055_v8  ;;  %v1064_v31 = vrot.slane %v1062_v18, 5  ;;  %v1076_v32 = vshll.u32 %v993_v24, 16 }
  0xa6   : > { %v1327_v38 = vunpack.c.l.b16 %v1107_v26  ;;  %v1069_v41 = vrot.slane %v1067_v40, 4  ;;  %v1072_v45 = vrot.slane %v1070_v28, 5  ;;  %v2026_v36 = vrot.slane %v1112_v35, 9 }
  0xa7   : > { %v1192_v42 = vpack.c.b16 %v1185_v1, %v1184_v49  ;;  %v1060_v51 = vrot.slane %v1059_v48, 4  ;;  %v1078_v7 = vrot.slane %v1076_v32, 5  ;;  %v1150_v52 = vrot.slane %v992_v9, 5  ;;  %v924_v48 = vld [vmem:[#allocation2 + $0x10] sm:$0xe] }
  0xa8   : > { %v2027_v54 = vrot.slane %v1113_v29, 9  ;;  %v1073_v55 = vor.u32 %v1072_v45, %v1069_v41  ;;  %v1154_v46 = vrot.slane %v993_v24, 5  ;;  %v812_v57 = vshrl.u32 %v795_v33, 16  ;;  %v926_v24 = vld [vmem:[#allocation2 + $0x20] sm:$0xe] }
  0xa9   : > { %1196 = vrot.lane.b32.xlu0 %v1192_v42, %s2289_s17  ;;  %v815_v58 = vshll.u32 %v795_v33, 16  ;;  %v1065_v59 = vsel %vm2528_vm15, %v1060_v51, %v1064_v31  ;;  %v1151_v60 = vsel %vm2493_vm14, %v2026_v36, %v1150_v52  ;;  %v821_v47 = vshll.u32 %v2642_v50, 16  ;;  %v2678_v51 = vld [vmem:[#allocation2 + $0x14] sm:$0x1]  ;;  %s2293_s17 = smov 120  }
  0xaa   : > { %1216 = vrot.lane.b32.xlu1 %v1212_v23, %s2288_s16  ;;  %v826_v62 = vshrl.u32 %v796_v37, 16  ;;  %v1331_v63 = vpack.c.b16 %v1327_v38, %v2636_v22  ;;  %v1351_v21 = vpack.c.b16 %v1347_v25, %v1346_v43  ;;  %v1074_v0 = vrot.slane %v1073_v55, 4  ;;  %v2666_v43 = vld [vmem:[#allocation2 + $0x24] sm:$0x1] }
  0xab   : > { %v1324_v2 = vunpack.c.l.b16 %v1065_v59  ;;  %v1155_v4 = vsel %vm2493_vm14, %v2027_v54, %v1154_v46  ;;  %v1344_v6 = vunpack.c.l.b16 %v1151_v60  ;;  %v814_v9 = vrot.slane %v812_v57, 4  ;;  %v981_v60 = vld [vmem:[#allocation2 + $0x18] sm:$0xf] }
  0xac   : > { %v817_v30 = vrot.slane %v815_v58, 5  ;;  %v1079_v11 = vsel %vm2528_vm15, %v1074_v0, %v1078_v7  ;;  %v828_v12 = vrot.slane %v826_v62, 4  ;;  %v829_v44 = vshll.u32 %v796_v37, 16  ;;  %v980_v37 = vld [vmem:[#allocation2 + $0x10] sm:$0xf] }
  0xad   : > { %v835_v49 = vshll.u32 %v2650_v61, 16  ;;  %v1325_v13 = vunpack.c.l.b16 %v1079_v11  ;;  %v823_v15 = vrot.slane %v821_v47, 5  ;;  %v2008_v16 = vrot.slane %v738_v3, 9  ;;  %v2686_v47 = vld [vmem:[#allocation2 + $0x1c] sm:$0x1] }
  0xae   : > { %v818_v39 = vor.u32 %v817_v30, %v814_v9  ;;  %v1345_v18 = vunpack.c.l.b16 %v1155_v4  ;;  %v831_v19 = vrot.slane %v829_v44, 5  ;;  %v773_v22 = vrot.slane %v2601_v5, 5  ;;  %v923_v5 = vld [vmem:[#allocation2 + $0x8] sm:$0xe]  ;;  %v2052_v0 = vld [vmem:[#allocation2 + $0x18] sm:$0xf] }
  0xaf   : > { %v2009_v56 = vrot.slane %v739_v10, 9  ;;  %v1330_v8 = vpack.c.b16 %v1325_v13, %v1324_v2  ;;  %v837_v23 = vrot.slane %v835_v49, 5  ;;  %v777_v26 = vrot.slane %v2610_v14, 5  ;;  %v2126_v2 = vld [vmem:[#allocation2 + $0x1c] sm:$0xf0] }
  0xb0   : > { %v819_v1 = vrot.slane %v818_v39, 4  ;;  %v832_v27 = vor.u32 %v831_v19, %v828_v12  ;;  %v774_v35 = vsel %vm2493_vm14, %v2008_v16, %v773_v22  ;;  %v2016_v25 = vrot.slane %v925_v53, 9  ;;  %v2125_v9 = vld [vmem:[#allocation2 + $0xc] sm:$0xf0]  ;;  %v2697_v39 = vld [vmem:[#allocation2 + $0x24] sm:$0x1] }
  0xb1   : > { %1338 = vrot.lane.b32.xlu0 %v1331_v63, %s2291_s19  ;;  %v957_v40 = vrot.slane %v2659_v17, 5  ;;  %1336 = vrot.lane.b32.xlu2 %v1330_v8, %s2291_s19  ;;  %v778_v14 = vsel %vm2493_vm14, %v2009_v56, %v777_v26  ;;  %v1206_v29 = vunpack.c.l.b16 %v774_v35  ;;  %v2017_v42 = vrot.slane %v926_v24, 9  ;;  %v797_v22 = vld [vmem:[#allocation2 + $0x18] sm:$0xf]  ;;  %v1111_v26 = vld [vmem:[#allocation2 + $0x28] sm:$0xe] }
  0xb2   : > { %1358 = vrot.lane.b32.xlu1 %v1351_v21, %s2292_s20  ;;  %v824_v28 = vsel %vm2528_vm15, %v819_v1, %v823_v15  ;;  %v1350_v31 = vpack.c.b16 %v1345_v18, %v1344_v6  ;;  %v833_v32 = vrot.slane %v832_v27, 4  ;;  %v1207_v33 = vunpack.c.l.b16 %v778_v14  ;;  %v2048_v6 = vld [vmem:[#allocation2 + $0x8] sm:$0xf]  ;;  %v1110_v15 = vld [vmem:[#allocation2 + $0x20] sm:$0xe] }
  0xb3   : > { %v1252_v38 = vunpack.c.l.b16 %v824_v28  ;;  %v958_v41 = vsel %vm2493_vm14, %v2016_v25, %v957_v40  ;;  %v961_v45 = vrot.slane %v2666_v43, 5  ;;  %v2014_v36 = vrot.slane %v923_v5, 9 }
  0xb4   : > { %v838_v7 = vsel %vm2528_vm15, %v833_v32, %v837_v23  ;;  %v1213_v52 = vpack.c.b16 %v1207_v33, %v1206_v29  ;;  %v949_v54 = vrot.slane %v2642_v50, 5  ;;  %v2015_v55 = vrot.slane %v924_v48, 9  ;;  %v2699_v23 = vld [vmem:[#allocation2 + $0x2c] sm:$0x1]  ;;  %v798_v48 = vld [vmem:[#allocation2 + $0x20] sm:$0xf] }
  0xb5   : > { %v1253_v46 = vunpack.c.l.b16 %v838_v7  ;;  %v962_v57 = vsel %vm2493_vm14, %v2017_v42, %v961_v45  ;;  %v953_v58 = vrot.slane %v2650_v61, 5  ;;  %v997_v59 = vshrl.u32 %v980_v37, 16  ;;  %v1108_v32 = vld [vmem:[#allocation2 + $0x10] sm:$0xe] }
  0xb6   : > { %v1000_v62 = vshll.u32 %v980_v37, 16  ;;  %v1006_v63 = vshll.u32 %v2678_v51, 16  ;;  %v1274_v3 = vunpack.c.l.b16 %v958_v41  ;;  %v1275_v4 = vunpack.c.l.b16 %v962_v57 }
  0xb7   : > { %v1260_v21 = vpack.c.b16 %v1253_v46, %v1252_v38  ;;  %v999_v50 = vrot.slane %v997_v59, 4  ;;  %v950_v61 = vsel %vm2493_vm14, %v2014_v36, %v949_v54  ;;  %v954_v10 = vsel %vm2493_vm14, %v2015_v55, %v953_v58  ;;  %v982_v46 = vld [vmem:[#allocation2 + $0x20] sm:$0xf] }
  0xb8   : > { %v1002_v30 = vrot.slane %v1000_v62, 5  ;;  %v1011_v11 = vshrl.u32 %v981_v60, 16  ;;  %v1014_v12 = vshll.u32 %v981_v60, 16  ;;  %v1020_v44 = vshll.u32 %v2686_v47, 16  ;;  %v983_v62 = vld [vmem:[#allocation2 + $0x28] sm:$0xf] }
  0xb9   : > { %1356 = vrot.lane.b32.xlu0 %v1350_v31, %s2292_s20  ;;  %1218 = vrot.lane.b32.xlu2 %v1213_v52, %s2288_s16  ;;  %v1008_v13 = vrot.slane %v1006_v63, 5  ;;  %v2053_v16 = vor.u32 %v2126_v2, %v2052_v0  ;;  %v2049_v53 = vor.u32 %v2125_v9, %v2048_v6  ;;  %v1281_v56 = vpack.c.b16 %v1275_v4, %v1274_v3  ;;  %v1109_v63 = vld [vmem:[#allocation2 + $0x18] sm:$0xe] }
  0xba   : > { %1264 = vrot.lane.b32.xlu1 %v1260_v21, %s2290_s18  ;;  %v1003_v49 = vor.u32 %v1002_v30, %v999_v50  ;;  %v1013_v18 = vrot.slane %v1011_v11, 4  ;;  %v1016_v19 = vrot.slane %v1014_v12, 5  ;;  %v1272_v24 = vunpack.c.l.b16 %v950_v61  ;;  %v2068_v11 = vld [vmem:[#allocation2 + $0x20] sm:$0xf] }
  0xbb   : > { %v1273_v8 = vunpack.c.l.b16 %v954_v10  ;;  %v1022_v35 = vrot.slane %v1020_v44, 5  ;;  %v2024_v25 = vrot.slane %v1110_v15, 9  ;;  %v1142_v40 = vrot.slane %v2697_v39, 5 }
  0xbc   : > { %v1004_v1 = vrot.slane %v1003_v49, 4  ;;  %v1017_v27 = vor.u32 %v1016_v19, %v1013_v18  ;;  %v840_v28 = vshrl.u32 %v797_v22, 16  ;;  %v2025_v29 = vrot.slane %v1111_v26, 9  ;;  %v2130_v49 = vld [vmem:[#allocation2 + $0x24] sm:$0xf0] }
  0xbd   : > { %v1146_v42 = vrot.slane %v2699_v23, 5  ;;  %v1280_v31 = vpack.c.b16 %v1273_v8, %v1272_v24  ;;  %v843_v37 = vshll.u32 %v797_v22, 16  ;;  %v1143_v45 = vsel %vm2493_vm14, %v2024_v25, %v1142_v40 }
  0xbe   : > { %v1009_v5 = vsel %vm2528_vm15, %v1004_v1, %v1008_v13  ;;  %v1018_v14 = vrot.slane %v1017_v27, 4  ;;  %v842_v33 = vrot.slane %v840_v28, 4  ;;  %v849_v36 = vshll.u32 %v2659_v17, 16 }
  0xbf   : > { %v1320_v41 = vunpack.c.l.b16 %v1009_v5  ;;  %v845_v52 = vrot.slane %v843_v37, 5  ;;  %v854_v54 = vshrl.u32 %v798_v48, 16  ;;  %v857_v55 = vshll.u32 %v798_v48, 16 }
  0xc0   : > { %v1023_v38 = vsel %vm2528_vm15, %v1018_v14, %v1022_v35  ;;  %v1147_v57 = vsel %vm2493_vm14, %v2025_v29, %v1146_v42  ;;  %v2022_v58 = vrot.slane %v1108_v32, 9  ;;  %v1134_v59 = vrot.slane %v2678_v51, 5  ;;  %v2064_v29 = vld [vmem:[#allocation2 + $0x10] sm:$0xf]  ;;  %v2129_v42 = vld [vmem:[#allocation2 + $0x14] sm:$0xf0] }
  0xc1   : > { %1246 = vrot.lane.b32.xlu0 %v2053_v16, %s2287_s13  ;;  %1244 = vrot.lane.b32.xlu2 %v2049_v53, %s2287_s13  ;;  %v1321_v7 = vunpack.c.l.b16 %v1023_v38  ;;  %v863_v60 = vshll.u32 %v2666_v43, 16  ;;  %v846_v21 = vor.u32 %v845_v52, %v842_v33  ;;  %v851_v0 = vrot.slane %v849_v36, 5  ;;  %v1444_v52 = vld [vmem:[%s2993_s1 + $0x20] sm:$0xf] }
  0xc2   : > { %1286 = vrot.lane.b32.xlu1 %v1281_v56, %s2286_s9  ;;  %v856_v2 = vrot.slane %v854_v54, 4  ;;  %v859_v50 = vrot.slane %v857_v55, 5  ;;  %v1025_v4 = vshrl.u32 %v982_v46, 16  ;;  %v1028_v6 = vshll.u32 %v982_v46, 16 }
  0xc3   : > { %v1328_v17 = vpack.c.b16 %v1321_v7, %v1320_v41  ;;  %v865_v3 = vrot.slane %v863_v60, 5  ;;  %v847_v9 = vrot.slane %v846_v21, 4  ;;  %v1039_v30 = vshrl.u32 %v983_v62, 16  ;;  %v2135_v60 = vld [vmem:[%s2993_s1 + $0x10] sm:$0xff]  ;;  %v2134_v21 = vld [vmem:[%s2993_s1 + $0x8] sm:$0xff] }
  0xc4   : > { %v860_v61 = vor.u32 %v859_v50, %v856_v2  ;;  %v1042_v10 = vshll.u32 %v983_v62, 16  ;;  %v2023_v51 = vrot.slane %v1109_v63, 9  ;;  %v1138_v43 = vrot.slane %v2686_v47, 5  ;;  %v2133_v2 = vld [vmem:[%s2993_s1] sm:$0xff] }
  0xc5   : > { %v1027_v12 = vrot.slane %v1025_v4, 4  ;;  %v1030_v44 = vrot.slane %v1028_v6, 5  ;;  %v852_v13 = vsel %vm2528_vm15, %v847_v9, %v851_v0  ;;  %v1041_v16 = vrot.slane %v1039_v30, 4  ;;  %v2044_v4 = vld [vmem:[#allocation2 + $0x30] sm:$0xf] }
  0xc6   : > { %v861_v15 = vrot.slane %v860_v61, 4  ;;  %v1044_v53 = vrot.slane %v1042_v10, 5  ;;  %v1342_v18 = vunpack.c.l.b16 %v1143_v45  ;;  %v1343_v19 = vunpack.c.l.b16 %v1147_v57  ;;  %v2124_v6 = vld [vmem:[#allocation2 + $0x34] sm:$0xf0]  ;;  %v2040_v10 = vld [vmem:[#allocation2 + $0x20] sm:$0xf] }
  0xc7   : > { %v1254_v22 = vunpack.c.l.b16 %v852_v13  ;;  %v2069_v24 = vor.u32 %v2130_v49, %v2068_v11  ;;  %v1135_v47 = vsel %vm2493_vm14, %v2022_v58, %v1134_v59  ;;  %v1139_v8 = vsel %vm2493_vm14, %v2023_v51, %v1138_v43  ;;  %v2136_v59 = vld [vmem:[%s2993_s1 + $0x18] sm:$0xff]  ;;  %v2123_v11 = vld [vmem:[#allocation2 + $0x24] sm:$0xf0] }
  0xc8   : > { %v866_v56 = vsel %vm2528_vm15, %v861_v15, %v865_v3  ;;  %v1031_v26 = vor.u32 %v1030_v44, %v1027_v12  ;;  %v1034_v27 = vshll.u32 %v2697_v39, 16  ;;  %v1045_v35 = vor.u32 %v1044_v53, %v1041_v16 }
  0xc9   : > { %1284 = vrot.lane.b32.xlu0 %v1280_v31, %s2286_s9  ;;  %v1255_v1 = vunpack.c.l.b16 %v866_v56  ;;  %v1048_v25 = vshll.u32 %v2699_v23, 16  ;;  %v1349_v40 = vpack.c.b16 %v1343_v19, %v1342_v18  ;;  %v1340_v28 = vunpack.c.l.b16 %v1135_v47  ;;  %s1515_s9 = ssub.s32 0, %s2265_s21 }
  0xca   : > { %1332 = vrot.lane.b32.xlu1 %v1328_v17, %s2291_s19  ;;  %v1341_v14 = vunpack.c.l.b16 %v1139_v8  ;;  %v1032_v48 = vrot.slane %v1031_v26, 4  ;;  %v1036_v34 = vrot.slane %v1034_v27, 5  ;;  %v1046_v31 = vrot.slane %v1045_v35, 4  ;;  %s2098_s13 = smin.u32 %s2265_s21, %s1515_s9 }
  0xcb   : > { %v1261_v5 = vpack.c.b16 %v1255_v1, %v1254_v22  ;;  %v1050_v32 = vrot.slane %v1048_v25, 5  ;;  %v2065_v33 = vor.u32 %v2129_v42, %v2064_v29  ;;  %v1462_v54 = vunpack.c.l.b16 %v1444_v52  ;;  %2230 = sdivrem.u32 %s2098_s13, 3 }
  0xcc   : > { %v1348_v39 = vpack.c.b16 %v1341_v14, %v1340_v28  ;;  %v1037_v23 = vsel %vm2528_vm15, %v1032_v48, %v1036_v34  ;;  %v2045_v9 = vor.u32 %v2124_v6, %v2044_v4  ;;  %v2041_v12 = vor.u32 %v2123_v11, %v2040_v10  ;;  %v2036_v48 = vld [vmem:[#allocation2 + $0x10] sm:$0xf]  ;;  %v2122_v34 = vld [vmem:[#allocation2 + $0x14] sm:$0xf0]  ;;  %2233 = sdivrem.u32 (!%p2102_p13), %s2103_s12, 3 }
  0xcd   : > { %1266 = vrot.lane.b32.xlu2 %v1261_v5, %s2290_s18  ;;  %v1051_v37 = vsel %vm2528_vm15, %v1046_v31, %v1050_v32  ;;  %v1322_v38 = vunpack.c.l.b16 %v1037_v23  ;;  %v1467_v20 = vpack.c.b16 %v1462_v54, %v1462_v54  ;;  %vm1418_vm8 = vcmask 457728   ;;  %v2121_v23 = vld [vmem:[#allocation2 + $0x4] sm:$0xf0] }
  0xce   : > { %v1323_v41 = vunpack.c.l.b16 %v1051_v37  ;;  %vm1472_vm9 = vcmask 588800   ;;  %v2037_v32 = vor.u32 %v2122_v34, %v2036_v48 }
  0xcf   : > { %v1483_v55 = vsel %vm1481_vm0, %v1467_v20, 0 }
  0xd0   : > { %v1329_v45 = vpack.c.b16 %v1323_v41, %v1322_v38  ;;  %v2740_v36 = vpop.permute.xlu2 %1248  ;;  %2158 = vmatpush.bf16.msra.mxu3 %v1483_v55  ;;  %2157 = vmatpush.bf16.msra.mxu2 %v1483_v55 }
  0xd1   : > { %1314 = vrot.lane.b32.xlu0 %v2069_v24, %s2285_s22  ;;  %2156 = vmatpush.bf16.msra.mxu1 %v1483_v55 }
  0xd2   : > { %1354 = vrot.lane.b32.xlu1 %v1349_v40, %s2292_s20  ;;  %1488 = vmatpush.bf16.msra.mxu0 %v1483_v55 }
  0xd4   : > { %2161 = vmatpush.bf16.msra.mxu3 %v2136_v59  ;;  %2160 = vmatpush.bf16.msra.mxu2 %v2136_v59  ;;  %s2231_s16 = spop.drf %2230 }
  0xd5   : > { %1312 = vrot.lane.b32.xlu2 %v2065_v33, %s2285_s22  ;;  %2159 = vmatpush.bf16.msra.mxu1 %v2136_v59  ;;  %v2032_v33 = vld [vmem:[#allocation2] sm:$0xf]  ;;  %s2232_s18 = spop.drf %2230 }
  0xd6   : > { %1489 = vmatpush.bf16.msra.mxu0 %v2136_v59  ;;  %v2033_v41 = vor.u32 %v2121_v23, %v2032_v33  ;;  %s2234_s27 = spop.drf (!%p2102_p13), %2233 }
  0xd7   : > { %s2235_s28 = spop.drf (!%p2102_p13), %2233 }
  0xd8   : > { %2164 = vmatpush.bf16.msra.mxu3 %v2135_v60  ;;  %2163 = vmatpush.bf16.msra.mxu2 %v2135_v60  ;;  %s1595_s30 = ssub.s32 (!%p2102_p13), 0, %s2235_s28 }
  0xd9   : > { %1352 = vrot.lane.b32.xlu0 %v1348_v39, %s2292_s20  ;;  %2162 = vmatpush.bf16.msra.mxu1 %v2135_v60 }
  0xda   : > { %1490 = vmatpush.bf16.msra.mxu0 %v2135_v60 }
  0xdb   : > { %v1251_v57 = vpop.permute.xlu2 %1250 }
  0xdc   : > { %2167 = vmatpush.bf16.msra.mxu3 %v2134_v21  ;;  %2166 = vmatpush.bf16.msra.mxu2 %v2134_v21 }
  0xdd   : > { %1334 = vrot.lane.b32.xlu2 %v1329_v45, %s2291_s19  ;;  %2165 = vmatpush.bf16.msra.mxu1 %v2134_v21  ;;  %s1519_s19 = ssub.s32 0, %s2232_s18 }
  0xde   : > { %v2742_v7 = vpop.permute.xlu1 %1316  ;;  %1491 = vmatpush.bf16.msra.mxu0 %v2134_v21  ;;  %s3028_s19 = smov (!%p1514_p11, %s1519_s19), %s2232_s18 }
  0xdf   : > { %p2100_p12 = scmp.lt.s32.totalorder %s3028_s19, 0  ;;  %s1525_s20 = sadd.s32 3, %s3028_s19 }
  0xe0   : > { %2170 = vmatpush.bf16.msra.mxu3 %v2133_v2  ;;  %2169 = vmatpush.bf16.msra.mxu2 %v2133_v2 }
  0xe1   : > { %2168 = vmatpush.bf16.msra.mxu1 %v2133_v2  ;;  %s3030_s20 = smov (!%p2100_p12, %s1525_s20), %s3028_s19 }
  0xe2   : > { %1492 = vmatpush.bf16.msra.mxu0 %v2133_v2  ;;  %s2101_s29 = sshll.u32 %s3030_s20, 6 }
  0xe3   : > { %v1319_v63 = vpop.permute.xlu2 %1318  ;;  %s2824_s8 = scalar_lea.vmem [#allocation3], %s2101_s29 }
  0xe6   : > { %v1291_v46 = vpop.permute.xlu0 %1290 }
  0xea   : > { %v1221_v58 = vpop.permute.xlu1 %1220 }
  0xf2   : > { %v1201_v62 = vpop.permute.xlu0 %1200  ;;  %v1223_v0 = vpop.permute.xlu1 %1222 }
  0xf3   : > { %v1289_v17 = vpop.permute.xlu2 %1288  ;;  %v1369_v49 = vsel %vm1360_vm1, %v2041_v12, %v1201_v62  ;;  %v1533_v12 = vld [vmem:[%s2824_s8 + $0x20] sm:$0xff] }
  0xf4   : > { %v1379_v18 = vsel %vm1373_vm2, %v1369_v49, %v1221_v58  ;;  %v1529_v49 = vld [vmem:[%s2824_s8] sm:$0xff] }
  0xf5   : > { %v1388_v56 = vsel %vm1382_vm3, %v1379_v18, %v2740_v36 }
  0xfa   : > { %v1203_v50 = vpop.permute.xlu0 %1202 }
  0xfb   : > { %v1372_v51 = vsel %vm1360_vm1, %v2045_v9, %v1203_v50 }
  0xfc   : > { %v1271_v3 = vpop.permute.xlu1 %1270  ;;  %v1381_v44 = vsel %vm1373_vm2, %v1372_v51, %v1223_v0 }
  0xfd   : > { %v1390_v13 = vsel %vm1382_vm3, %v1381_v44, %v1251_v57 }
  0xfe   : > { %v1399_v19 = vsel %vm1391_vm4, %v1390_v13, %v1271_v3 }
  0xff   : > { %v1408_v22 = vsel %vm1400_vm5, %v1399_v19, %v1291_v46 }
 0x100   : > { %v1417_v8 = vsel %vm1409_vm6, %v1408_v22, %v1319_v63  ;;  %v1535_v22 = vld [vmem:[%s2824_s8 + $0x30] sm:$0xff] }
 0x102   : > { %v1269_v61 = vpop.permute.xlu0 %1268 }
 0x103   : > { %v1397_v24 = vsel %vm1391_vm4, %v1388_v56, %v1269_v61 }
 0x104   : > { %v1406_v1 = vsel %vm1400_vm5, %v1397_v24, %v1289_v17  ;;  %v1531_v24 = vld [vmem:[%s2824_s8 + $0x10] sm:$0xff] }
 0x105   : > { %v1415_v40 = vsel %vm1409_vm6, %v1406_v1, %v2742_v7 }
 0x10b   : > { %v1337_v30 = vpop.permute.xlu2 %1336 }
 0x10c   : > { %v1424_v28 = vsel %vm1418_vm8, %v1415_v40, %v1337_v30 }
 0x113   : > { %v1219_v16 = vpop.permute.xlu2 %1218 }
 0x114   : > { %v1199_v43 = vpop.permute.xlu1 %1198 }
 0x115   : > { %v1366_v38 = vsel %vm1360_vm1, %v2037_v32, %v1199_v43 }
 0x116   : > { %v1377_v36 = vsel %vm1373_vm2, %v1366_v38, %v1219_v16 }
 0x11b   : > { %v1197_v15 = vpop.permute.xlu0 %1196  ;;  %v1245_v35 = vpop.permute.xlu2 %1244 }
 0x11c   : > { %v1217_v53 = vpop.permute.xlu1 %1216  ;;  %v1363_v54 = vsel %vm1360_vm1, %v2033_v41, %v1197_v15 }
 0x11d   : > { %v1375_v20 = vsel %vm1373_vm2, %v1363_v54, %v1217_v53  ;;  %v1532_v53 = vld [vmem:[%s2824_s8 + $0x18] sm:$0xff] }
 0x11e   : > { %v1384_v57 = vsel %vm1382_vm3, %v1375_v20, %v1245_v35 }
 0x123   : > { %v1339_v47 = vpop.permute.xlu0 %1338 }
 0x124   : > { %v1426_v26 = vsel %vm1418_vm8, %v1417_v8, %v1339_v47  ;;  %v1359_v27 = vpop.permute.xlu1 %1358 }
 0x125   : > { %v1435_v25 = vsel %vm1427_vm7, %v1426_v26, %v1359_v27  ;;  %v1534_v26 = vld [vmem:[%s2824_s8 + $0x28] sm:$0xff] }
 0x126   : > { %2097 = vmatmul.msk.bf16.vlgmr.msra.gmra.mxu3 %vm1472_vm9, %v1435_v25  ;;  %v1530_v25 = vld [vmem:[%s2824_s8 + $0x8] sm:$0xff] }
 0x127   : > { %v1267_v42 = vpop.permute.xlu2 %1266 }
 0x12b   : > { %v1357_v5 = vpop.permute.xlu0 %1356 }
 0x12c   : > { %v1433_v14 = vsel %vm1427_vm7, %v1424_v28, %v1357_v5  ;;  %v1265_v29 = vpop.permute.xlu1 %1264  ;;  %v1536_v28 = vld [vmem:[%s2824_s8 + $0x38] sm:$0xff] }
 0x12d   : > { %2096 = vmatmul.msk.bf16.vlgmr.msra.gmra.mxu2 %vm1472_vm9, %v1433_v14  ;;  %v1393_v60 = vsel %vm1391_vm4, %v1384_v57, %v1265_v29 }
 0x12f   : > { %v1313_v37 = vpop.permute.xlu2 %1312 }
 0x133   : > { %v1247_v31 = vpop.permute.xlu0 %1246 }
 0x134   : > { %v1287_v39 = vpop.permute.xlu1 %1286  ;;  %v1386_v7 = vsel %vm1382_vm3, %v1377_v36, %v1247_v31 }
 0x135   : > { %v1395_v55 = vsel %vm1391_vm4, %v1386_v7, %v1267_v42 }
 0x136   : > { %v1404_v58 = vsel %vm1400_vm5, %v1395_v55, %v1287_v39 }
 0x137   : > { %v1335_v46 = vpop.permute.xlu2 %1334 }
 0x13b   : > { %v1285_v45 = vpop.permute.xlu0 %1284 }
 0x13c   : > { %v1333_v52 = vpop.permute.xlu1 %1332  ;;  %v1402_v63 = vsel %vm1400_vm5, %v1393_v60, %v1285_v45 }
 0x13d   : > { %v1411_v50 = vsel %vm1409_vm6, %v1402_v63, %v1313_v37 }
 0x13e   : > { %v1420_v17 = vsel %vm1418_vm8, %v1411_v50, %v1333_v52 }
 0x143   : > { %v1315_v59 = vpop.permute.xlu0 %1314 }
 0x144   : > { %v1413_v62 = vsel %vm1409_vm6, %v1404_v58, %v1315_v59  ;;  %v1355_v0 = vpop.permute.xlu1 %1354 }
 0x145   : > { %v1422_v21 = vsel %vm1418_vm8, %v1413_v62, %v1335_v46 }
 0x146   : > { %v1431_v2 = vsel %vm1427_vm7, %v1422_v21, %v1355_v0 }
 0x147   : > { %2095 = vmatmul.msk.bf16.vlgmr.msra.gmra.mxu1 %vm1472_vm9, %v1431_v2 }
 0x14b   : > { %v1353_v3 = vpop.permute.xlu0 %1352 }
 0x14c   : > { %v1429_v4 = vsel %vm1427_vm7, %v1420_v17, %v1353_v3 }
 0x14d   : > { %2094 = vmatmul.msk.bf16.vlgmr.msra.gmra.mxu0 %vm1472_vm9, %v1429_v4 }
 0x1a9   : > { %v2811_v10 = vpop.f32.mrf.mxu3 }
 0x1b0   : > { %v2799_v6 = vpop.f32.mrf.mxu2 }
 0x1b1   : > { %1553 = vrot.lane.b32.xlu0 %v2799_v6, %s2293_s17  ;;  %v2819_v43 = vpop.f32.mrf.mxu3 }
 0x1b8   : > { %v2808_v30 = vpop.f32.mrf.mxu2 }
 0x1c4   : > { %v2802_v9 = vpop.f32.mrf.mxu1 }
 0x1c5   : > { %1549 = vrot.lane.b32.xlu1 %v2802_v9, %s2293_s17 }
 0x1ca   : > { %v2805_v61 = vpop.f32.mrf.mxu0 }
 0x1cb   : > { %1545 = vrot.lane.b32.xlu2 %v2805_v61, %s2293_s17 }
 0x1cc   : > { %v2813_v11 = vpop.f32.mrf.mxu1 }
 0x1cd   : > { %1555 = vrot.lane.b32.xlu1 %v2808_v30, %s2293_s17 }
 0x1d2   : > { %v2815_v51 = vpop.f32.mrf.mxu0 }
 0x1d3   : > { %1551 = vrot.lane.b32.xlu2 %v2813_v11, %s2293_s17  ;;  %1547 = vrot.lane.b32.xlu0 %v2815_v51, %s2293_s17 }
 0x1db   : > { %1557 = vrot.lane.b32.xlu2 %v2811_v10, %s2293_s17  ;;  %1559 = vrot.lane.b32.xlu0 %v2819_v43, %s2293_s17 }
 0x223   : > { %v1554_v44 = vpop.permute.xlu0 %1553 }
 0x224   : > { %v1573_v13 = vadd.f32 %v1554_v44, %v1533_v12 }
 0x225   : > { %v1546_v15 = vpop.permute.xlu2 %1545 }
 0x226   : > { %1581 = vst.msk [vmem:[%s2824_s8 + $0x20] sm:$0xff] %vm1360_vm1, %v1573_v13  ;;  %v1569_v16 = vadd.f32 %v1546_v15, %v1529_v49 }
 0x228   : > { %1577 = vst.msk [vmem:[%s2824_s8] sm:$0xff] %vm1360_vm1, %v1569_v16 }
 0x22d   : > { %v1552_v18 = vpop.permute.xlu2 %1551 }
 0x22e   : > { %v1572_v19 = vadd.f32 %v1552_v18, %v1532_v53 }
 0x230   : > { %1580 = vst.msk [vmem:[%s2824_s8 + $0x18] sm:$0xff] %vm1360_vm1, %v1572_v19 }
 0x235   : > { %v1558_v56 = vpop.permute.xlu2 %1557 }
 0x236   : > { %v1575_v47 = vadd.f32 %v1558_v56, %v1535_v22 }
 0x237   : > { %v1550_v8 = vpop.permute.xlu1 %1549 }
 0x238   : > { %1583 = vst.msk [vmem:[%s2824_s8 + $0x30] sm:$0xff] %vm1360_vm1, %v1575_v47  ;;  %v1571_v1 = vadd.f32 %v1550_v8, %v1531_v24 }
 0x23a   : > { %1579 = vst.msk [vmem:[%s2824_s8 + $0x10] sm:$0xff] %vm1360_vm1, %v1571_v1 }
 0x23f   : > { %v1556_v27 = vpop.permute.xlu1 %1555 }
 0x240   : > { %v1574_v35 = vadd.f32 %v1556_v27, %v1534_v26 }
 0x242   : > { %1582 = vst.msk [vmem:[%s2824_s8 + $0x28] sm:$0xff] %vm1360_vm1, %v1574_v35 }
 0x245   : > { %v1548_v40 = vpop.permute.xlu0 %1547 }
 0x246   : > { %v1570_v5 = vadd.f32 %v1548_v40, %v1530_v25 }
 0x248   : > { %1578 = vst.msk [vmem:[%s2824_s8 + $0x8] sm:$0xff] %vm1360_vm1, %v1570_v5 }
 0x24c   : > { %1588 = sbr.rel (%p2102_p13) target bundleno = 610 (0x262), region = 52 }
 0x24d   : > { %v1560_v14 = vpop.permute.xlu0 %1559 }
 0x24e   : > { %v1576_v29 = vadd.f32 %v1560_v14, %v1536_v28 }
 0x250   : > { %1584 = vst.msk [vmem:[%s2824_s8 + $0x38] sm:$0xff] %vm1360_vm1, %v1576_v29 }
 0x251   : > { %s3032_s30 = smov (!%p1590_p0, %s1595_s30), %s2235_s28 }
 0x252   : > { %p2105_p1 = scmp.lt.s32.totalorder %s3032_s30, 0  ;;  %s1601_s15 = sadd.s32 3, %s3032_s30 }
 0x254   : > { %s3034_s15 = smov (!%p2105_p1, %s1601_s15), %s3032_s30 }
 0x255   : > { %s2106_s22 = sshll.u32 %s3034_s15, 6 }
 0x256   : > { %s1604_s9 = scalar_lea.vmem [#allocation3], %s2106_s22 }
 0x257   : > { %v1605_v42 = vld [vmem:[%s1604_s9] sm:$0xff]  ;;  %v1606_v48 = vld [vmem:[%s1604_s9 + $0x8] sm:$0xff]  ;;  %v1607_v34 = vld [vmem:[%s1604_s9 + $0x10] sm:$0xff] }
 0x258   : > { %v1613_v31 = vadd.f32 %v1605_v42, %v2805_v61  ;;  %v1614_v32 = vadd.f32 %v1606_v48, %v2815_v51  ;;  %v1615_v39 = vadd.f32 %v1607_v34, %v2802_v9  ;;  %v1608_v33 = vld [vmem:[%s1604_s9 + $0x18] sm:$0xff]  ;;  %v1609_v23 = vld [vmem:[%s1604_s9 + $0x20] sm:$0xff]  ;;  %v1610_v37 = vld [vmem:[%s1604_s9 + $0x28] sm:$0xff] }
 0x259   : > { %v1616_v38 = vadd.f32 %v1608_v33, %v2813_v11  ;;  %v1611_v41 = vld [vmem:[%s1604_s9 + $0x30] sm:$0xff]  ;;  %v1617_v45 = vadd.f32 %v1609_v23, %v2799_v6  ;;  %v1612_v36 = vld [vmem:[%s1604_s9 + $0x38] sm:$0xff]  ;;  %v1618_v7 = vadd.f32 %v1610_v37, %v2808_v30 }
 0x25a   : > { %1621 = vst.msk [vmem:[%s1604_s9] sm:$0xff] %vm1360_vm1, %v1613_v31  ;;  %v1619_v52 = vadd.f32 %v1611_v41, %v2811_v10  ;;  %v1620_v54 = vadd.f32 %v1612_v36, %v2819_v43 }
 0x25b   : > { %1622 = vst.msk [vmem:[%s1604_s9 + $0x8] sm:$0xff] %vm1360_vm1, %v1614_v32 }
 0x25c   : > { %1623 = vst.msk [vmem:[%s1604_s9 + $0x10] sm:$0xff] %vm1360_vm1, %v1615_v39 }
 0x25d   : > { %1624 = vst.msk [vmem:[%s1604_s9 + $0x18] sm:$0xff] %vm1360_vm1, %v1616_v38 }
 0x25e   : > { %1625 = vst.msk [vmem:[%s1604_s9 + $0x20] sm:$0xff] %vm1360_vm1, %v1617_v45 }
 0x25f   : > { %1626 = vst.msk [vmem:[%s1604_s9 + $0x28] sm:$0xff] %vm1360_vm1, %v1618_v7 }
 0x260   : > { %1627 = vst.msk [vmem:[%s1604_s9 + $0x30] sm:$0xff] %vm1360_vm1, %v1619_v52 }
 0x261   : > { %1628 = vst.msk [vmem:[%s1604_s9 + $0x38] sm:$0xff] %vm1360_vm1, %v1620_v54 }
 0x262 PF: > { %p2107_p2 = scmp.le.s32.totalorder %s2265_s21, 0 }
 0x263   : > { %s1633_s13 = sadd.s32 (!%p2107_p2), 2, %s2265_s21  ;;  %s2294_s16 = smov (!%p2107_p2), 112  }
 0x264   : > { %1632 = sbr.rel (%p2107_p2) target bundleno = 752 (0x2f0), region = 56  ;;  %s1635_s17 = ssub.s32 (!%p2107_p2), 0, %s1633_s13 }
 0x265   : > { %s2108_s18 = smin.u32 (!%p2107_p2), %s1635_s17, %s1633_s13  ;;  %p1634_p3 = scmp.lt.s32.totalorder (!%p2107_p2), %s1633_s13, 0 }
 0x266   : > { %2236 = sdivrem.u32 (!%p2107_p2), %s2108_s18, 3 }
 0x269   : > { %1661 = vrot.lane.b32.xlu1 %v2802_v9, %s2294_s16  ;;  %1657 = vrot.lane.b32.xlu0 %v2805_v61, %s2294_s16 }
 0x26a   : > { %1665 = vrot.lane.b32.xlu2 %v2799_v6, %s2294_s16 }
 0x26f   : > { %s2237_s19 = spop.drf %2236 }
 0x270   : > { %s2238_s20 = spop.drf %2236 }
 0x271   : > { %1663 = vrot.lane.b32.xlu1 %v2813_v11, %s2294_s16  ;;  %1659 = vrot.lane.b32.xlu0 %v2815_v51, %s2294_s16  ;;  %s1639_s29 = ssub.s32 0, %s2238_s20 }
 0x272   : > { %1667 = vrot.lane.b32.xlu2 %v2808_v30, %s2294_s16  ;;  %s3036_s29 = smov (!%p1634_p3, %s1639_s29), %s2238_s20 }
 0x273   : > { %p2110_p4 = scmp.lt.s32.totalorder %s3036_s29, 0  ;;  %s1645_s8 = sadd.s32 3, %s3036_s29 }
 0x275   : > { %s3038_s8 = smov (!%p2110_p4, %s1645_s8), %s3036_s29 }
 0x276   : > { %s2111_s11 = sshll.u32 %s3038_s8, 6 }
 0x277   : > { %s2878_s10 = scalar_lea.vmem [#allocation3], %s2111_s11 }
 0x278   : > { %v1653_v20 = vld [vmem:[%s2878_s10 + $0x20] sm:$0xff]  ;;  %v1654_v57 = vld [vmem:[%s2878_s10 + $0x28] sm:$0xff]  ;;  %v1651_v60 = vld [vmem:[%s2878_s10 + $0x10] sm:$0xff] }
 0x279   : > { %1671 = vrot.lane.b32.xlu1 %v2819_v43, %s2294_s16  ;;  %1669 = vrot.lane.b32.xlu0 %v2811_v10, %s2294_s16  ;;  %v1649_v62 = vld [vmem:[%s2878_s10] sm:$0xff]  ;;  %v1652_v50 = vld [vmem:[%s2878_s10 + $0x18] sm:$0xff] }
 0x27a   : > { %v1650_v17 = vld [vmem:[%s2878_s10 + $0x8] sm:$0xff]  ;;  %v1656_v30 = vld [vmem:[%s2878_s10 + $0x38] sm:$0xff]  ;;  %v1655_v11 = vld [vmem:[%s2878_s10 + $0x30] sm:$0xff] }
 0x2c4   : > { %v1666_v55 = vpop.permute.xlu2 %1665 }
 0x2c5   : > { %v1685_v46 = vadd.f32 %v1666_v55, %v1653_v20 }
 0x2c7   : > { %1693 = vst.msk [vmem:[%s2878_s10 + $0x20] sm:$0xff] %vm1360_vm1, %v1685_v46 }
 0x2cc   : > { %v1668_v58 = vpop.permute.xlu2 %1667 }
 0x2cd   : > { %v1686_v59 = vadd.f32 %v1668_v58, %v1654_v57 }
 0x2cf   : > { %1694 = vst.msk [vmem:[%s2878_s10 + $0x28] sm:$0xff] %vm1360_vm1, %v1686_v59 }
 0x2db   : > { %v1662_v63 = vpop.permute.xlu1 %1661  ;;  %v1658_v21 = vpop.permute.xlu0 %1657 }
 0x2dc   : > { %v1683_v0 = vadd.f32 %v1662_v63, %v1651_v60  ;;  %v1681_v2 = vadd.f32 %v1658_v21, %v1649_v62 }
 0x2de   : > { %1691 = vst.msk [vmem:[%s2878_s10 + $0x10] sm:$0xff] %vm1360_vm1, %v1683_v0 }
 0x2df   : > { %1689 = vst.msk [vmem:[%s2878_s10] sm:$0xff] %vm1360_vm1, %v1681_v2 }
 0x2e3   : > { %v1664_v3 = vpop.permute.xlu1 %1663  ;;  %v1660_v4 = vpop.permute.xlu0 %1659 }
 0x2e4   : > { %v1684_v6 = vadd.f32 %v1664_v3, %v1652_v50  ;;  %v1682_v9 = vadd.f32 %v1660_v4, %v1650_v17 }
 0x2e6   : > { %1692 = vst.msk [vmem:[%s2878_s10 + $0x18] sm:$0xff] %vm1360_vm1, %v1684_v6 }
 0x2e7   : > { %1690 = vst.msk [vmem:[%s2878_s10 + $0x8] sm:$0xff] %vm1360_vm1, %v1682_v9 }
 0x2eb   : > { %v1672_v61 = vpop.permute.xlu1 %1671  ;;  %v1670_v10 = vpop.permute.xlu0 %1669 }
 0x2ec   : > { %v1688_v51 = vadd.f32 %v1672_v61, %v1656_v30  ;;  %v1687_v43 = vadd.f32 %v1670_v10, %v1655_v11 }
 0x2ee   : > { %1696 = vst.msk [vmem:[%s2878_s10 + $0x38] sm:$0xff] %vm1360_vm1, %v1688_v51 }
 0x2ef   : > { %1695 = vst.msk [vmem:[%s2878_s10 + $0x30] sm:$0xff] %vm1360_vm1, %v1687_v43 }
 0x2f0 PF: > { %p2112_p5 = scmp.le.s32.totalorder %s2265_s21, 0 }
 0x2f1   : > { %s1701_s12 = sadd.s32 (!%p2112_p5), 2, %s2265_s21 }
 0x2f2   : > { %1700 = sbr.rel (%p2112_p5) target bundleno = 811 (0x32b), region = 60  ;;  %s1703_s27 = ssub.s32 (!%p2112_p5), 0, %s1701_s12 }
 0x2f3   : > { %s2113_s28 = smin.u32 (!%p2112_p5), %s1703_s27, %s1701_s12  ;;  %p1702_p6 = scmp.lt.s32.totalorder (!%p2112_p5), %s1701_s12, 0 }
 0x2f4   : > { %2240 = sdivrem.u32 (!%p2112_p5), %s2113_s28, 3 }
 0x2f7   : > { %v2239_v12 = vld [vmem:[%s2994_s2] ss:$0 sm:$0xff]  ;;  %vm1754_vm10 = vcmask 64512   ;;  %v2295_v56 = vmov 0.0   ;;  %vm1745_vm11 = vcmask 60416   ;;  %vm1805_vm12 = vcmask 1040384  }
 0x2f8   : > { %vm1809_vm13 = vcmask 58368  }
 0x2fd   : > { %s2241_s30 = spop.drf %2240 }
 0x2fe   : > { %s2242_s15 = spop.drf %2240 }
 0x2ff   : > { %s1707_s22 = ssub.s32 0, %s2242_s15 }
 0x300   : > { %s3040_s22 = smov (!%p1702_p6, %s1707_s22), %s2242_s15 }
 0x301   : > { %p2115_p7 = scmp.lt.s32.totalorder %s3040_s22, 0  ;;  %s1713_s9 = sadd.s32 3, %s3040_s22 }
 0x303   : > { %s3042_s9 = smov (!%p2115_p7, %s1713_s9), %s3040_s22 }
 0x304   : > { %s2116_s17 = sshll.u32 %s3042_s9, 6 }
 0x305   : > { %s2909_s18 = scalar_lea.vmem [#allocation3], %s2116_s17 }
 0x306   : > { %v1717_v44 = vld [vmem:[%s2909_s18] sm:$0xff]  ;;  %v1718_v49 = vld [vmem:[%s2909_s18 + $0x8] sm:$0xff]  ;;  %v1719_v13 = vld [vmem:[%s2909_s18 + $0x10] sm:$0xff] }
 0x307   : > { %v1729_v15 = vadd.f32 %v2239_v12, %v1717_v44  ;;  %v1730_v16 = vadd.f32 %v2239_v12, %v1718_v49  ;;  %v1731_v53 = vadd.f32 %v2239_v12, %v1719_v13  ;;  %v1720_v18 = vld [vmem:[%s2909_s18 + $0x18] sm:$0xff]  ;;  %v1721_v19 = vld [vmem:[%s2909_s18 + $0x20] sm:$0xff]  ;;  %v1722_v22 = vld [vmem:[%s2909_s18 + $0x28] sm:$0xff]  ;;  %1811 = vst.msk [vmem:[%s2909_s18] sm:$0xff] %vm1754_vm10, %v2295_v56 }
 0x308   : > { %v1732_v24 = vadd.f32 %v2239_v12, %v1720_v18  ;;  %v1733_v47 = vadd.f32 %v2239_v12, %v1721_v19  ;;  %1812 = vst.msk [vmem:[%s2909_s18 + $0x8] sm:$0xff] %vm1754_vm10, %v2295_v56  ;;  %v1734_v5 = vadd.f32 %v2239_v12, %v1722_v22  ;;  %v1723_v39 = vld [vmem:[%s2909_s18 + $0x30] sm:$0xff]  ;;  %v1724_v37 = vld [vmem:[%s2909_s18 + $0x38] sm:$0xff] }
 0x309   : > { %v1737_v8 = vpack.c.bf16 %v1729_v15, %v1729_v15  ;;  %v1755_v1 = vsel %vm1754_vm10, %v1729_v15, 0.0  ;;  %v1776_v26 = vmul.f32 %v1729_v15, %v1729_v15  ;;  %v1738_v27 = vpack.c.bf16 %v1730_v16, %v1730_v16  ;;  %1813 = vst.msk [vmem:[%s2909_s18 + $0x10] sm:$0xff] %vm1754_vm10, %v2295_v56 }
 0x30a   : > { %v1756_v35 = vsel %vm1754_vm10, %v1730_v16, 0.0  ;;  %v1777_v25 = vmul.f32 %v1730_v16, %v1730_v16  ;;  %v1739_v40 = vpack.c.bf16 %v1731_v53, %v1731_v53  ;;  %1814 = vst.msk [vmem:[%s2909_s18 + $0x18] sm:$0xff] %vm1754_vm10, %v2295_v56  ;;  %v1778_v29 = vmul.f32 %v1731_v53, %v1731_v53 }
 0x30b   : > { %1746 = vst.msk [vmem:[%s2391_s14] sm:$0xf] %vm1745_vm11, %v1737_v8  ;;  %v1784_v28 = vsel %vm1754_vm10, %v1776_v26, 0.0  ;;  %v1757_v14 = vadd.f32 %v1756_v35, %v1755_v1  ;;  %v1740_v42 = vpack.c.bf16 %v1732_v24, %v1732_v24  ;;  %v1758_v34 = vsel %vm1754_vm10, %v1731_v53, 0.0 }
 0x30c   : > { %1747 = vst.msk [vmem:[%s2391_s14 + $0x4] sm:$0xf] %vm1745_vm11, %v1738_v27  ;;  %v1785_v48 = vsel %vm1754_vm10, %v1777_v25, 0.0  ;;  %v1779_v31 = vmul.f32 %v1732_v24, %v1732_v24  ;;  %v1741_v32 = vpack.c.bf16 %v1733_v47, %v1733_v47  ;;  %v1787_v38 = vsel %vm1754_vm10, %v1778_v29, 0.0 }
 0x30d   : > { %v1786_v33 = vadd.f32 %v1785_v48, %v1784_v28  ;;  %1748 = vst.msk [vmem:[%s2391_s14 + $0x8] sm:$0xf] %vm1745_vm11, %v1739_v40  ;;  %v1759_v23 = vadd.f32 %v1758_v34, %v1757_v14  ;;  %v1760_v41 = vsel %vm1754_vm10, %v1732_v24, 0.0  ;;  %v1780_v45 = vmul.f32 %v1733_v47, %v1733_v47 }
 0x30e   : > { %1749 = vst.msk [vmem:[%s2391_s14 + $0xc] sm:$0xf] %vm1745_vm11, %v1740_v42  ;;  %v1742_v36 = vpack.c.bf16 %v1734_v5, %v1734_v5  ;;  %v1735_v54 = vadd.f32 %v2239_v12, %v1723_v39  ;;  %v1789_v20 = vsel %vm1754_vm10, %v1779_v31, 0.0  ;;  %v1762_v55 = vsel %vm1754_vm10, %v1733_v47, 0.0  ;;  %v1807_v47 = vld [vmem:[%s2386_s7] sm:$0x3] }
 0x30f   : > { %v1788_v7 = vadd.f32 %v1787_v38, %v1786_v33  ;;  %v1761_v52 = vadd.f32 %v1760_v41, %v1759_v23  ;;  %1750 = vst.msk [vmem:[%s2391_s14 + $0x10] sm:$0xf] %vm1745_vm11, %v1741_v32  ;;  %v1781_v46 = vmul.f32 %v1734_v5, %v1734_v5  ;;  %v1736_v57 = vadd.f32 %v2239_v12, %v1724_v37 }
 0x310   : > { %1751 = vst.msk [vmem:[%s2391_s14 + $0x14] sm:$0xf] %vm1745_vm11, %v1742_v36  ;;  %v1743_v60 = vpack.c.bf16 %v1735_v54, %v1735_v54  ;;  %v1791_v62 = vsel %vm1754_vm10, %v1780_v45, 0.0  ;;  %v1764_v63 = vsel %vm1754_vm10, %v1734_v5, 0.0  ;;  %v1782_v21 = vmul.f32 %v1735_v54, %v1735_v54 }
 0x311   : > { %v1790_v58 = vadd.f32 %v1789_v20, %v1788_v7  ;;  %v1763_v59 = vadd.f32 %v1762_v55, %v1761_v52  ;;  %1815 = vst.msk [vmem:[%s2909_s18 + $0x20] sm:$0xff] %vm1754_vm10, %v2295_v56  ;;  %v1744_v0 = vpack.c.bf16 %v1736_v57, %v1736_v57  ;;  %v1793_v17 = vsel %vm1754_vm10, %v1781_v46, 0.0 }
 0x312   : > { %1816 = vst.msk [vmem:[%s2909_s18 + $0x28] sm:$0xff] %vm1754_vm10, %v2295_v56  ;;  %v1766_v3 = vsel %vm1754_vm10, %v1735_v54, 0.0  ;;  %v1783_v4 = vmul.f32 %v1736_v57, %v1736_v57  ;;  %v1795_v61 = vsel %vm1754_vm10, %v1782_v21, 0.0  ;;  %v1768_v30 = vsel %vm1754_vm10, %v1736_v57, 0.0 }
 0x313   : > { %v1792_v2 = vadd.f32 %v1791_v62, %v1790_v58  ;;  %v1765_v50 = vadd.f32 %v1764_v63, %v1763_v59  ;;  %1752 = vst.msk [vmem:[%s2391_s14 + $0x18] sm:$0xf] %vm1745_vm11, %v1743_v60 }
 0x314   : > { %1753 = vst.msk [vmem:[%s2391_s14 + $0x1c] sm:$0xf] %vm1745_vm11, %v1744_v0  ;;  %v1797_v51 = vsel %vm1754_vm10, %v1783_v4, 0.0 }
 0x315   : > { %v1794_v6 = vadd.f32 %v1793_v17, %v1792_v2  ;;  %v1767_v9 = vadd.f32 %v1766_v3, %v1765_v50  ;;  %1817 = vst.msk [vmem:[%s2909_s18 + $0x30] sm:$0xff] %vm1754_vm10, %v2295_v56 }
 0x316   : > { %1818 = vst.msk [vmem:[%s2909_s18 + $0x38] sm:$0xff] %vm1754_vm10, %v2295_v56 }
 0x317   : > { %v1796_v10 = vadd.f32 %v1795_v61, %v1794_v6  ;;  %v1769_v11 = vadd.f32 %v1768_v30, %v1767_v9 }
 0x319   : > { %v1770_v43 = vrot.slane %v1769_v11, 4  ;;  %v1798_v12 = vadd.f32 %v1797_v51, %v1796_v10 }
 0x31b   : > { %v1771_v44 = vadd.f32 %v1770_v43, %v1769_v11  ;;  %v1799_v49 = vrot.slane %v1798_v12, 4 }
 0x31d   : > { %v1772_v13 = vrot.slane %v1771_v44, 2  ;;  %v1800_v15 = vadd.f32 %v1799_v49, %v1798_v12 }
 0x31f   : > { %v1773_v16 = vadd.f32 %v1772_v13, %v1771_v44  ;;  %v1801_v53 = vrot.slane %v1800_v15, 2 }
 0x321   : > { %v1774_v18 = vrot.slane %v1773_v16, 1  ;;  %v1802_v19 = vadd.f32 %v1801_v53, %v1800_v15 }
 0x323   : > { %v1803_v22 = vrot.slane %v1802_v19, 1  ;;  %v1775_v24 = vadd.f32 %v1774_v18, %v1773_v16 }
 0x325   : > { %v1804_v56 = vadd.f32 %v1803_v22, %v1802_v19 }
 0x327   : > { %v1806_v8 = vsel %vm1805_vm12, %v1775_v24, %v1804_v56 }
 0x328   : > { %v1808_v1 = vadd.f32 %v1807_v47, %v1806_v8 }
 0x32a   : > { %1810 = vst.msk [vmem:[%s2386_s7] sm:$0x3] %vm1809_vm13, %v1808_v1 }
 0x32b PF: > { %s17_s25 = sadd.s32 1, %s2281_s25   ;;  %s3008_s14 = sld [smem:[#allocation4_spill]] }
 0x32c   : > { %p14_p8 = scmp.ge.s32.totalorder %s17_s25, 12   ;;  %s3009_s21 = smov %s2273_s23 }
 0x32d   : > { %s3010_s22 = smov %s2277_s24  ;;  %s3011_s23 = smov %s3014_s26 }
 0x32e   :  { %16 = sbr.rel (!%p14_p8) target bundleno = 3 (0x3), region = 114 }
 0x331   : > { %s3012_s24 = smov %s3008_s14 }

</bundles_post_ra>
